<compile_context>
chip_gen: v7x
topology: tpu7x:2x2x1
jax: 0.10.0
libtpu: 0.0.40
codegen_flags: <defaults>
</compile_context>

<pallas_src>
import jax
import jax.numpy as jnp
from jax.experimental import pallas as pl
from jax.experimental.pallas import tpu as pltpu


def _round_up(x, m):
    return (x + m - 1) // m * m


def _pick_tile_m(m, bytes_per_row, cap=4096, budget=4 * 1024 * 1024, mult=16,
                 min_steps=2):
    """Row tile: multiple of 16, one input block under `budget`, >=2 grid steps
    when the row count allows (v7x megacore), minimal end-padding."""
    m_r = _round_up(m, mult)
    t = (budget // max(bytes_per_row, 1)) // mult * mult
    t = max(mult, min(t, cap, m_r))
    steps = -(-m_r // t)
    if m_r >= mult * min_steps:
        steps = max(steps, min_steps)
    return _round_up(-(-m_r // steps), mult)


# ----------------------------- Pallas kernels ------------------------------

def _conv_pool_kernel(a_ref, w_ref, b_ref, o_ref):
    """a: (4, TM, K) bf16   w: (K, N) bf16   b: (1, N) f32   o: (TM, N) bf16.

    Leading axis of `a` enumerates the 4 positions of the 2x2 max-pool window,
    so  relu(max_q(a_q @ w) + b)  ==  maxpool2x2(relu(conv(x) + b)).
    One long (4*TM, K) x (K, N) dot (single RHS load / MXU stream); the pool max
    is taken over sublane-aligned static row slices of the result.
    """
    q, tm, kp = a_ref.shape
    y = jnp.dot(a_ref[...].reshape(q * tm, kp), w_ref[...],
                preferred_element_type=jnp.float32)                 # (4*TM, N) f32
    m = jnp.maximum(jnp.maximum(y[0:tm], y[tm:2 * tm]),
                    jnp.maximum(y[2 * tm:3 * tm], y[3 * tm:4 * tm]))
    o_ref[...] = jnp.maximum(m + b_ref[...], 0.0).astype(o_ref.dtype)


def _fc_stack_kernel(x_ref, w1, b1, w2, b2, w3, b3, w4, b4, w5, b5, o_ref):
    """Five chained Linear layers (ReLU on the first four) fused in one kernel.
    x is bf16; matmul accumulation, bias and ReLU stay f32; logits out in f32."""
    h = x_ref[...].astype(jnp.bfloat16)
    for w_ref, b_ref in ((w1, b1), (w2, b2), (w3, b3), (w4, b4)):
        y = jnp.dot(h, w_ref[...], preferred_element_type=jnp.float32) + b_ref[...]
        h = jnp.maximum(y, 0.0).astype(jnp.bfloat16)
    o_ref[...] = jnp.dot(h, w5[...], preferred_element_type=jnp.float32) + b5[...]


# ------------------------------ Wrappers ------------------------------------

def conv_pool_relu(xc, w_prep, b_prep, kh=5, kw=5, cin=None):
    """Fused valid conv (stride 1) + bias + ReLU + 2x2/2 max-pool.

    xc: (B, H, W, C) channels-last.
    cin: if given, only the first `cin` input channels are gathered (the rest
         are exact zero padding from the previous layer).
    w_prep: (Kp, Np) bf16 with row order (i*kw + j)*cin + c, lane-dense Np.
    Returns (B, PH, PW, Np) bf16; padded channels are exact zeros.
    """
    B, H, W, C = xc.shape
    cu = C if cin is None else min(cin, C)
    OH, OW = H - kh + 1, W - kw + 1
    PH, PW = OH // 2, OW // 2
    K = kh * kw * cu
    Kp, Np = w_prep.shape

    # im2col grouped by pool-window position (dh, dw); feature order (i, j, c).
    # TODO(synk): move this patch extraction in-kernel (parity-split input + 25
    # small accumulating dots) to avoid materializing the im2col matrix in HBM
    # at large batch; at MNIST sizes the XLA glue is cheap.
    groups = []
    for dh in range(2):
        for dw in range(2):
            feats = []
            for i in range(kh):
                for j in range(kw):
                    r0, c0 = dh + i, dw + j
                    feats.append(
                        xc[:, r0:r0 + 2 * (PH - 1) + 1:2,
                              c0:c0 + 2 * (PW - 1) + 1:2, :cu])      # (B,PH,PW,cu)
            g = jnp.concatenate(feats, axis=-1)                      # (B,PH,PW,K)
            groups.append(g.reshape(B * PH * PW, K))
    a = jnp.stack(groups, axis=0)                                    # (4, M, K)
    if Kp > K:
        a = jnp.pad(a, ((0, 0), (0, 0), (0, Kp - K)))
    a = a.astype(jnp.bfloat16)

    M = B * PH * PW
    tile_m = _pick_tile_m(M, bytes_per_row=4 * Kp * 2)
    m_pad = _round_up(M, tile_m)
    if m_pad > M:
        a = jnp.pad(a, ((0, 0), (0, m_pad - M), (0, 0)))

    out = pl.pallas_call(
        _conv_pool_kernel,
        out_shape=jax.ShapeDtypeStruct((m_pad, Np), jnp.bfloat16),
        grid=(m_pad // tile_m,),
        in_specs=[
            pl.BlockSpec((4, tile_m, Kp), lambda i: (0, i, 0)),
            pl.BlockSpec((Kp, Np), lambda i: (0, 0)),
            pl.BlockSpec((1, Np), lambda i: (0, 0)),
        ],
        out_specs=pl.BlockSpec((tile_m, Np), lambda i: (i, 0)),
        compiler_params=pltpu.CompilerParams(dimension_semantics=("parallel",)),
    )(a, w_prep, b_prep)
    return out[:M].reshape(B, PH, PW, Np)


def fc_stack(x2d, fcs):
    """x2d: (B, Kin) bf16; fcs: five (weight bf16 (Kin_l, Nl), bias f32 (1, Nl))."""
    B, Kin = x2d.shape
    x2d = x2d.astype(jnp.bfloat16)
    tile_b = _pick_tile_m(B, bytes_per_row=Kin * 2, cap=512)
    b_pad = _round_up(B, tile_b)
    if b_pad > B:
        x2d = jnp.pad(x2d, ((0, b_pad - B), (0, 0)))
    n_out = fcs[-1][0].shape[1]

    operands = [x2d]
    in_specs = [pl.BlockSpec((tile_b, Kin), lambda i: (i, 0))]
    for w, b in fcs:
        operands += [w, b]
        in_specs += [pl.BlockSpec(w.shape, lambda i: (0, 0)),
                     pl.BlockSpec(b.shape, lambda i: (0, 0))]

    out = pl.pallas_call(
        _fc_stack_kernel,
        out_shape=jax.ShapeDtypeStruct((b_pad, n_out), jnp.float32),
        grid=(b_pad // tile_b,),
        in_specs=in_specs,
        out_specs=pl.BlockSpec((tile_b, n_out), lambda i: (i, 0)),
        compiler_params=pltpu.CompilerParams(dimension_semantics=("parallel",)),
    )(*operands)
    return out[:B]


# ------------------------------ Parameters ----------------------------------

C1_PAD = 128                              # conv1 out-channels 25 -> 128 (lane-dense store)
C1_USE = 32                               # channels actually fed into conv2 (25 -> 32)
C2_PAD = 128                              # conv2 out-channels 50 -> 128
FC_PAD = (512, 256, 128, 128, 128)        # fc1..fc5 padded output widths


def init_params(key):
    """Deterministic synthetic params (PyTorch-style uniform +-1/sqrt(fan_in))."""
    def uniform(k, shape, fan_in):
        bound = 1.0 / jnp.sqrt(float(fan_in))
        return jax.random.uniform(k, shape, jnp.float32, -bound, bound)

    keys = jax.random.split(key, 14)
    p = {}
    p["conv1_w"] = uniform(keys[0], (25, 1, 5, 5), 1 * 5 * 5)
    p["conv1_b"] = uniform(keys[1], (25,), 1 * 5 * 5)
    p["conv2_w"] = uniform(keys[2], (50, 25, 5, 5), 25 * 5 * 5)
    p["conv2_b"] = uniform(keys[3], (50,), 25 * 5 * 5)
    fc_dims = [(400, 800), (200, 400), (100, 200), (50, 100), (10, 50)]
    for n, (out_d, in_d) in enumerate(fc_dims, start=1):
        p[f"fc{n}_w"] = uniform(keys[2 + 2 * n], (out_d, in_d), in_d)
        p[f"fc{n}_b"] = uniform(keys[3 + 2 * n], (out_d,), in_d)
    return p


def prepare_params(p):
    """One-time (eager, outside jit) relayout: channels-last im2col row order,
    zero-padding to lane-dense (multiple-of-128) widths, bf16 MXU operands."""
    out = {}

    def prep_conv(w, b, cin_pad, cout_pad, k_pad=None):
        cout, cin, kh, kw = w.shape
        wt = jnp.transpose(w, (2, 3, 1, 0))                          # (kh,kw,cin,cout)
        wt = jnp.pad(wt, ((0, 0), (0, 0), (0, cin_pad - cin), (0, cout_pad - cout)))
        wt = wt.reshape(kh * kw * cin_pad, cout_pad)
        if k_pad is not None and k_pad > wt.shape[0]:
            wt = jnp.pad(wt, ((0, k_pad - wt.shape[0]), (0, 0)))
        bt = jnp.pad(b, (0, cout_pad - cout)).reshape(1, cout_pad)
        return wt.astype(jnp.bfloat16), bt.astype(jnp.float32)

    out["conv1_w"], out["conv1_b"] = prep_conv(
        p["conv1_w"], p["conv1_b"], cin_pad=1, cout_pad=C1_PAD, k_pad=_round_up(25, 8))
    # conv2 consumes only the first C1_USE (=32) channels of conv1's output
    # (channels 25..31 are exact zeros), so its im2col K is 5*5*32 = 800.
    out["conv2_w"], out["conv2_b"] = prep_conv(
        p["conv2_w"], p["conv2_b"], cin_pad=C1_USE, cout_pad=C2_PAD)

    # fc1 consumes the (B, 4, 4, C2_PAD) channels-last pooled activation: permute
    # its columns from PyTorch's (c, h, w) view(-1, 800) order to (h, w, c) + pad,
    # so the result is bit-identical to x.view(-1, 4*4*50) @ fc1_w.T semantics.
    w = p["fc1_w"].reshape(400, 50, 4, 4).transpose(2, 3, 1, 0)      # (4,4,50,400)
    w = jnp.pad(w, ((0, 0), (0, 0), (0, C2_PAD - 50), (0, FC_PAD[0] - 400)))
    out["fc1_w"] = w.reshape(4 * 4 * C2_PAD, FC_PAD[0]).astype(jnp.bfloat16)
    out["fc1_b"] = jnp.pad(p["fc1_b"], (0, FC_PAD[0] - 400)).reshape(1, -1).astype(jnp.float32)

    in_pads = (FC_PAD[0], FC_PAD[1], FC_PAD[2], FC_PAD[3])
    for n, in_pad, out_pad in zip(range(2, 6), in_pads, FC_PAD[1:]):
        w = p[f"fc{n}_w"]                                            # (out, in)
        o_d, i_d = w.shape
        out[f"fc{n}_w"] = jnp.pad(w.T, ((0, in_pad - i_d), (0, out_pad - o_d))).astype(jnp.bfloat16)
        out[f"fc{n}_b"] = jnp.pad(p[f"fc{n}_b"], (0, out_pad - o_d)).reshape(1, -1).astype(jnp.float32)
    return out


# ------------------------------ Forward --------------------------------------

def mnist_forward(pp, x):
    b = x.shape[0]
    xc = jnp.transpose(x, (0, 2, 3, 1))                      # NCHW -> NHWC (C=1)
    h = conv_pool_relu(xc, pp["conv1_w"], pp["conv1_b"])     # (B, 12, 12, 128) bf16
    h = conv_pool_relu(h, pp["conv2_w"], pp["conv2_b"],
                       cin=C1_USE)                           # (B, 4, 4, 128) bf16
    h = h.reshape(b, 4 * 4 * C2_PAD)                         # (B, 2048), zeros in pad
    logits = fc_stack(h, [(pp[f"fc{n}_w"], pp[f"fc{n}_b"]) for n in range(1, 6)])
    return logits[:, :10]                                    # drop lane padding


if __name__ == "__main__":
    key = jax.random.PRNGKey(0)
    pkey, xkey = jax.random.split(key)
    params = prepare_params(init_params(pkey))               # eager, one-time relayout
    # MNIST-style input: batch=2, 1 channel, 28x28 (required so flatten gives 800)
    x = jax.random.normal(xkey, (2, 1, 28, 28), dtype=jnp.float32)

    out = jax.jit(mnist_forward)(params, x)
    out = jax.block_until_ready(out)
    assert out.shape == (2, 10) and out.dtype == jnp.float32
    assert bool(jnp.all(jnp.isfinite(out)))
    print("KERNEL_OK")
</pallas_src>

<mosaic_0001>
module attributes {stable_mosaic.version = 11 : i64} {
  func.func @_conv_pool_kernel(%arg0: i32, %arg1: memref<4x144x32xbf16, #tpu.memory_space<vmem>>, %arg2: memref<32x128xbf16, #tpu.memory_space<vmem>>, %arg3: memref<1x128xf32, #tpu.memory_space<vmem>>, %arg4: memref<144x128xbf16, #tpu.memory_space<vmem>>) attributes {dimension_semantics = [#tpu.dimension_semantics<parallel>], iteration_bounds = array<i64: 2>, scalar_prefetch = 0 : i64, scratch_operands = 0 : i64, tpu.core_type = #tpu.core_type<tc>, window_params = [{transform_indices = @transform_0, window_bounds = array<i64: 4, 144, 32>}, {pipeline_mode = #tpu.pipeline_mode<synchronous>, transform_indices = @transform_1, window_bounds = array<i64: 32, 128>}, {pipeline_mode = #tpu.pipeline_mode<synchronous>, transform_indices = @transform_2, window_bounds = array<i64: 1, 128>}, {transform_indices = @transform_3, window_bounds = array<i64: 144, 128>}]} {
    %c0 = arith.constant 0 : index
    %c0_0 = arith.constant 0 : index
    %c0_1 = arith.constant 0 : index
    %0 = vector.load %arg1[%c0, %c0_0, %c0_1] : memref<4x144x32xbf16, #tpu.memory_space<vmem>>, vector<4x144x32xbf16>
    %1 = vector.shape_cast %0 : vector<4x144x32xbf16> to vector<576x32xbf16>
    %c0_2 = arith.constant 0 : index
    %c0_3 = arith.constant 0 : index
    %2 = vector.load %arg2[%c0_2, %c0_3] : memref<32x128xbf16, #tpu.memory_space<vmem>>, vector<32x128xbf16>
    %cst = arith.constant dense<0.000000e+00> : vector<576x128xf32>
    %3 = tpu.matmul %1, %2, %cst {dimension_numbers = #tpu.dot_dimension_numbers<[1], [0], [0], [1], [0, 0, 1, 1], [], []>} : vector<576x32xbf16>, vector<32x128xbf16>, vector<576x128xf32> -> vector<576x128xf32>
    %4 = vector.extract_strided_slice %3 {offsets = [0, 0], sizes = [144, 128], strides = [1, 1]} : vector<576x128xf32> to vector<144x128xf32>
    %5 = vector.extract_strided_slice %3 {offsets = [144, 0], sizes = [144, 128], strides = [1, 1]} : vector<576x128xf32> to vector<144x128xf32>
    %6 = arith.maximumf %4, %5 : vector<144x128xf32>
    %7 = vector.extract_strided_slice %3 {offsets = [288, 0], sizes = [144, 128], strides = [1, 1]} : vector<576x128xf32> to vector<144x128xf32>
    %8 = vector.extract_strided_slice %3 {offsets = [432, 0], sizes = [144, 128], strides = [1, 1]} : vector<576x128xf32> to vector<144x128xf32>
    %9 = arith.maximumf %7, %8 : vector<144x128xf32>
    %10 = arith.maximumf %6, %9 : vector<144x128xf32>
    %c0_4 = arith.constant 0 : index
    %c0_5 = arith.constant 0 : index
    %11 = vector.load %arg3[%c0_4, %c0_5] : memref<1x128xf32, #tpu.memory_space<vmem>>, vector<1x128xf32>
    %12 = vector.broadcast %11 : vector<1x128xf32> to vector<144x128xf32>
    %13 = arith.addf %10, %12 : vector<144x128xf32>
    %cst_6 = arith.constant 0.000000e+00 : f32
    %14 = vector.broadcast %cst_6 : f32 to vector<144x128xf32>
    %15 = arith.maximumf %13, %14 : vector<144x128xf32>
    %16 = arith.truncf %15 : vector<144x128xf32> to vector<144x128xbf16>
    %c0_7 = arith.constant 0 : index
    %c0_8 = arith.constant 0 : index
    %17 = vector.load %arg4[%c0_7, %c0_8] : memref<144x128xbf16, #tpu.memory_space<vmem>>, vector<144x128xbf16>
    tpu.vector_store %arg4[%c0_7, %c0_8], %16 {strides = array<i32>} : memref<144x128xbf16, #tpu.memory_space<vmem>>, vector<144x128xbf16>,
    return
  }
  func.func @transform_0(%arg0: i32) -> (i32, i32, i32) {
    %c0_i32 = arith.constant 0 : i32
    %c0_i32_0 = arith.constant 0 : i32
    %c0_i32_1 = arith.constant 0 : i32
    return %c0_i32, %arg0, %c0_i32_0 : i32, i32, i32
  }
  func.func @transform_1(%arg0: i32) -> (i32, i32) {
    %c0_i32 = arith.constant 0 : i32
    %c0_i32_0 = arith.constant 0 : i32
    %c0_i32_1 = arith.constant 0 : i32
    return %c0_i32, %c0_i32_0 : i32, i32
  }
  func.func @transform_2(%arg0: i32) -> (i32, i32) {
    %c0_i32 = arith.constant 0 : i32
    %c0_i32_0 = arith.constant 0 : i32
    %c0_i32_1 = arith.constant 0 : i32
    return %c0_i32, %c0_i32_0 : i32, i32
  }
  func.func @transform_3(%arg0: i32) -> (i32, i32) {
    %c0_i32 = arith.constant 0 : i32
    %c0_i32_0 = arith.constant 0 : i32
    return %arg0, %c0_i32 : i32, i32
  }
}

module attributes {stable_mosaic.version = 11 : i64} {
  func.func @_fc_stack_kernel(%arg0: i32, %arg1: memref<16x2048xbf16, #tpu.memory_space<vmem>>, %arg2: memref<2048x512xbf16, #tpu.memory_space<vmem>>, %arg3: memref<1x512xf32, #tpu.memory_space<vmem>>, %arg4: memref<512x256xbf16, #tpu.memory_space<vmem>>, %arg5: memref<1x256xf32, #tpu.memory_space<vmem>>, %arg6: memref<256x128xbf16, #tpu.memory_space<vmem>>, %arg7: memref<1x128xf32, #tpu.memory_space<vmem>>, %arg8: memref<128x128xbf16, #tpu.memory_space<vmem>>, %arg9: memref<1x128xf32, #tpu.memory_space<vmem>>, %arg10: memref<128x128xbf16, #tpu.memory_space<vmem>>, %arg11: memref<1x128xf32, #tpu.memory_space<vmem>>, %arg12: memref<16x128xf32, #tpu.memory_space<vmem>>) attributes {dimension_semantics = [#tpu.dimension_semantics<parallel>], iteration_bounds = array<i64: 1>, scalar_prefetch = 0 : i64, scratch_operands = 0 : i64, tpu.core_type = #tpu.core_type<tc>, window_params = [{transform_indices = @transform_0, window_bounds = array<i64: 16, 2048>}, {pipeline_mode = #tpu.pipeline_mode<synchronous>, transform_indices = @transform_1, window_bounds = array<i64: 2048, 512>}, {pipeline_mode = #tpu.pipeline_mode<synchronous>, transform_indices = @transform_2, window_bounds = array<i64: 1, 512>}, {pipeline_mode = #tpu.pipeline_mode<synchronous>, transform_indices = @transform_3, window_bounds = array<i64: 512, 256>}, {pipeline_mode = #tpu.pipeline_mode<synchronous>, transform_indices = @transform_4, window_bounds = array<i64: 1, 256>}, {pipeline_mode = #tpu.pipeline_mode<synchronous>, transform_indices = @transform_5, window_bounds = array<i64: 256, 128>}, {pipeline_mode = #tpu.pipeline_mode<synchronous>, transform_indices = @transform_6, window_bounds = array<i64: 1, 128>}, {pipeline_mode = #tpu.pipeline_mode<synchronous>, transform_indices = @transform_7, window_bounds = array<i64: 128, 128>}, {pipeline_mode = #tpu.pipeline_mode<synchronous>, transform_indices = @transform_8, window_bounds = array<i64: 1, 128>}, {pipeline_mode = #tpu.pipeline_mode<synchronous>, transform_indices = @transform_9, window_bounds = array<i64: 128, 128>}, {pipeline_mode = #tpu.pipeline_mode<synchronous>, transform_indices = @transform_10, window_bounds = array<i64: 1, 128>}, {transform_indices = @transform_11, window_bounds = array<i64: 16, 128>}]} {
    %c0 = arith.constant 0 : index
    %c0_0 = arith.constant 0 : index
    %0 = vector.load %arg1[%c0, %c0_0] : memref<16x2048xbf16, #tpu.memory_space<vmem>>, vector<16x2048xbf16>
    %c0_1 = arith.constant 0 : index
    %c0_2 = arith.constant 0 : index
    %1 = vector.load %arg2[%c0_1, %c0_2] : memref<2048x512xbf16, #tpu.memory_space<vmem>>, vector<2048x512xbf16>
    %cst = arith.constant dense<0.000000e+00> : vector<16x512xf32>
    %2 = tpu.matmul %0, %1, %cst {dimension_numbers = #tpu.dot_dimension_numbers<[1], [0], [0], [1], [0, 0, 1, 1], [], []>} : vector<16x2048xbf16>, vector<2048x512xbf16>, vector<16x512xf32> -> vector<16x512xf32>
    %c0_3 = arith.constant 0 : index
    %c0_4 = arith.constant 0 : index
    %3 = vector.load %arg3[%c0_3, %c0_4] : memref<1x512xf32, #tpu.memory_space<vmem>>, vector<1x512xf32>
    %4 = vector.broadcast %3 : vector<1x512xf32> to vector<16x512xf32>
    %5 = arith.addf %2, %4 : vector<16x512xf32>
    %cst_5 = arith.constant 0.000000e+00 : f32
    %6 = vector.broadcast %cst_5 : f32 to vector<16x512xf32>
    %7 = arith.maximumf %5, %6 : vector<16x512xf32>
    %8 = arith.truncf %7 : vector<16x512xf32> to vector<16x512xbf16>
    %c0_6 = arith.constant 0 : index
    %c0_7 = arith.constant 0 : index
    %9 = vector.load %arg4[%c0_6, %c0_7] : memref<512x256xbf16, #tpu.memory_space<vmem>>, vector<512x256xbf16>
    %cst_8 = arith.constant dense<0.000000e+00> : vector<16x256xf32>
    %10 = tpu.matmul %8, %9, %cst_8 {dimension_numbers = #tpu.dot_dimension_numbers<[1], [0], [0], [1], [0, 0, 1, 1], [], []>} : vector<16x512xbf16>, vector<512x256xbf16>, vector<16x256xf32> -> vector<16x256xf32>
    %c0_9 = arith.constant 0 : index
    %c0_10 = arith.constant 0 : index
    %11 = vector.load %arg5[%c0_9, %c0_10] : memref<1x256xf32, #tpu.memory_space<vmem>>, vector<1x256xf32>
    %12 = vector.broadcast %11 : vector<1x256xf32> to vector<16x256xf32>
    %13 = arith.addf %10, %12 : vector<16x256xf32>
    %cst_11 = arith.constant 0.000000e+00 : f32
    %14 = vector.broadcast %cst_11 : f32 to vector<16x256xf32>
    %15 = arith.maximumf %13, %14 : vector<16x256xf32>
    %16 = arith.truncf %15 : vector<16x256xf32> to vector<16x256xbf16>
    %c0_12 = arith.constant 0 : index
    %c0_13 = arith.constant 0 : index
    %17 = vector.load %arg6[%c0_12, %c0_13] : memref<256x128xbf16, #tpu.memory_space<vmem>>, vector<256x128xbf16>
    %cst_14 = arith.constant dense<0.000000e+00> : vector<16x128xf32>
    %18 = tpu.matmul %16, %17, %cst_14 {dimension_numbers = #tpu.dot_dimension_numbers<[1], [0], [0], [1], [0, 0, 1, 1], [], []>} : vector<16x256xbf16>, vector<256x128xbf16>, vector<16x128xf32> -> vector<16x128xf32>
    %c0_15 = arith.constant 0 : index
    %c0_16 = arith.constant 0 : index
    %19 = vector.load %arg7[%c0_15, %c0_16] : memref<1x128xf32, #tpu.memory_space<vmem>>, vector<1x128xf32>
    %20 = vector.broadcast %19 : vector<1x128xf32> to vector<16x128xf32>
    %21 = arith.addf %18, %20 : vector<16x128xf32>
    %cst_17 = arith.constant 0.000000e+00 : f32
    %22 = vector.broadcast %cst_17 : f32 to vector<16x128xf32>
    %23 = arith.maximumf %21, %22 : vector<16x128xf32>
    %24 = arith.truncf %23 : vector<16x128xf32> to vector<16x128xbf16>
    %c0_18 = arith.constant 0 : index
    %c0_19 = arith.constant 0 : index
    %25 = vector.load %arg8[%c0_18, %c0_19] : memref<128x128xbf16, #tpu.memory_space<vmem>>, vector<128x128xbf16>
    %cst_20 = arith.constant dense<0.000000e+00> : vector<16x128xf32>
    %26 = tpu.matmul %24, %25, %cst_20 {dimension_numbers = #tpu.dot_dimension_numbers<[1], [0], [0], [1], [0, 0, 1, 1], [], []>} : vector<16x128xbf16>, vector<128x128xbf16>, vector<16x128xf32> -> vector<16x128xf32>
    %c0_21 = arith.constant 0 : index
    %c0_22 = arith.constant 0 : index
    %27 = vector.load %arg9[%c0_21, %c0_22] : memref<1x128xf32, #tpu.memory_space<vmem>>, vector<1x128xf32>
    %28 = vector.broadcast %27 : vector<1x128xf32> to vector<16x128xf32>
    %29 = arith.addf %26, %28 : vector<16x128xf32>
    %cst_23 = arith.constant 0.000000e+00 : f32
    %30 = vector.broadcast %cst_23 : f32 to vector<16x128xf32>
    %31 = arith.maximumf %29, %30 : vector<16x128xf32>
    %32 = arith.truncf %31 : vector<16x128xf32> to vector<16x128xbf16>
    %c0_24 = arith.constant 0 : index
    %c0_25 = arith.constant 0 : index
    %33 = vector.load %arg10[%c0_24, %c0_25] : memref<128x128xbf16, #tpu.memory_space<vmem>>, vector<128x128xbf16>
    %cst_26 = arith.constant dense<0.000000e+00> : vector<16x128xf32>
    %34 = tpu.matmul %32, %33, %cst_26 {dimension_numbers = #tpu.dot_dimension_numbers<[1], [0], [0], [1], [0, 0, 1, 1], [], []>} : vector<16x128xbf16>, vector<128x128xbf16>, vector<16x128xf32> -> vector<16x128xf32>
    %c0_27 = arith.constant 0 : index
    %c0_28 = arith.constant 0 : index
    %35 = vector.load %arg11[%c0_27, %c0_28] : memref<1x128xf32, #tpu.memory_space<vmem>>, vector<1x128xf32>
    %36 = vector.broadcast %35 : vector<1x128xf32> to vector<16x128xf32>
    %37 = arith.addf %34, %36 : vector<16x128xf32>
    %c0_29 = arith.constant 0 : index
    %c0_30 = arith.constant 0 : index
    %38 = vector.load %arg12[%c0_29, %c0_30] : memref<16x128xf32, #tpu.memory_space<vmem>>, vector<16x128xf32>
    tpu.vector_store %arg12[%c0_29, %c0_30], %37 {strides = array<i32>} : memref<16x128xf32, #tpu.memory_space<vmem>>, vector<16x128xf32>,
    return
  }
  func.func @transform_0(%arg0: i32) -> (i32, i32) {
    %c0_i32 = arith.constant 0 : i32
    %c0_i32_0 = arith.constant 0 : i32
    return %arg0, %c0_i32 : i32, i32
  }
  func.func @transform_1(%arg0: i32) -> (i32, i32) {
    %c0_i32 = arith.constant 0 : i32
    %c0_i32_0 = arith.constant 0 : i32
    %c0_i32_1 = arith.constant 0 : i32
    return %c0_i32, %c0_i32_0 : i32, i32
  }
  func.func @transform_2(%arg0: i32) -> (i32, i32) {
    %c0_i32 = arith.constant 0 : i32
    %c0_i32_0 = arith.constant 0 : i32
    %c0_i32_1 = arith.constant 0 : i32
    return %c0_i32, %c0_i32_0 : i32, i32
  }
  func.func @transform_3(%arg0: i32) -> (i32, i32) {
    %c0_i32 = arith.constant 0 : i32
    %c0_i32_0 = arith.constant 0 : i32
    %c0_i32_1 = arith.constant 0 : i32
    return %c0_i32, %c0_i32_0 : i32, i32
  }
  func.func @transform_4(%arg0: i32) -> (i32, i32) {
    %c0_i32 = arith.constant 0 : i32
    %c0_i32_0 = arith.constant 0 : i32
    %c0_i32_1 = arith.constant 0 : i32
    return %c0_i32, %c0_i32_0 : i32, i32
  }
  func.func @transform_5(%arg0: i32) -> (i32, i32) {
    %c0_i32 = arith.constant 0 : i32
    %c0_i32_0 = arith.constant 0 : i32
    %c0_i32_1 = arith.constant 0 : i32
    return %c0_i32, %c0_i32_0 : i32, i32
  }
  func.func @transform_6(%arg0: i32) -> (i32, i32) {
    %c0_i32 = arith.constant 0 : i32
    %c0_i32_0 = arith.constant 0 : i32
    %c0_i32_1 = arith.constant 0 : i32
    return %c0_i32, %c0_i32_0 : i32, i32
  }
  func.func @transform_7(%arg0: i32) -> (i32, i32) {
    %c0_i32 = arith.constant 0 : i32
    %c0_i32_0 = arith.constant 0 : i32
    %c0_i32_1 = arith.constant 0 : i32
    return %c0_i32, %c0_i32_0 : i32, i32
  }
  func.func @transform_8(%arg0: i32) -> (i32, i32) {
    %c0_i32 = arith.constant 0 : i32
    %c0_i32_0 = arith.constant 0 : i32
    %c0_i32_1 = arith.constant 0 : i32
    return %c0_i32, %c0_i32_0 : i32, i32
  }
  func.func @transform_9(%arg0: i32) -> (i32, i32) {
    %c0_i32 = arith.constant 0 : i32
    %c0_i32_0 = arith.constant 0 : i32
    %c0_i32_1 = arith.constant 0 : i32
    return %c0_i32, %c0_i32_0 : i32, i32
  }
  func.func @transform_10(%arg0: i32) -> (i32, i32) {
    %c0_i32 = arith.constant 0 : i32
    %c0_i32_0 = arith.constant 0 : i32
    %c0_i32_1 = arith.constant 0 : i32
    return %c0_i32, %c0_i32_0 : i32, i32
  }
  func.func @transform_11(%arg0: i32) -> (i32, i32) {
    %c0_i32 = arith.constant 0 : i32
    %c0_i32_0 = arith.constant 0 : i32
    return %arg0, %c0_i32 : i32, i32
  }
}

module attributes {stable_mosaic.version = 11 : i64} {
  func.func @_conv_pool_kernel(%arg0: i32, %arg1: memref<4x16x800xbf16, #tpu.memory_space<vmem>>, %arg2: memref<800x128xbf16, #tpu.memory_space<vmem>>, %arg3: memref<1x128xf32, #tpu.memory_space<vmem>>, %arg4: memref<16x128xbf16, #tpu.memory_space<vmem>>) attributes {dimension_semantics = [#tpu.dimension_semantics<parallel>], iteration_bounds = array<i64: 2>, scalar_prefetch = 0 : i64, scratch_operands = 0 : i64, tpu.core_type = #tpu.core_type<tc>, window_params = [{transform_indices = @transform_0, window_bounds = array<i64: 4, 16, 800>}, {pipeline_mode = #tpu.pipeline_mode<synchronous>, transform_indices = @transform_1, window_bounds = array<i64: 800, 128>}, {pipeline_mode = #tpu.pipeline_mode<synchronous>, transform_indices = @transform_2, window_bounds = array<i64: 1, 128>}, {transform_indices = @transform_3, window_bounds = array<i64: 16, 128>}]} {
    %c0 = arith.constant 0 : index
    %c0_0 = arith.constant 0 : index
    %c0_1 = arith.constant 0 : index
    %0 = vector.load %arg1[%c0, %c0_0, %c0_1] : memref<4x16x800xbf16, #tpu.memory_space<vmem>>, vector<4x16x800xbf16>
    %1 = vector.shape_cast %0 : vector<4x16x800xbf16> to vector<64x800xbf16>
    %c0_2 = arith.constant 0 : index
    %c0_3 = arith.constant 0 : index
    %2 = vector.load %arg2[%c0_2, %c0_3] : memref<800x128xbf16, #tpu.memory_space<vmem>>, vector<800x128xbf16>
    %cst = arith.constant dense<0.000000e+00> : vector<64x128xf32>
    %3 = tpu.matmul %1, %2, %cst {dimension_numbers = #tpu.dot_dimension_numbers<[1], [0], [0], [1], [0, 0, 1, 1], [], []>} : vector<64x800xbf16>, vector<800x128xbf16>, vector<64x128xf32> -> vector<64x128xf32>
    %4 = vector.extract_strided_slice %3 {offsets = [0, 0], sizes = [16, 128], strides = [1, 1]} : vector<64x128xf32> to vector<16x128xf32>
    %5 = vector.extract_strided_slice %3 {offsets = [16, 0], sizes = [16, 128], strides = [1, 1]} : vector<64x128xf32> to vector<16x128xf32>
    %6 = arith.maximumf %4, %5 : vector<16x128xf32>
    %7 = vector.extract_strided_slice %3 {offsets = [32, 0], sizes = [16, 128], strides = [1, 1]} : vector<64x128xf32> to vector<16x128xf32>
    %8 = vector.extract_strided_slice %3 {offsets = [48, 0], sizes = [16, 128], strides = [1, 1]} : vector<64x128xf32> to vector<16x128xf32>
    %9 = arith.maximumf %7, %8 : vector<16x128xf32>
    %10 = arith.maximumf %6, %9 : vector<16x128xf32>
    %c0_4 = arith.constant 0 : index
    %c0_5 = arith.constant 0 : index
    %11 = vector.load %arg3[%c0_4, %c0_5] : memref<1x128xf32, #tpu.memory_space<vmem>>, vector<1x128xf32>
    %12 = vector.broadcast %11 : vector<1x128xf32> to vector<16x128xf32>
    %13 = arith.addf %10, %12 : vector<16x128xf32>
    %cst_6 = arith.constant 0.000000e+00 : f32
    %14 = vector.broadcast %cst_6 : f32 to vector<16x128xf32>
    %15 = arith.maximumf %13, %14 : vector<16x128xf32>
    %16 = arith.truncf %15 : vector<16x128xf32> to vector<16x128xbf16>
    %c0_7 = arith.constant 0 : index
    %c0_8 = arith.constant 0 : index
    %17 = vector.load %arg4[%c0_7, %c0_8] : memref<16x128xbf16, #tpu.memory_space<vmem>>, vector<16x128xbf16>
    tpu.vector_store %arg4[%c0_7, %c0_8], %16 {strides = array<i32>} : memref<16x128xbf16, #tpu.memory_space<vmem>>, vector<16x128xbf16>,
    return
  }
  func.func @transform_0(%arg0: i32) -> (i32, i32, i32) {
    %c0_i32 = arith.constant 0 : i32
    %c0_i32_0 = arith.constant 0 : i32
    %c0_i32_1 = arith.constant 0 : i32
    return %c0_i32, %arg0, %c0_i32_0 : i32, i32, i32
  }
  func.func @transform_1(%arg0: i32) -> (i32, i32) {
    %c0_i32 = arith.constant 0 : i32
    %c0_i32_0 = arith.constant 0 : i32
    %c0_i32_1 = arith.constant 0 : i32
    return %c0_i32, %c0_i32_0 : i32, i32
  }
  func.func @transform_2(%arg0: i32) -> (i32, i32) {
    %c0_i32 = arith.constant 0 : i32
    %c0_i32_0 = arith.constant 0 : i32
    %c0_i32_1 = arith.constant 0 : i32
    return %c0_i32, %c0_i32_0 : i32, i32
  }
  func.func @transform_3(%arg0: i32) -> (i32, i32) {
    %c0_i32 = arith.constant 0 : i32
    %c0_i32_0 = arith.constant 0 : i32
    return %arg0, %c0_i32 : i32, i32
  }
}

</mosaic_0001>

<bundles_post_ra>
// kernel: mnist_forward.3
= control target key start
LH: loop header
LB: loop body
LE: loop exit
PB: predicated region body
PF: predicated region fallthrough
CT: control target
= control target key end

     0   :  { %s1847_s12 = smov 0   ;;  %s1849_s13 = smov 0   ;;  %s2179_s0 = inlined_call_operand.vmem [shape: bf16[4,288,32], index: 0, kind: input, shape index: {}]   ;;  %s2180_s1 = inlined_call_operand.vmem [shape: bf16[32,128], index: 1, kind: input, shape index: {}]   ;;  %s2181_s2 = inlined_call_operand.vmem [shape: f32[1,128], index: 2, kind: input, shape index: {}]   ;;  %s2182_s3 = inlined_call_operand.vmem [shape: bf16[288,128], index: 3, kind: output, shape index: {}]  }
   0x1   :  { %s1851_s14 = smov 0  }
   0x2 LB: > { %s1447_s15 = sadd.s32 4294967295, %s1825_s14   ;;  %s1864_s16 = sadd.s32 1, %s1825_s14   ;;  %s1825_s14 = sphi %s1851_s14, %s2185_s14   ;;  %s1821_s13 = sphi %s1849_s13, %s2184_s13   ;;  %s1817_s12 = sphi %s1847_s12, %s2183_s12  }
   0x3   : > { %s17_s17 = ssub.s32 %s1825_s14, %s1864_s16  ;;  %s20_s18 = sadd.s32 1, %s1821_s13 }
   0x4   : > { %p18_p0 = scmp.eq.s32.totalorder %s17_s17, 0  ;;  %p27_p1 = scmp.ne.s32.totalorder %s1821_s13, %s1817_s12 }
   0x5   : > { %p28_p2 = scmp.eq.s32.totalorder %s1825_s14, 0  ;;  %p1450_p4 = scmp.ge.s32.totalorder %s1825_s14, 2 }
   0x6   : > { %s1873_s19 = scalar_select %p18_p0, %s1821_s13, %s20_s18  }
   0x7   : > { %p29_p3 = por %p28_p2, %p27_p1  ;;  %127 = sbr.rel (%p1450_p4) target bundleno = 37 (0x25), region = 24 }
   0xe   : > { %130 = sbr.rel (!%p29_p3) target bundleno = 37 (0x25), region = 28  ;;  %s132_s20 = sand.u32 (%p29_p3), 1, %s1821_s13  }
   0xf   : > { %s1549_s21 = smul.u32 (%p29_p3), 72, %s1825_s14 }
  0x10   : > { %s1739_s22 = smul.u32 (%p29_p3), 288, %s132_s20 }
  0x11   : > { %s1881_s25 = scalar_lea.vmem (%p29_p3), %s2179_s0, %s1549_s21 }
  0x12   : > { %v153_v0 = vld [vmem:[%s1881_s25] sm:$0xff] (%p29_p3)   ;;  %v157_v1 = vld [vmem:[%s1881_s25 + $0x8] sm:$0xff] (%p29_p3)   ;;  %v161_v2 = vld [vmem:[%s1881_s25 + $0x10] sm:$0xff] (%p29_p3)   ;;  %s1886_s26 = scalar_lea.vmem (%p29_p3), [#allocation2], %s1739_s22 }
  0x13   : > { %154 = vst [vmem:[%s1886_s26] sm:$0xff] (%p29_p3), %v153_v0   ;;  %158 = vst [vmem:[%s1886_s26 + $0x8] sm:$0xff] (%p29_p3), %v157_v1   ;;  %v165_v3 = vld [vmem:[%s1881_s25 + $0x18] sm:$0xff] (%p29_p3)   ;;  %v169_v4 = vld [vmem:[%s1881_s25 + $0x20] sm:$0xff] (%p29_p3)  }
  0x14   : > { %162 = vst [vmem:[%s1886_s26 + $0x10] sm:$0xff] (%p29_p3), %v161_v2   ;;  %v173_v5 = vld [vmem:[%s1881_s25 + $0x28] sm:$0xff] (%p29_p3)   ;;  %166 = vst [vmem:[%s1886_s26 + $0x18] sm:$0xff] (%p29_p3), %v165_v3   ;;  %v177_v6 = vld [vmem:[%s1881_s25 + $0x30] sm:$0xff] (%p29_p3)  }
  0x15   : > { %170 = vst [vmem:[%s1886_s26 + $0x20] sm:$0xff] %v169_v4   ;;  %174 = vst [vmem:[%s1886_s26 + $0x28] sm:$0xff] %v173_v5   ;;  %v181_v7 = vld [vmem:[%s1881_s25 + $0x38] sm:$0xff]   ;;  %v185_v8 = vld [vmem:[%s1881_s25 + $0x40] sm:$0xff]  }
  0x16   : > { %178 = vst [vmem:[%s1886_s26 + $0x30] sm:$0xff] %v177_v6   ;;  %182 = vst [vmem:[%s1886_s26 + $0x38] sm:$0xff] %v181_v7   ;;  %v189_v9 = vld [vmem:[%s1881_s25 + $0x90] sm:$0xff]   ;;  %v193_v10 = vld [vmem:[%s1881_s25 + $0x98] sm:$0xff]  }
  0x17   : > { %186 = vst [vmem:[%s1886_s26 + $0x40] sm:$0xff] %v185_v8   ;;  %v197_v11 = vld [vmem:[%s1881_s25 + $0xa0] sm:$0xff]   ;;  %190 = vst [vmem:[%s1886_s26 + $0x48] sm:$0xff] %v189_v9   ;;  %v201_v12 = vld [vmem:[%s1881_s25 + $0xa8] sm:$0xff]  }
  0x18   : > { %194 = vst [vmem:[%s1886_s26 + $0x50] sm:$0xff] %v193_v10   ;;  %198 = vst [vmem:[%s1886_s26 + $0x58] sm:$0xff] %v197_v11   ;;  %v205_v13 = vld [vmem:[%s1881_s25 + $0xb0] sm:$0xff]   ;;  %v209_v14 = vld [vmem:[%s1881_s25 + $0xb8] sm:$0xff]  }
  0x19   : > { %202 = vst [vmem:[%s1886_s26 + $0x60] sm:$0xff] %v201_v12   ;;  %206 = vst [vmem:[%s1886_s26 + $0x68] sm:$0xff] %v205_v13   ;;  %v213_v15 = vld [vmem:[%s1881_s25 + $0xc0] sm:$0xff]   ;;  %v217_v16 = vld [vmem:[%s1881_s25 + $0xc8] sm:$0xff]  }
  0x1a   : > { %210 = vst [vmem:[%s1886_s26 + $0x70] sm:$0xff] %v209_v14   ;;  %v221_v17 = vld [vmem:[%s1881_s25 + $0xd0] sm:$0xff]   ;;  %214 = vst [vmem:[%s1886_s26 + $0x78] sm:$0xff] %v213_v15   ;;  %v225_v18 = vld [vmem:[%s1881_s25 + $0x120] sm:$0xff]  }
  0x1b   : > { %218 = vst [vmem:[%s1886_s26 + $0x80] sm:$0xff] %v217_v16   ;;  %222 = vst [vmem:[%s1886_s26 + $0x88] sm:$0xff] %v221_v17   ;;  %v229_v19 = vld [vmem:[%s1881_s25 + $0x128] sm:$0xff]   ;;  %v233_v20 = vld [vmem:[%s1881_s25 + $0x130] sm:$0xff]  }
  0x1c   : > { %226 = vst [vmem:[%s1886_s26 + $0x90] sm:$0xff] %v225_v18   ;;  %230 = vst [vmem:[%s1886_s26 + $0x98] sm:$0xff] %v229_v19   ;;  %v237_v21 = vld [vmem:[%s1881_s25 + $0x138] sm:$0xff]   ;;  %v241_v22 = vld [vmem:[%s1881_s25 + $0x140] sm:$0xff]  }
  0x1d   : > { %234 = vst [vmem:[%s1886_s26 + $0xa0] sm:$0xff] %v233_v20   ;;  %v245_v23 = vld [vmem:[%s1881_s25 + $0x148] sm:$0xff]   ;;  %238 = vst [vmem:[%s1886_s26 + $0xa8] sm:$0xff] %v237_v21   ;;  %v249_v24 = vld [vmem:[%s1881_s25 + $0x150] sm:$0xff]  }
  0x1e   : > { %242 = vst [vmem:[%s1886_s26 + $0xb0] sm:$0xff] %v241_v22   ;;  %246 = vst [vmem:[%s1886_s26 + $0xb8] sm:$0xff] %v245_v23   ;;  %v253_v25 = vld [vmem:[%s1881_s25 + $0x158] sm:$0xff]   ;;  %v257_v26 = vld [vmem:[%s1881_s25 + $0x160] sm:$0xff]  }
  0x1f   : > { %250 = vst [vmem:[%s1886_s26 + $0xc0] sm:$0xff] %v249_v24   ;;  %254 = vst [vmem:[%s1886_s26 + $0xc8] sm:$0xff] %v253_v25   ;;  %v261_v27 = vld [vmem:[%s1881_s25 + $0x1b0] sm:$0xff]   ;;  %v265_v28 = vld [vmem:[%s1881_s25 + $0x1b8] sm:$0xff]  }
  0x20   : > { %258 = vst [vmem:[%s1886_s26 + $0xd0] sm:$0xff] %v257_v26   ;;  %v269_v29 = vld [vmem:[%s1881_s25 + $0x1c0] sm:$0xff]   ;;  %262 = vst [vmem:[%s1886_s26 + $0xd8] sm:$0xff] %v261_v27   ;;  %v273_v30 = vld [vmem:[%s1881_s25 + $0x1c8] sm:$0xff]  }
  0x21   : > { %266 = vst [vmem:[%s1886_s26 + $0xe0] sm:$0xff] %v265_v28   ;;  %270 = vst [vmem:[%s1886_s26 + $0xe8] sm:$0xff] %v269_v29   ;;  %v277_v31 = vld [vmem:[%s1881_s25 + $0x1d0] sm:$0xff]   ;;  %v281_v32 = vld [vmem:[%s1881_s25 + $0x1d8] sm:$0xff]  }
  0x22   : > { %274 = vst [vmem:[%s1886_s26 + $0xf0] sm:$0xff] %v273_v30   ;;  %278 = vst [vmem:[%s1886_s26 + $0xf8] sm:$0xff] %v277_v31   ;;  %v285_v33 = vld [vmem:[%s1881_s25 + $0x1e0] sm:$0xff]   ;;  %v289_v34 = vld [vmem:[%s1881_s25 + $0x1e8] sm:$0xff]  }
  0x23   : > { %282 = vst [vmem:[%s1886_s26 + $0x100] sm:$0xff] %v281_v32   ;;  %v293_v35 = vld [vmem:[%s1881_s25 + $0x1f0] sm:$0xff]   ;;  %286 = vst [vmem:[%s1886_s26 + $0x108] sm:$0xff] %v285_v33  }
  0x24   : > { %290 = vst [vmem:[%s1886_s26 + $0x110] sm:$0xff] %v289_v34   ;;  %294 = vst [vmem:[%s1886_s26 + $0x118] sm:$0xff] %v293_v35  }
  0x25 PF: > { %p1452_p5 = scmp.ge.s32.totalorder %s1825_s14, 1  ;;  %p462_p6 = scmp.lt.s32.totalorder %s1825_s14, 3 }
  0x27   : > { %p463_p7 = pnand %p1452_p5, %p462_p6 }
  0x28   : > { %v1765_v36 = vld [vmem:[%s2180_s1] sm:$0xff] (!%p463_p7)   ;;  %s469_s29 = sand.u32 (!%p463_p7), 1, %s1817_s12   ;;  %v1766_v37 = vld [vmem:[%s2180_s1 + $0x8] sm:$0xff] (!%p463_p7)   ;;  %vm768_vm0 = vcmask (!%p463_p7), 261120   ;;  %s493_s7 = smul.u32 (!%p463_p7), 18, %s1447_s15 }
  0x29   : > { %466 = sbr.rel (%p463_p7) target bundleno = 340 (0x154), region = 69  ;;  %1659 = vmatprep.subr.bf16.mxu0 (!%p463_p7), %v1765_v36  ;;  %1735 = vmatprep.subr.bf16.mxu1 (!%p463_p7), %v1765_v36 }
  0x2a   : > { %s1740_s5 = smul.u32 (!%p463_p7), 288, %s469_s29  ;;  %1660 = vmatpush3.bf16.msra.mxu0 (!%p463_p7), %v1765_v36  ;;  %1737 = vmatpush3.bf16.msra.mxu1 (!%p463_p7), %v1765_v36  ;;  %p494_p8 = scmp.lt.s32.totalorder (!%p463_p7), %s493_s7, 35 }
  0x2b   : > { %1661 = vmatprep.subr.bf16.mxu0 (!%p463_p7), %v1766_v37  ;;  %1736 = vmatprep.subr.bf16.mxu1 (!%p463_p7), %v1766_v37 }
  0x2c   : > { %s1966_s6 = scalar_lea.vmem (!%p463_p7), [#allocation2], %s1740_s5 }
  0x2d   : > { %v1767_v38 = vld [vmem:[%s1966_s6] sm:$0xff] (!%p463_p7)   ;;  %v1768_v39 = vld [vmem:[%s1966_s6 + $0x90] sm:$0xff] (!%p463_p7)   ;;  %v1769_v40 = vld [vmem:[%s1966_s6 + $0x8] sm:$0xff] (!%p463_p7)  }
  0x2e   : > { %1663 = vmatprep.mubr.msk.bf16.mxu0 (!%p463_p7), %vm768_vm0, %v1767_v38  ;;  %1662 = vmatpush3.bf16.msra.mxu0 (!%p463_p7), %v1766_v37  ;;  %v1770_v41 = vld [vmem:[%s1966_s6 + $0x98] sm:$0xff] (!%p463_p7)   ;;  %v1771_v42 = vld [vmem:[%s1966_s6 + $0x10] sm:$0xff] (!%p463_p7)   ;;  %v1772_v43 = vld [vmem:[%s1966_s6 + $0xa0] sm:$0xff] (!%p463_p7)  }
  0x2f   : > { %1738 = vmatpush3.bf16.msra.mxu1 (!%p463_p7), %v1766_v37  ;;  %1699 = vmatprep.mubr.msk.bf16.mxu1 (!%p463_p7), %vm768_vm0, %v1768_v39  ;;  %v1773_v44 = vld [vmem:[%s1966_s6 + $0x18] sm:$0xff] (!%p463_p7)   ;;  %v1774_v45 = vld [vmem:[%s1966_s6 + $0xa8] sm:$0xff] (!%p463_p7)   ;;  %v1775_v46 = vld [vmem:[%s1966_s6 + $0x20] sm:$0xff] (!%p463_p7)  }
  0x30   : > { %v1776_v47 = vld [vmem:[%s1966_s6 + $0xb0] sm:$0xff]   ;;  %v1777_v48 = vld [vmem:[%s1966_s6 + $0x28] sm:$0xff]   ;;  %v1778_v49 = vld [vmem:[%s1966_s6 + $0xb8] sm:$0xff]   ;;  %s2187_s7 = smov (!%p494_p8, %s493_s7), 35 }
  0x31   : > { %1664 = vmatmul.mubr.msk.bf16.vlgmr.msra.gmra.mrb[0].mxu0 %vm768_vm0, %v1769_v40  ;;  %v1779_v50 = vld [vmem:[%s1966_s6 + $0x30] sm:$0xff]   ;;  %v1780_v51 = vld [vmem:[%s1966_s6 + $0xc0] sm:$0xff]   ;;  %v1781_v52 = vld [vmem:[%s1966_s6 + $0x38] sm:$0xff]   ;;  %s1453_s10 = sshll.u32 %s2187_s7, 2 }
  0x32   : > { %1700 = vmatmul.mubr.msk.bf16.vlgmr.msra.gmra.mrb[0].mxu1 %vm768_vm0, %v1770_v41  ;;  %1667 = vmatprep.mubr.msk.bf16.mxu0 %vm768_vm0, %v1771_v42  ;;  %v1782_v53 = vld [vmem:[%s1966_s6 + $0xc8] sm:$0xff]   ;;  %v1783_v54 = vld [vmem:[%s1966_s6 + $0x40] sm:$0xff]   ;;  %v1784_v55 = vld [vmem:[%s1966_s6 + $0xd0] sm:$0xff]   ;;  %s2112_s14 = scalar_lea.vmem %s2182_s3, %s1453_s10 }
  0x33   : > { %1703 = vmatprep.mubr.msk.bf16.mxu1 %vm768_vm0, %v1772_v43  ;;  %v1785_v56 = vld [vmem:[%s1966_s6 + $0x48] sm:$0xff]   ;;  %v1786_v57 = vld [vmem:[%s1966_s6 + $0xd8] sm:$0xff]   ;;  %v1787_v58 = vld [vmem:[%s1966_s6 + $0x50] sm:$0xff]  }
  0x34   : > { %v1788_v59 = vld [vmem:[%s1966_s6 + $0xe0] sm:$0xff]   ;;  %v1789_v60 = vld [vmem:[%s1966_s6 + $0x58] sm:$0xff]   ;;  %v1790_v61 = vld [vmem:[%s1966_s6 + $0xe8] sm:$0xff]  }
  0x35   : > { %v1791_v62 = vld [vmem:[%s1966_s6 + $0x60] sm:$0xff]   ;;  %v1792_v63 = vld [vmem:[%s1966_s6 + $0xf0] sm:$0xff]   ;;  %v1793_v0 = vld [vmem:[%s1966_s6 + $0x68] sm:$0xff]  }
  0x36   : > { %v1794_v1 = vld [vmem:[%s1966_s6 + $0xf8] sm:$0xff]   ;;  %v1795_v2 = vld [vmem:[%s1966_s6 + $0x70] sm:$0xff]   ;;  %v1796_v3 = vld [vmem:[%s1966_s6 + $0x100] sm:$0xff]  }
  0x37   : > { %v1797_v4 = vld [vmem:[%s1966_s6 + $0x78] sm:$0xff]   ;;  %v1798_v5 = vld [vmem:[%s1966_s6 + $0x108] sm:$0xff]   ;;  %v1799_v6 = vld [vmem:[%s1966_s6 + $0x80] sm:$0xff]  }
  0x38   : > { %v1800_v7 = vld [vmem:[%s1966_s6 + $0x110] sm:$0xff]   ;;  %v1801_v8 = vld [vmem:[%s1966_s6 + $0x88] sm:$0xff]   ;;  %v1802_v9 = vld [vmem:[%s1966_s6 + $0x118] sm:$0xff]  }
  0x39   : > { %1668 = vmatmul.mubr.msk.bf16.gmra.mrb[4].mxu0 %vm768_vm0, %v1773_v44 }
  0x3a   : > { %1704 = vmatmul.mubr.msk.bf16.gmra.mrb[4].mxu1 %vm768_vm0, %v1774_v45  ;;  %1671 = vmatprep.mubr.msk.bf16.mxu0 %vm768_vm0, %v1775_v46 }
  0x3b   : > { %1707 = vmatprep.mubr.msk.bf16.mxu1 %vm768_vm0, %v1776_v47 }
  0x41   : > { %1672 = vmatmul.mubr.msk.bf16.gmra.mrb[8].mxu0 %vm768_vm0, %v1777_v48  ;;  %v2101_v48 = vld [vmem:[%s2181_s2] ss:$0 sm:$0xff] }
  0x42   : > { %1708 = vmatmul.mubr.msk.bf16.gmra.mrb[8].mxu1 %vm768_vm0, %v1778_v49  ;;  %1675 = vmatprep.mubr.msk.bf16.mxu0 %vm768_vm0, %v1779_v50 }
  0x43   : > { %1711 = vmatprep.mubr.msk.bf16.mxu1 %vm768_vm0, %v1780_v51 }
  0x49   : > { %1676 = vmatmul.mubr.msk.bf16.gmra.mrb[12].mxu0 %vm768_vm0, %v1781_v52 }
  0x4a   : > { %1712 = vmatmul.mubr.msk.bf16.gmra.mrb[12].mxu1 %vm768_vm0, %v1782_v53  ;;  %1679 = vmatprep.mubr.msk.bf16.mxu0 %vm768_vm0, %v1783_v54 }
  0x4b   : > { %1715 = vmatprep.mubr.msk.bf16.mxu1 %vm768_vm0, %v1784_v55 }
  0x51   : > { %1680 = vmatmul.mubr.msk.bf16.gmra.mrb[16].mxu0 %vm768_vm0, %v1785_v56 }
  0x52   : > { %1716 = vmatmul.mubr.msk.bf16.gmra.mrb[16].mxu1 %vm768_vm0, %v1786_v57  ;;  %1683 = vmatprep.mubr.msk.bf16.mxu0 %vm768_vm0, %v1787_v58 }
  0x53   : > { %1719 = vmatprep.mubr.msk.bf16.mxu1 %vm768_vm0, %v1788_v59 }
  0x59   : > { %1684 = vmatmul.mubr.msk.bf16.gmra.mrb[20].mxu0 %vm768_vm0, %v1789_v60 }
  0x5a   : > { %1720 = vmatmul.mubr.msk.bf16.gmra.mrb[20].mxu1 %vm768_vm0, %v1790_v61  ;;  %1687 = vmatprep.mubr.msk.bf16.mxu0 %vm768_vm0, %v1791_v62 }
  0x5b   : > { %1723 = vmatprep.mubr.msk.bf16.mxu1 %vm768_vm0, %v1792_v63 }
  0x61   : > { %1688 = vmatmul.mubr.msk.bf16.gmra.mrb[24].mxu0 %vm768_vm0, %v1793_v0 }
  0x62   : > { %1724 = vmatmul.mubr.msk.bf16.gmra.mrb[24].mxu1 %vm768_vm0, %v1794_v1  ;;  %1691 = vmatprep.mubr.msk.bf16.mxu0 %vm768_vm0, %v1795_v2 }
  0x63   : > { %1727 = vmatprep.mubr.msk.bf16.mxu1 %vm768_vm0, %v1796_v3 }
  0x69   : > { %1692 = vmatmul.mubr.msk.bf16.gmra.mrb[28].mxu0 %vm768_vm0, %v1797_v4 }
  0x6a   : > { %1728 = vmatmul.mubr.msk.bf16.gmra.mrb[28].mxu1 %vm768_vm0, %v1798_v5  ;;  %1695 = vmatprep.mubr.msk.bf16.mxu0 %vm768_vm0, %v1799_v6 }
  0x6b   : > { %1731 = vmatprep.mubr.msk.bf16.mxu1 %vm768_vm0, %v1800_v7 }
  0x71   : > { %1696 = vmatmul.mubr.msk.bf16.gmra.mrb[32].mxu0 %vm768_vm0, %v1801_v8 }
  0x72   : > { %1732 = vmatmul.mubr.msk.bf16.gmra.mrb[32].mxu1 %vm768_vm0, %v1802_v9 }
 0x104   : > { %v2040_v10 = vpop.f32.mrb[0].mxu0 }
 0x105   : > { %v2042_v11 = vpop.f32.mrb[0].mxu1  ;;  %v911_v12 = vpop.f32.mrb[1].mxu0 }
 0x106   : > { %v1055_v13 = vpop.f32.mrb[1].mxu1  ;;  %v2044_v14 = vpop.f32.mrb[2].mxu0 }
 0x107   : > { %v2046_v15 = vpop.f32.mrb[2].mxu1  ;;  %v914_v16 = vpop.f32.mrb[3].mxu0 }
 0x108   : > { %v1058_v17 = vpop.f32.mrb[3].mxu1 }
 0x10c   : > { %v2048_v18 = vpop.f32.mrb[4].mxu0 }
 0x10d   : > { %v2050_v19 = vpop.f32.mrb[4].mxu1  ;;  %v927_v20 = vpop.f32.mrb[5].mxu0 }
 0x10e   : > { %v1071_v21 = vpop.f32.mrb[5].mxu1  ;;  %v2052_v22 = vpop.f32.mrb[6].mxu0 }
 0x10f   : > { %v2054_v23 = vpop.f32.mrb[6].mxu1  ;;  %v2056_v24 = vpop.f32.mrb[7].mxu0 }
 0x110   : > { %v2058_v25 = vpop.f32.mrb[7].mxu1 }
 0x114   : > { %v2060_v26 = vpop.f32.mrb[8].mxu0 }
 0x115   : > { %v2062_v27 = vpop.f32.mrb[8].mxu1  ;;  %v2064_v28 = vpop.f32.mrb[9].mxu0 }
 0x116   : > { %v2066_v29 = vpop.f32.mrb[9].mxu1  ;;  %v2068_v30 = vpop.f32.mrb[10].mxu0 }
 0x117   : > { %v2070_v31 = vpop.f32.mrb[10].mxu1  ;;  %v2072_v32 = vpop.f32.mrb[11].mxu0 }
 0x118   : > { %v2074_v33 = vpop.f32.mrb[11].mxu1 }
 0x11c   : > { %v2076_v34 = vpop.f32.mrb[12].mxu0 }
 0x11d   : > { %v2078_v35 = vpop.f32.mrb[12].mxu1  ;;  %v2080_v36 = vpop.f32.mrb[13].mxu0 }
 0x11e   : > { %v2082_v37 = vpop.f32.mrb[13].mxu1  ;;  %v2084_v38 = vpop.f32.mrb[14].mxu0 }
 0x11f   : > { %v2086_v39 = vpop.f32.mrb[14].mxu1  ;;  %v2088_v40 = vpop.f32.mrb[15].mxu0 }
 0x120   : > { %v2090_v41 = vpop.f32.mrb[15].mxu1 }
 0x124   : > { %v1681_v42 = vpop.f32.mrb[16].mxu0 }
 0x125   : > { %v1717_v43 = vpop.f32.mrb[16].mxu1  ;;  %v1198_v44 = vmax.f32 %v911_v12, %v1681_v42  ;;  %v2094_v46 = vpop.f32.mrb[17].mxu0 }
 0x126   : > { %v1216_v45 = vmax.f32 %v1055_v13, %v1717_v43  ;;  %v2096_v47 = vpop.f32.mrb[17].mxu1  ;;  %v1682_v49 = vpop.f32.mrb[18].mxu0 }
 0x127   : > { %v1718_v50 = vpop.f32.mrb[18].mxu1  ;;  %v1199_v52 = vmax.f32 %v914_v16, %v1682_v49  ;;  %v2103_v54 = vpop.f32.mrb[19].mxu0 }
 0x128   : > { %v1234_v51 = vmax.f32 %v1198_v44, %v1216_v45  ;;  %v1217_v53 = vmax.f32 %v1058_v17, %v1718_v50  ;;  %v2105_v55 = vpop.f32.mrb[19].mxu1 }
 0x12a   : > { %v1259_v56 = vadd.f32 %v2101_v48, %v1234_v51  ;;  %v1235_v57 = vmax.f32 %v1199_v52, %v1217_v53 }
 0x12c   : > { %v1260_v58 = vadd.f32 %v2101_v48, %v1235_v57  ;;  %v1685_v59 = vpop.f32.mrb[20].mxu0  ;;  %v1277_v61 = vmax.f32 %v1259_v56, 0.0 }
 0x12d   : > { %v1721_v60 = vpop.f32.mrb[20].mxu1  ;;  %v1202_v63 = vmax.f32 %v927_v20, %v1685_v59  ;;  %v991_v1 = vpop.f32.mrb[21].mxu0 }
 0x12e   : > { %v1278_v62 = vmax.f32 %v1260_v58, 0.0  ;;  %v1220_v0 = vmax.f32 %v1071_v21, %v1721_v60  ;;  %v1135_v2 = vpop.f32.mrb[21].mxu1  ;;  %v1200_v3 = vmax.f32 %v2040_v10, %v991_v1  ;;  %v1686_v5 = vpop.f32.mrb[22].mxu0 }
 0x12f   : > { %v1218_v4 = vmax.f32 %v2042_v11, %v1135_v2  ;;  %v1722_v6 = vpop.f32.mrb[22].mxu1  ;;  %v1203_v9 = vmax.f32 %v2056_v24, %v1686_v5  ;;  %v994_v13 = vpop.f32.mrb[23].mxu0 }
 0x130   : > { %v1571_v7 = vpack.c.bf16 %v1278_v62, %v1277_v61  ;;  %v1238_v8 = vmax.f32 %v1202_v63, %v1220_v0  ;;  %v1221_v12 = vmax.f32 %v2058_v25, %v1722_v6  ;;  %v1138_v16 = vpop.f32.mrb[23].mxu1  ;;  %v1201_v20 = vmax.f32 %v2044_v14, %v994_v13 }
 0x131   : > { %v1236_v17 = vmax.f32 %v1200_v3, %v1218_v4  ;;  %v1219_v21 = vmax.f32 %v2046_v15, %v1138_v16 }
 0x132   : > { %1572 = vst [vmem:[%s2112_s14] sm:$0xff] %v1571_v7   ;;  %v1263_v10 = vadd.f32 %v2101_v48, %v1238_v8  ;;  %v1239_v42 = vmax.f32 %v1203_v9, %v1221_v12 }
 0x133   : > { %v1261_v11 = vadd.f32 %v2101_v48, %v1236_v17  ;;  %v1237_v43 = vmax.f32 %v1201_v20, %v1219_v21 }
 0x134   : > { %v1264_v44 = vadd.f32 %v2101_v48, %v1239_v42  ;;  %v1689_v45 = vpop.f32.mrb[24].mxu0  ;;  %v1281_v49 = vmax.f32 %v1263_v10, 0.0 }
 0x135   : > { %v1262_v24 = vadd.f32 %v2101_v48, %v1237_v43  ;;  %v1725_v25 = vpop.f32.mrb[24].mxu1  ;;  %v1206_v51 = vmax.f32 %v2064_v28, %v1689_v45  ;;  %v1007_v15 = vpop.f32.mrb[25].mxu0  ;;  %v1279_v53 = vmax.f32 %v1261_v11, 0.0 }
 0x136   : > { %v1282_v50 = vmax.f32 %v1264_v44, 0.0  ;;  %v1224_v14 = vmax.f32 %v2066_v29, %v1725_v25  ;;  %v1151_v52 = vpop.f32.mrb[25].mxu1  ;;  %v1204_v57 = vmax.f32 %v2048_v18, %v1007_v15  ;;  %v1690_v59 = vpop.f32.mrb[26].mxu0 }
 0x137   : > { %v1280_v56 = vmax.f32 %v1262_v24, 0.0  ;;  %v1222_v58 = vmax.f32 %v2050_v19, %v1151_v52  ;;  %v1726_v60 = vpop.f32.mrb[26].mxu1  ;;  %v1207_v63 = vmax.f32 %v2072_v32, %v1690_v59  ;;  %v1010_v0 = vpop.f32.mrb[27].mxu0 }
 0x138   : > { %v1581_v61 = vpack.c.bf16 %v1282_v50, %v1281_v49  ;;  %v1242_v62 = vmax.f32 %v1206_v51, %v1224_v14  ;;  %v1225_v28 = vmax.f32 %v2074_v33, %v1726_v60  ;;  %v1154_v29 = vpop.f32.mrb[27].mxu1  ;;  %v1205_v3 = vmax.f32 %v2052_v22, %v1010_v0 }
 0x139   : > { %v1576_v1 = vpack.c.bf16 %v1280_v56, %v1279_v53  ;;  %v1240_v2 = vmax.f32 %v1204_v57, %v1222_v58  ;;  %v1223_v4 = vmax.f32 %v2054_v23, %v1154_v29 }
 0x13a   : > { %1614 = vst [vmem:[%s2112_s14 + $0x10] sm:$0xff] %v1581_v61   ;;  %v1267_v18 = vadd.f32 %v2101_v48, %v1242_v62  ;;  %v1243_v19 = vmax.f32 %v1207_v63, %v1225_v28 }
 0x13b   : > { %1613 = vst [vmem:[%s2112_s14 + $0x8] sm:$0xff] %v1576_v1   ;;  %v1265_v5 = vadd.f32 %v2101_v48, %v1240_v2  ;;  %v1241_v6 = vmax.f32 %v1205_v3, %v1223_v4 }
 0x13c   : > { %v1268_v32 = vadd.f32 %v2101_v48, %v1243_v19  ;;  %v1693_v7 = vpop.f32.mrb[28].mxu0  ;;  %v1285_v9 = vmax.f32 %v1267_v18, 0.0 }
 0x13d   : > { %v1266_v33 = vadd.f32 %v2101_v48, %v1241_v6  ;;  %v1729_v8 = vpop.f32.mrb[28].mxu1  ;;  %v1210_v22 = vmax.f32 %v2080_v36, %v1693_v7  ;;  %v1023_v13 = vpop.f32.mrb[29].mxu0  ;;  %v1283_v17 = vmax.f32 %v1265_v5, 0.0 }
 0x13e   : > { %v1286_v12 = vmax.f32 %v1268_v32, 0.0  ;;  %v1228_v23 = vmax.f32 %v2082_v37, %v1729_v8  ;;  %v1167_v16 = vpop.f32.mrb[29].mxu1  ;;  %v1208_v21 = vmax.f32 %v2060_v26, %v1023_v13  ;;  %v1694_v42 = vpop.f32.mrb[30].mxu0 }
 0x13f   : > { %v1284_v20 = vmax.f32 %v1266_v33, 0.0  ;;  %v1226_v10 = vmax.f32 %v2062_v27, %v1167_v16  ;;  %v1730_v11 = vpop.f32.mrb[30].mxu1  ;;  %v1211_v24 = vmax.f32 %v2088_v40, %v1694_v42  ;;  %v1026_v45 = vpop.f32.mrb[31].mxu0 }
 0x140   : > { %v1591_v43 = vpack.c.bf16 %v1286_v12, %v1285_v9  ;;  %v1246_v44 = vmax.f32 %v1210_v22, %v1228_v23  ;;  %v1229_v36 = vmax.f32 %v2090_v41, %v1730_v11  ;;  %v1170_v37 = vpop.f32.mrb[31].mxu1  ;;  %v1209_v50 = vmax.f32 %v2068_v30, %v1026_v45 }
 0x141   : > { %v1586_v25 = vpack.c.bf16 %v1284_v20, %v1283_v17  ;;  %v1244_v49 = vmax.f32 %v1208_v21, %v1226_v10  ;;  %v1227_v51 = vmax.f32 %v2070_v31, %v1170_v37 }
 0x142   : > { %1616 = vst [vmem:[%s2112_s14 + $0x20] sm:$0xff] %v1591_v43   ;;  %v1271_v26 = vadd.f32 %v2101_v48, %v1246_v44  ;;  %v1247_v27 = vmax.f32 %v1211_v24, %v1229_v36 }
 0x143   : > { %1615 = vst [vmem:[%s2112_s14 + $0x18] sm:$0xff] %v1586_v25   ;;  %v1269_v14 = vadd.f32 %v2101_v48, %v1244_v49  ;;  %v1245_v15 = vmax.f32 %v1209_v50, %v1227_v51 }
 0x144   : > { %v1272_v40 = vadd.f32 %v2101_v48, %v1247_v27  ;;  %v1697_v52 = vpop.f32.mrb[32].mxu0  ;;  %v1289_v56 = vmax.f32 %v1271_v26, 0.0 }
 0x145   : > { %v1270_v41 = vadd.f32 %v2101_v48, %v1245_v15  ;;  %v1733_v53 = vpop.f32.mrb[32].mxu1  ;;  %v1214_v30 = vmax.f32 %v2094_v46, %v1697_v52  ;;  %v1039_v58 = vpop.f32.mrb[33].mxu0  ;;  %v1287_v60 = vmax.f32 %v1269_v14, 0.0 }
 0x146   : > { %v1290_v57 = vmax.f32 %v1272_v40, 0.0  ;;  %v1232_v31 = vmax.f32 %v2096_v47, %v1733_v53  ;;  %v1183_v59 = vpop.f32.mrb[33].mxu1  ;;  %v1212_v62 = vmax.f32 %v2076_v34, %v1039_v58  ;;  %v1698_v28 = vpop.f32.mrb[34].mxu0 }
 0x147   : > { %v1288_v61 = vmax.f32 %v1270_v41, 0.0  ;;  %v1230_v63 = vmax.f32 %v2078_v35, %v1183_v59  ;;  %v1734_v0 = vpop.f32.mrb[34].mxu1  ;;  %v1215_v2 = vmax.f32 %v2103_v54, %v1698_v28  ;;  %v1042_v3 = vpop.f32.mrb[35].mxu0 }
 0x148   : > { %v1601_v29 = vpack.c.bf16 %v1290_v57, %v1289_v56  ;;  %v1250_v1 = vmax.f32 %v1214_v30, %v1232_v31  ;;  %v1233_v46 = vmax.f32 %v2105_v55, %v1734_v0  ;;  %v1186_v47 = vpop.f32.mrb[35].mxu1  ;;  %v1213_v19 = vmax.f32 %v2084_v38, %v1042_v3 }
 0x149   : > { %v1596_v4 = vpack.c.bf16 %v1288_v61, %v1287_v60  ;;  %v1248_v18 = vmax.f32 %v1212_v62, %v1230_v63  ;;  %v1231_v34 = vmax.f32 %v2086_v39, %v1186_v47 }
 0x14a   : > { %1618 = vst [vmem:[%s2112_s14 + $0x30] sm:$0xff] %v1601_v29   ;;  %v1275_v35 = vadd.f32 %v2101_v48, %v1250_v1  ;;  %v1251_v5 = vmax.f32 %v1215_v2, %v1233_v46 }
 0x14b   : > { %1617 = vst [vmem:[%s2112_s14 + $0x28] sm:$0xff] %v1596_v4   ;;  %v1273_v6 = vadd.f32 %v2101_v48, %v1248_v18  ;;  %v1249_v54 = vmax.f32 %v1213_v19, %v1231_v34 }
 0x14c   : > { %v1276_v55 = vadd.f32 %v2101_v48, %v1251_v5  ;;  %v1293_v33 = vmax.f32 %v1275_v35, 0.0 }
 0x14d   : > { %v1274_v32 = vadd.f32 %v2101_v48, %v1249_v54  ;;  %v1291_v8 = vmax.f32 %v1273_v6, 0.0 }
 0x14e   : > { %v1294_v7 = vmax.f32 %v1276_v55, 0.0 }
 0x14f   : > { %v1292_v38 = vmax.f32 %v1274_v32, 0.0 }
 0x150   : > { %v1611_v9 = vpack.c.bf16 %v1294_v7, %v1293_v33 }
 0x151   : > { %v1606_v12 = vpack.c.bf16 %v1292_v38, %v1291_v8 }
 0x152   : > { %1620 = vst [vmem:[%s2112_s14 + $0x40] sm:$0xff] %v1611_v9  }
 0x153   : > { %1619 = vst [vmem:[%s2112_s14 + $0x38] sm:$0xff] %v1606_v12  }
 0x154 PF: > { %p10_p9 = scmp.ge.s32.totalorder %s1864_s16, 4   ;;  %s2183_s12 = smov %s1821_s13 }
 0x155   : > { %s2184_s13 = smov %s1873_s19  ;;  %s2185_s14 = smov %s1864_s16 }
 0x156   :  { %12 = sbr.rel (!%p10_p9) target bundleno = 2 (0x2), region = 108 }

// kernel: mnist_forward.4
= control target key start
LH: loop header
LB: loop body
LE: loop exit
PB: predicated region body
PF: predicated region fallthrough
CT: control target
= control target key end

     0   :  { %s1639_s12 = smov 0   ;;  %s1641_s13 = smov 0   ;;  %s1949_s0 = inlined_call_operand.vmem [shape: bf16[4,32,800], index: 0, kind: input, shape index: {}]   ;;  %s1950_s1 = inlined_call_operand.vmem [shape: bf16[800,128], index: 1, kind: input, shape index: {}]   ;;  %s1951_s2 = inlined_call_operand.vmem [shape: f32[1,128], index: 2, kind: input, shape index: {}]   ;;  %s1952_s3 = inlined_call_operand.vmem [shape: bf16[32,128], index: 3, kind: output, shape index: {}]  }
   0x1   :  { %s1643_s14 = smov 0  }
   0x2 LB: > { %s1204_s15 = sadd.s32 4294967295, %s1617_s14   ;;  %s1656_s16 = sadd.s32 1, %s1617_s14   ;;  %s1617_s14 = sphi %s1643_s14, %s1955_s14   ;;  %s1613_s13 = sphi %s1641_s13, %s1954_s13   ;;  %s1609_s12 = sphi %s1639_s12, %s1953_s12  }
   0x3   : > { %s17_s17 = ssub.s32 %s1617_s14, %s1656_s16  ;;  %s20_s18 = sadd.s32 1, %s1613_s13 }
   0x4   : > { %p18_p0 = scmp.eq.s32.totalorder %s17_s17, 0  ;;  %p27_p1 = scmp.ne.s32.totalorder %s1613_s13, %s1609_s12 }
   0x5   : > { %p28_p2 = scmp.eq.s32.totalorder %s1617_s14, 0  ;;  %p1207_p4 = scmp.ge.s32.totalorder %s1617_s14, 2 }
   0x6   : > { %s1665_s19 = scalar_select %p18_p0, %s1613_s13, %s20_s18  }
   0x7   : > { %p29_p3 = por %p28_p2, %p27_p1  ;;  %127 = sbr.rel (%p1207_p4) target bundleno = 36 (0x24), region = 24 }
   0xe   : > { %130 = sbr.rel (!%p29_p3) target bundleno = 36 (0x24), region = 28  ;;  %s132_s20 = sand.u32 (%p29_p3), 1, %s1613_s13  }
   0xf   : > { %s1479_s21 = smul.u32 (%p29_p3), 56, %s1617_s14 }
  0x10   : > { %s1478_s22 = smul.u32 (%p29_p3), 224, %s132_s20 }
  0x11   : > { %s1673_s25 = scalar_lea.vmem (%p29_p3), %s1949_s0, %s1479_s21 }
  0x12   : > { %v153_v0 = vld [vmem:[%s1673_s25] sm:$0xff] (%p29_p3)  ;;  %v155_v1 = vld [vmem:[%s1673_s25 + $0x8] sm:$0xff] (%p29_p3)  ;;  %v157_v2 = vld [vmem:[%s1673_s25 + $0x10] sm:$0xff] (%p29_p3)  ;;  %s1678_s26 = scalar_lea.vmem (%p29_p3), [#allocation2], %s1478_s22 }
  0x13   : > { %154 = vst [vmem:[%s1678_s26] sm:$0xff] (%p29_p3), %v153_v0  ;;  %156 = vst [vmem:[%s1678_s26 + $0x8] sm:$0xff] (%p29_p3), %v155_v1  ;;  %v159_v3 = vld [vmem:[%s1673_s25 + $0x1c] sm:$0xff] (%p29_p3)  ;;  %v161_v4 = vld [vmem:[%s1673_s25 + $0x24] sm:$0xff] (%p29_p3) }
  0x14   : > { %158 = vst [vmem:[%s1678_s26 + $0x10] sm:$0xff] (%p29_p3), %v157_v2  ;;  %v163_v5 = vld [vmem:[%s1673_s25 + $0x2c] sm:$0xff] (%p29_p3)  ;;  %160 = vst [vmem:[%s1678_s26 + $0x1c] sm:$0xff] (%p29_p3), %v159_v3  ;;  %v167_v7 = vld [vmem:[%s1673_s25 + $0x78] sm:$0xff] (%p29_p3) }
  0x15   : > { %162 = vst [vmem:[%s1678_s26 + $0x24] sm:$0xff] %v161_v4  ;;  %164 = vst [vmem:[%s1678_s26 + $0x2c] sm:$0xff] %v163_v5  ;;  %v165_v6 = vld [vmem:[%s1673_s25 + $0x70] sm:$0xff]  ;;  %v169_v8 = vld [vmem:[%s1673_s25 + $0x80] sm:$0xff] }
  0x16   : > { %166 = vst [vmem:[%s1678_s26 + $0x38] sm:$0xff] %v165_v6  ;;  %168 = vst [vmem:[%s1678_s26 + $0x40] sm:$0xff] %v167_v7  ;;  %v171_v9 = vld [vmem:[%s1673_s25 + $0x8c] sm:$0xff]  ;;  %v173_v10 = vld [vmem:[%s1673_s25 + $0x94] sm:$0xff] }
  0x17   : > { %170 = vst [vmem:[%s1678_s26 + $0x48] sm:$0xff] %v169_v8  ;;  %v175_v11 = vld [vmem:[%s1673_s25 + $0x9c] sm:$0xff]  ;;  %172 = vst [vmem:[%s1678_s26 + $0x54] sm:$0xff] %v171_v9  ;;  %v179_v13 = vld [vmem:[%s1673_s25 + $0xe8] sm:$0xff] }
  0x18   : > { %174 = vst [vmem:[%s1678_s26 + $0x5c] sm:$0xff] %v173_v10  ;;  %176 = vst [vmem:[%s1678_s26 + $0x64] sm:$0xff] %v175_v11  ;;  %v177_v12 = vld [vmem:[%s1673_s25 + $0xe0] sm:$0xff]  ;;  %v181_v14 = vld [vmem:[%s1673_s25 + $0xf0] sm:$0xff] }
  0x19   : > { %178 = vst [vmem:[%s1678_s26 + $0x70] sm:$0xff] %v177_v12  ;;  %180 = vst [vmem:[%s1678_s26 + $0x78] sm:$0xff] %v179_v13  ;;  %v183_v15 = vld [vmem:[%s1673_s25 + $0xfc] sm:$0xff]  ;;  %v185_v16 = vld [vmem:[%s1673_s25 + $0x104] sm:$0xff] }
  0x1a   : > { %182 = vst [vmem:[%s1678_s26 + $0x80] sm:$0xff] %v181_v14  ;;  %v187_v17 = vld [vmem:[%s1673_s25 + $0x10c] sm:$0xff]  ;;  %184 = vst [vmem:[%s1678_s26 + $0x8c] sm:$0xff] %v183_v15  ;;  %v191_v19 = vld [vmem:[%s1673_s25 + $0x158] sm:$0xff] }
  0x1b   : > { %186 = vst [vmem:[%s1678_s26 + $0x94] sm:$0xff] %v185_v16  ;;  %188 = vst [vmem:[%s1678_s26 + $0x9c] sm:$0xff] %v187_v17  ;;  %v189_v18 = vld [vmem:[%s1673_s25 + $0x150] sm:$0xff]  ;;  %v193_v20 = vld [vmem:[%s1673_s25 + $0x160] sm:$0xff] }
  0x1c   : > { %190 = vst [vmem:[%s1678_s26 + $0xa8] sm:$0xff] %v189_v18  ;;  %192 = vst [vmem:[%s1678_s26 + $0xb0] sm:$0xff] %v191_v19  ;;  %v195_v21 = vld [vmem:[%s1673_s25 + $0x16c] sm:$0xff]  ;;  %v197_v22 = vld [vmem:[%s1673_s25 + $0x174] sm:$0xff] }
  0x1d   : > { %194 = vst [vmem:[%s1678_s26 + $0xb8] sm:$0xff] %v193_v20  ;;  %v199_v23 = vld [vmem:[%s1673_s25 + $0x17c] sm:$0xff]  ;;  %196 = vst [vmem:[%s1678_s26 + $0xc4] sm:$0xff] %v195_v21  ;;  %v1211_v24 = vld [vmem:[%s1673_s25 + $0x18] sm:$0xf] }
  0x1e   : > { %198 = vst [vmem:[%s1678_s26 + $0xcc] sm:$0xff] %v197_v22  ;;  %200 = vst [vmem:[%s1678_s26 + $0xd4] sm:$0xff] %v199_v23  ;;  %v1213_v25 = vld [vmem:[%s1673_s25 + $0x34] sm:$0xf]  ;;  %v1215_v26 = vld [vmem:[%s1673_s25 + $0x88] sm:$0xf] }
  0x1f   : > { %1212 = vst [vmem:[%s1678_s26 + $0x18] sm:$0xf] %v1211_v24  ;;  %1214 = vst [vmem:[%s1678_s26 + $0x34] sm:$0xf] %v1213_v25  ;;  %v1217_v27 = vld [vmem:[%s1673_s25 + $0xa4] sm:$0xf] }
  0x20   : > { %1216 = vst [vmem:[%s1678_s26 + $0x50] sm:$0xf] %v1215_v26  ;;  %v1219_v28 = vld [vmem:[%s1673_s25 + $0xf8] sm:$0xf]  ;;  %v1221_v29 = vld [vmem:[%s1673_s25 + $0x114] sm:$0xf] }
  0x21   : > { %1218 = vst [vmem:[%s1678_s26 + $0x6c] sm:$0xf] %v1217_v27  ;;  %1220 = vst [vmem:[%s1678_s26 + $0x88] sm:$0xf] %v1219_v28  ;;  %v1223_v30 = vld [vmem:[%s1673_s25 + $0x168] sm:$0xf] }
  0x22   : > { %1222 = vst [vmem:[%s1678_s26 + $0xa4] sm:$0xf] %v1221_v29  ;;  %v1225_v31 = vld [vmem:[%s1673_s25 + $0x184] sm:$0xf]  ;;  %1224 = vst [vmem:[%s1678_s26 + $0xc0] sm:$0xf] %v1223_v30 }
  0x23   : > { %1226 = vst [vmem:[%s1678_s26 + $0xdc] sm:$0xf] %v1225_v31 }
  0x24 PF: > { %p1227_p5 = scmp.ge.s32.totalorder %s1617_s14, 1  ;;  %p228_p6 = scmp.lt.s32.totalorder %s1617_s14, 3 }
  0x26   : > { %p229_p7 = pnand %p1227_p5, %p228_p6 }
  0x27   : > { %v1505_v32 = vld [vmem:[%s1950_s1 + $0x40] sm:$0xff] (!%p229_p7)   ;;  %v1509_v36 = vld [vmem:[%s1950_s1 + $0x48] sm:$0xff] (!%p229_p7)   ;;  %v1513_v40 = vld [vmem:[%s1950_s1 + $0x50] sm:$0xff] (!%p229_p7)   ;;  %s235_s4 = sand.u32 (!%p229_p7), 1, %s1609_s12   ;;  %vm838_vm0 = vcmask (!%p229_p7), 261120  }
  0x28   : > { %232 = sbr.rel (%p229_p7) target bundleno = 354 (0x162), region = 54  ;;  %v1506_v33 = vld [vmem:[%s1950_s1 + $0xc0] sm:$0xff] (!%p229_p7)   ;;  %1324 = vmatprep.subr.bf16.mxu0 (!%p229_p7), %v1505_v32  ;;  %v1510_v37 = vld [vmem:[%s1950_s1 + $0xc8] sm:$0xff] (!%p229_p7)   ;;  %v1514_v41 = vld [vmem:[%s1950_s1 + $0xd0] sm:$0xff] (!%p229_p7)  }
  0x29   : > { %v1507_v34 = vld [vmem:[%s1950_s1] sm:$0xff] (!%p229_p7)   ;;  %1364 = vmatprep.subr.bf16.mxu1 (!%p229_p7), %v1506_v33  ;;  %v1511_v38 = vld [vmem:[%s1950_s1 + $0x8] sm:$0xff] (!%p229_p7)   ;;  %v1515_v42 = vld [vmem:[%s1950_s1 + $0x10] sm:$0xff] (!%p229_p7)   ;;  %s1480_s11 = smul.u32 (!%p229_p7), 224, %s235_s4 }
  0x2a   : > { %v1508_v35 = vld [vmem:[%s1950_s1 + $0x80] sm:$0xff] (!%p229_p7)   ;;  %1325 = vmatpush3.bf16.msra.mxu0 (!%p229_p7), %v1507_v34  ;;  %v1512_v39 = vld [vmem:[%s1950_s1 + $0x88] sm:$0xff] (!%p229_p7)   ;;  %v1516_v43 = vld [vmem:[%s1950_s1 + $0x90] sm:$0xff] (!%p229_p7)  }
  0x2b   : > { %1365 = vmatpush3.bf16.msra.mxu1 (!%p229_p7), %v1508_v35  ;;  %1326 = vmatprep.subr.bf16.mxu0 (!%p229_p7), %v1509_v36  ;;  %v1517_v44 = vld [vmem:[%s1950_s1 + $0x58] sm:$0xff] (!%p229_p7)   ;;  %v1521_v48 = vld [vmem:[%s1950_s1 + $0x60] sm:$0xff] (!%p229_p7)   ;;  %v1525_v52 = vld [vmem:[%s1950_s1 + $0x68] sm:$0xff] (!%p229_p7)   ;;  %s1840_s29 = scalar_lea.vmem (!%p229_p7), [#allocation2], %s1480_s11 }
  0x2c   : > { %1366 = vmatprep.subr.bf16.mxu1 (!%p229_p7), %v1510_v37  ;;  %v1518_v45 = vld [vmem:[%s1950_s1 + $0xd8] sm:$0xff] (!%p229_p7)   ;;  %v1522_v49 = vld [vmem:[%s1950_s1 + $0xe0] sm:$0xff] (!%p229_p7)   ;;  %v1526_v53 = vld [vmem:[%s1950_s1 + $0xe8] sm:$0xff] (!%p229_p7)  }
  0x2d   : > { %v1519_v46 = vld [vmem:[%s1950_s1 + $0x18] sm:$0xff] (!%p229_p7)   ;;  %v1523_v50 = vld [vmem:[%s1950_s1 + $0x20] sm:$0xff] (!%p229_p7)   ;;  %v1527_v54 = vld [vmem:[%s1950_s1 + $0x28] sm:$0xff] (!%p229_p7)  }
  0x2e   : > { %1327 = vmatpush3.bf16.msra.mxu0 (!%p229_p7), %v1511_v38  ;;  %v1520_v47 = vld [vmem:[%s1950_s1 + $0x98] sm:$0xff] (!%p229_p7)   ;;  %v1524_v51 = vld [vmem:[%s1950_s1 + $0xa0] sm:$0xff] (!%p229_p7)   ;;  %v1528_v55 = vld [vmem:[%s1950_s1 + $0xa8] sm:$0xff] (!%p229_p7)  }
  0x2f   : > { %1367 = vmatpush3.bf16.msra.mxu1 %v1512_v39  ;;  %1328 = vmatprep.subr.bf16.mxu0 %v1513_v40  ;;  %v1529_v56 = vld [vmem:[%s1950_s1 + $0x70] sm:$0xff]   ;;  %v1533_v60 = vld [vmem:[%s1950_s1 + $0x78] sm:$0xff]   ;;  %v1539_v1 = vld [vmem:[%s1840_s29 + $0x4] ss:$28 sps:$4 sm:$0xff]  }
  0x30   : > { %1368 = vmatprep.subr.bf16.mxu1 %v1514_v41  ;;  %v1530_v57 = vld [vmem:[%s1950_s1 + $0xf0] sm:$0xff]   ;;  %v1534_v61 = vld [vmem:[%s1950_s1 + $0xf8] sm:$0xff]   ;;  %v1540_v2 = vld [vmem:[%s1840_s29 + $0x8] ss:$28 sps:$4 sm:$0xff]   ;;  %883 = vmatprep.mubr.bf16.mxu0 %v1539_v1 }
  0x31   : > { %v1531_v58 = vld [vmem:[%s1950_s1 + $0x30] sm:$0xff]   ;;  %v1535_v62 = vld [vmem:[%s1950_s1 + $0x38] sm:$0xff]   ;;  %v1542_v3 = vld [vmem:[%s1840_s29 + $0xc] ss:$28 sps:$4 sm:$0xff]  }
  0x32   : > { %1329 = vmatpush3.bf16.msra.mxu0 %v1515_v42  ;;  %v1532_v59 = vld [vmem:[%s1950_s1 + $0xb0] sm:$0xff]   ;;  %v1536_v63 = vld [vmem:[%s1950_s1 + $0xb8] sm:$0xff]   ;;  %v1543_v4 = vld [vmem:[%s1950_s1 + $0x140] sm:$0xff]   ;;  %948 = vmatprep.mubr.bf16.mxu1 %v1542_v3 }
  0x33   : > { %1369 = vmatpush3.bf16.msra.mxu1 %v1516_v43  ;;  %1330 = vmatprep.subr.bf16.mxu0 %v1517_v44  ;;  %v1537_v0 = vld [vmem:[%s1840_s29] ss:$28 sps:$4 sm:$0xff]   ;;  %v1545_v6 = vld [vmem:[%s1950_s1 + $0x148] sm:$0xff]   ;;  %v1551_v10 = vld [vmem:[%s1840_s29 + $0x38] ss:$28 sps:$4 sm:$0xff]  }
  0x34   : > { %1370 = vmatprep.subr.bf16.mxu1 %v1518_v45  ;;  %v1544_v5 = vld [vmem:[%s1950_s1 + $0x100] sm:$0xff]   ;;  %v1546_v7 = vld [vmem:[%s1950_s1 + $0x108] sm:$0xff]   ;;  %v1547_v8 = vld [vmem:[%s1840_s29 + $0x3c] ss:$28 sps:$4 sm:$0xff]  }
  0x35   : > { %v1549_v9 = vld [vmem:[%s1840_s29 + $0x44] ss:$28 sps:$4 sm:$0xff]   ;;  %v1553_v12 = vld [vmem:[%s1950_s1 + $0x150] sm:$0xff]   ;;  %v1555_v14 = vld [vmem:[%s1950_s1 + $0x158] sm:$0xff]  }
  0x36   : > { %1331 = vmatpush3.bf16.msra.mxu0 %v1519_v46  ;;  %v1552_v11 = vld [vmem:[%s1840_s29 + $0x40] ss:$28 sps:$4 sm:$0xff]   ;;  %v1554_v13 = vld [vmem:[%s1950_s1 + $0x110] sm:$0xff]   ;;  %v1565_v22 = vld [vmem:[%s1950_s1 + $0x168] sm:$0xff]  }
  0x37   : > { %1371 = vmatpush3.bf16.msra.mxu1 %v1520_v47  ;;  %1332 = vmatprep.subr.bf16.mxu0 %v1521_v48  ;;  %v1556_v15 = vld [vmem:[%s1950_s1 + $0x118] sm:$0xff]   ;;  %v1557_v16 = vld [vmem:[%s1840_s29 + $0x74] ss:$28 sps:$4 sm:$0xff]   ;;  %v1563_v19 = vld [vmem:[%s1950_s1 + $0x160] sm:$0xff]  }
  0x38   : > { %1372 = vmatprep.subr.bf16.mxu1 %v1522_v49  ;;  %v1559_v17 = vld [vmem:[%s1840_s29 + $0x7c] ss:$28 sps:$4 sm:$0xff]   ;;  %v1561_v18 = vld [vmem:[%s1840_s29 + $0x70] ss:$28 sps:$4 sm:$0xff]   ;;  %v1564_v21 = vld [vmem:[%s1950_s1 + $0x120] sm:$0xff]  }
  0x39   : > { %v1562_v20 = vld [vmem:[%s1840_s29 + $0x78] ss:$28 sps:$4 sm:$0xff]   ;;  %v1567_v23 = vld [vmem:[%s1840_s29 + $0xac] ss:$28 sps:$4 sm:$0xff]   ;;  %v1583_v34 = vld [vmem:[%s1950_s1 + $0x180] sm:$0xff]  }
  0x3a   : > { %1333 = vmatpush3.bf16.msra.mxu0 %v1523_v50  ;;  %v1569_v24 = vld [vmem:[%s1840_s29 + $0xb4] ss:$28 sps:$4 sm:$0xff]   ;;  %v1566_v25 = vld [vmem:[%s1950_s1 + $0x128] sm:$0xff]   ;;  %v1575_v30 = vld [vmem:[%s1950_s1 + $0x178] sm:$0xff]  }
  0x3b   : > { %1373 = vmatpush3.bf16.msra.mxu1 %v1524_v51  ;;  %1334 = vmatprep.subr.bf16.mxu0 %v1525_v52  ;;  %v1573_v26 = vld [vmem:[%s1950_s1 + $0x170] sm:$0xff]   ;;  %v1571_v27 = vld [vmem:[%s1840_s29 + $0xa8] ss:$28 sps:$4 sm:$0xff]   ;;  %v1582_v32 = vld [vmem:[%s1840_s29 + $0xbc] ss:$28 sps:$4 sm:$0xff]  }
  0x3c   : > { %1374 = vmatprep.subr.bf16.mxu1 %v1526_v53  ;;  %v1572_v28 = vld [vmem:[%s1840_s29 + $0xb0] ss:$28 sps:$4 sm:$0xff]   ;;  %v1576_v33 = vld [vmem:[%s1950_s1 + $0x138] sm:$0xff]   ;;  %v1588_v40 = vld [vmem:[%s1840_s29 + $0x48] ss:$28 sps:$4 sm:$0xff]  }
  0x3d   : > { %v1574_v29 = vld [vmem:[%s1950_s1 + $0x130] sm:$0xff]   ;;  %v1585_v37 = vld [vmem:[%s1840_s29 + $0x4c] ss:$28 sps:$4 sm:$0xff]   ;;  %v1590_v42 = vld [vmem:[%s1840_s29 + $0x84] ss:$28 sps:$4 sm:$0xff]  }
  0x3e   : > { %1335 = vmatpush3.bf16.msra.mxu0 %v1527_v54  ;;  %v1579_v31 = vld [vmem:[%s1840_s29 + $0x14] ss:$28 sps:$4 sm:$0xff]   ;;  %v1584_v39 = vld [vmem:[%s1950_s1 + $0x188] sm:$0xff]   ;;  %v1593_v44 = vld [vmem:[%s1840_s29 + $0x80] ss:$28 sps:$4 sm:$0xff]  }
  0x3f   : > { %1375 = vmatpush3.bf16.msra.mxu1 %v1528_v55  ;;  %1336 = vmatprep.subr.bf16.mxu0 %v1529_v56  ;;  %v1577_v35 = vld [vmem:[%s1840_s29 + $0x10] ss:$28 sps:$4 sm:$0xff]   ;;  %v1580_v36 = vld [vmem:[%s1840_s29 + $0xb8] ss:$28 sps:$4 sm:$0xff]   ;;  %v1592_v43 = vld [vmem:[%s1840_s29 + $0x88] ss:$28 sps:$4 sm:$0xff]  }
  0x40   : > { %1376 = vmatprep.subr.bf16.mxu1 %v1530_v57  ;;  %v1587_v38 = vld [vmem:[%s1840_s29 + $0x18] ss:$28 sps:$4 sm:$0xff]   ;;  %v1589_v41 = vld [vmem:[%s1840_s29 + $0x50] ss:$28 sps:$4 sm:$0xff]   ;;  %v1594_v45 = vld [vmem:[%s1840_s29 + $0xc0] ss:$28 sps:$4 sm:$0xff]  }
  0x41   : > { %s1228_s29 = sshll.u32 %s1204_s15, 1 }
  0x42   : > { %1337 = vmatpush3.bf16.msra.mxu0 %v1531_v58  ;;  %p260_p8 = scmp.lt.s32.totalorder %s1228_s29, 3 }
  0x43   : > { %1377 = vmatpush3.bf16.msra.mxu1 %v1532_v59  ;;  %1338 = vmatprep.subr.bf16.mxu0 %v1533_v60 }
  0x44   : > { %1378 = vmatprep.subr.bf16.mxu1 %v1534_v61  ;;  %s1957_s29 = smov (!%p260_p8, %s1228_s29), 3 }
  0x45   : > { %s1229_s14 = sshll.u32 %s1957_s29, 2 }
  0x46   : > { %1339 = vmatpush3.bf16.msra.mxu0 %v1535_v62  ;;  %s263_s26 = scalar_lea.vmem %s1952_s3, %s1229_s14 }
  0x47   : > { %1379 = vmatpush3.bf16.msra.mxu1 %v1536_v63  ;;  %1404 = vmatprep.subr.bf16.mxu0 %v1543_v4 }
  0x48   : > { %1462 = vmatprep.subr.bf16.mxu1 %v1543_v4 }
  0x49   : > { %884 = vmatmul.mubr.bf16.vlgmr.msra.gmra.mrb[0].mxu0 %v1537_v0 }
  0x4a   : > { %949 = vmatmul.mubr.bf16.vlgmr.msra.gmra.mrb[0].mxu1 %v1540_v2  ;;  %1405 = vmatpush3.bf16.msra.mxu0 %v1544_v5 }
  0x4b   : > { %1470 = vmatpush3.bf16.msra.mxu1 %v1544_v5  ;;  %1406 = vmatprep.subr.bf16.mxu0 %v1545_v6 }
  0x4c   : > { %1463 = vmatprep.subr.bf16.mxu1 %v1545_v6  ;;  %891 = vmatprep.mubr.bf16.mxu0 %v1547_v8 }
  0x4d   : > { %956 = vmatprep.mubr.bf16.mxu1 %v1549_v9 }
  0x4e   : > { %1407 = vmatpush3.bf16.msra.mxu0 %v1546_v7 }
  0x4f   : > { %1471 = vmatpush3.bf16.msra.mxu1 %v1546_v7  ;;  %1408 = vmatprep.subr.bf16.mxu0 %v1553_v12 }
  0x50   : > { %1464 = vmatprep.subr.bf16.mxu1 %v1553_v12 }
  0x51   : > { %892 = vmatmul.mubr.bf16.gmra.mrb[4].mxu0 %v1551_v10 }
  0x52   : > { %957 = vmatmul.mubr.bf16.gmra.mrb[4].mxu1 %v1552_v11  ;;  %1409 = vmatpush3.bf16.msra.mxu0 %v1554_v13 }
  0x53   : > { %1472 = vmatpush3.bf16.msra.mxu1 %v1554_v13  ;;  %1410 = vmatprep.subr.bf16.mxu0 %v1555_v14 }
  0x54   : > { %1465 = vmatprep.subr.bf16.mxu1 %v1555_v14  ;;  %899 = vmatprep.mubr.bf16.mxu0 %v1557_v16 }
  0x55   : > { %964 = vmatprep.mubr.bf16.mxu1 %v1559_v17 }
  0x56   : > { %1411 = vmatpush3.bf16.msra.mxu0 %v1556_v15 }
  0x57   : > { %1473 = vmatpush3.bf16.msra.mxu1 %v1556_v15  ;;  %1412 = vmatprep.subr.bf16.mxu0 %v1563_v19 }
  0x58   : > { %1466 = vmatprep.subr.bf16.mxu1 %v1563_v19 }
  0x59   : > { %900 = vmatmul.mubr.bf16.gmra.mrb[8].mxu0 %v1561_v18 }
  0x5a   : > { %965 = vmatmul.mubr.bf16.gmra.mrb[8].mxu1 %v1562_v20  ;;  %1413 = vmatpush3.bf16.msra.mxu0 %v1564_v21 }
  0x5b   : > { %907 = vmatprep.mubr.bf16.mxu0 %v1567_v23  ;;  %1474 = vmatpush3.bf16.msra.mxu1 %v1564_v21 }
  0x5c   : > { %1414 = vmatprep.subr.bf16.mxu0 %v1565_v22  ;;  %1467 = vmatprep.subr.bf16.mxu1 %v1565_v22 }
  0x5d   : > { %972 = vmatprep.mubr.bf16.mxu1 %v1569_v24 }
  0x5e   : > { %1415 = vmatpush3.bf16.msra.mxu0 %v1566_v25 }
  0x5f   : > { %1475 = vmatpush3.bf16.msra.mxu1 %v1566_v25  ;;  %1416 = vmatprep.subr.bf16.mxu0 %v1573_v26 }
  0x60   : > { %1468 = vmatprep.subr.bf16.mxu1 %v1573_v26 }
  0x61   : > { %908 = vmatmul.mubr.bf16.gmra.mrb[12].mxu0 %v1571_v27 }
  0x62   : > { %973 = vmatmul.mubr.bf16.gmra.mrb[12].mxu1 %v1572_v28  ;;  %1013 = vmatprep.mubr.bf16.mxu0 %v1579_v31 }
  0x63   : > { %1417 = vmatpush3.bf16.msra.mxu0 %v1574_v29  ;;  %1476 = vmatpush3.bf16.msra.mxu1 %v1574_v29 }
  0x64   : > { %1418 = vmatprep.subr.bf16.mxu0 %v1575_v30  ;;  %1469 = vmatprep.subr.bf16.mxu1 %v1575_v30 }
  0x65   : > { %1037 = vmatprep.mubr.bf16.mxu1 %v1582_v32 }
  0x67   : > { %1419 = vmatpush3.bf16.msra.mxu0 %v1576_v33  ;;  %1477 = vmatpush3.bf16.msra.mxu1 %v1576_v33 }
  0x68   : > { %1450 = vmatprep.subr.bf16.mxu1 %v1583_v34 }
  0x6a   : > { %1014 = vmatmul.mubr.bf16.vlgmr.msra.gmra.mrb[16].mxu0 %v1577_v35  ;;  %1038 = vmatmul.mubr.bf16.vlgmr.msra.gmra.mrb[16].mxu1 %v1580_v36 }
  0x6b   : > { %1021 = vmatprep.mubr.bf16.mxu0 %v1585_v37  ;;  %1451 = vmatpush3.bf16.msra.mxu1 %v1583_v34 }
  0x6c   : > { %1454 = vmatprep.mubr.msk.bf16.mxu1 %vm838_vm0, %v1587_v38  ;;  %1452 = vmatprep.subr.bf16.mxu1 %v1584_v39 }
  0x6f   : > { %1453 = vmatpush3.bf16.msra.mxu1 %v1584_v39 }
  0x72   : > { %1022 = vmatmul.mubr.bf16.gmra.mrb[20].mxu0 %v1588_v40  ;;  %1455 = vmatmul.mubr.msk.bf16.vlgmr.msra.gmra.mrb[20].mxu1 %vm838_vm0, %v1589_v41 }
  0x73   : > { %1029 = vmatprep.mubr.bf16.mxu0 %v1590_v42  ;;  %1458 = vmatprep.mubr.msk.bf16.mxu1 %vm838_vm0, %v1592_v43 }
  0x7a   : > { %1030 = vmatmul.mubr.bf16.gmra.mrb[24].mxu0 %v1593_v44  ;;  %1459 = vmatmul.mubr.msk.bf16.gmra.mrb[24].mxu1 %vm838_vm0, %v1594_v45 }
 0x11c   : > { %v1340_v46 = vpop.f32.mrb[0].mxu0 }
 0x11d   : > { %v1380_v47 = vpop.f32.mrb[0].mxu1  ;;  %v1341_v48 = vpop.f32.mrb[1].mxu0 }
 0x11e   : > { %v1342_v49 = vadd.f32 %v1341_v48, %v1340_v46  ;;  %v1381_v50 = vpop.f32.mrb[1].mxu1  ;;  %v1343_v51 = vpop.f32.mrb[2].mxu0 }
 0x11f   : > { %v1382_v52 = vadd.f32 %v1381_v50, %v1380_v47  ;;  %v1383_v53 = vpop.f32.mrb[2].mxu1  ;;  %v1344_v54 = vpop.f32.mrb[3].mxu0 }
 0x120   : > { %v1345_v55 = vadd.f32 %v1344_v54, %v1343_v51  ;;  %v1384_v56 = vpop.f32.mrb[3].mxu1 }
 0x121   : > { %v951_v57 = vadd.f32 %v1382_v52, %v1342_v49  ;;  %v1385_v58 = vadd.f32 %v1384_v56, %v1383_v53 }
 0x123   : > { %v954_v59 = vadd.f32 %v1385_v58, %v1345_v55 }
 0x124   : > { %v1346_v60 = vpop.f32.mrb[4].mxu0 }
 0x125   : > { %v1386_v61 = vpop.f32.mrb[4].mxu1  ;;  %v1347_v62 = vpop.f32.mrb[5].mxu0 }
 0x126   : > { %v1348_v63 = vadd.f32 %v1347_v62, %v1346_v60  ;;  %v1387_v0 = vpop.f32.mrb[5].mxu1  ;;  %v1349_v1 = vpop.f32.mrb[6].mxu0 }
 0x127   : > { %v1388_v2 = vadd.f32 %v1387_v0, %v1386_v61  ;;  %v1389_v3 = vpop.f32.mrb[6].mxu1  ;;  %v1350_v4 = vpop.f32.mrb[7].mxu0 }
 0x128   : > { %v1351_v5 = vadd.f32 %v1350_v4, %v1349_v1  ;;  %v1390_v6 = vpop.f32.mrb[7].mxu1 }
 0x129   : > { %v959_v7 = vadd.f32 %v1388_v2, %v1348_v63  ;;  %v1391_v8 = vadd.f32 %v1390_v6, %v1389_v3 }
 0x12b   : > { %v962_v9 = vadd.f32 %v1391_v8, %v1351_v5 }
 0x12c   : > { %v1352_v10 = vpop.f32.mrb[8].mxu0 }
 0x12d   : > { %v1392_v11 = vpop.f32.mrb[8].mxu1  ;;  %v1353_v12 = vpop.f32.mrb[9].mxu0 }
 0x12e   : > { %v1354_v13 = vadd.f32 %v1353_v12, %v1352_v10  ;;  %v1393_v14 = vpop.f32.mrb[9].mxu1  ;;  %v1355_v15 = vpop.f32.mrb[10].mxu0 }
 0x12f   : > { %v1394_v16 = vadd.f32 %v1393_v14, %v1392_v11  ;;  %v1395_v17 = vpop.f32.mrb[10].mxu1  ;;  %v1356_v18 = vpop.f32.mrb[11].mxu0 }
 0x130   : > { %v1357_v19 = vadd.f32 %v1356_v18, %v1355_v15  ;;  %v1396_v20 = vpop.f32.mrb[11].mxu1 }
 0x131   : > { %v967_v21 = vadd.f32 %v1394_v16, %v1354_v13  ;;  %v1397_v22 = vadd.f32 %v1396_v20, %v1395_v17 }
 0x133   : > { %v1928_v23 = vadd.f32 %v1397_v22, %v1357_v19 }
 0x134   : > { %v1358_v24 = vpop.f32.mrb[12].mxu0 }
 0x135   : > { %v1398_v25 = vpop.f32.mrb[12].mxu1  ;;  %v1359_v26 = vpop.f32.mrb[13].mxu0 }
 0x136   : > { %v1360_v27 = vadd.f32 %v1359_v26, %v1358_v24  ;;  %v1399_v28 = vpop.f32.mrb[13].mxu1  ;;  %v1361_v29 = vpop.f32.mrb[14].mxu0 }
 0x137   : > { %v1400_v30 = vadd.f32 %v1399_v28, %v1398_v25  ;;  %v1401_v31 = vpop.f32.mrb[14].mxu1  ;;  %v1362_v32 = vpop.f32.mrb[15].mxu0 }
 0x138   : > { %v1363_v33 = vadd.f32 %v1362_v32, %v1361_v29  ;;  %v1402_v34 = vpop.f32.mrb[15].mxu1 }
 0x139   : > { %v975_v35 = vadd.f32 %v1400_v30, %v1360_v27  ;;  %v1403_v36 = vadd.f32 %v1402_v34, %v1401_v31  ;;  %v1312_v27 = vld [vmem:[%s1951_s2] ss:$0 sm:$0xff] }
 0x13b   : > { %v978_v37 = vadd.f32 %v1403_v36, %v1363_v33 }
 0x13d   : > { %v1420_v38 = vpop.f32.mrb[16].mxu0  ;;  %v1438_v39 = vpop.f32.mrb[16].mxu1 }
 0x13e   : > { %v1421_v40 = vpop.f32.mrb[17].mxu0  ;;  %v1439_v42 = vpop.f32.mrb[17].mxu1 }
 0x13f   : > { %v1422_v41 = vadd.f32 %v1421_v40, %v1420_v38  ;;  %v1423_v43 = vpop.f32.mrb[18].mxu0  ;;  %v1440_v44 = vadd.f32 %v1439_v42, %v1438_v39  ;;  %v1441_v45 = vpop.f32.mrb[18].mxu1 }
 0x140   : > { %v1424_v46 = vpop.f32.mrb[19].mxu0  ;;  %v1442_v48 = vpop.f32.mrb[19].mxu1 }
 0x141   : > { %v1425_v47 = vadd.f32 %v1424_v46, %v1423_v43  ;;  %v1016_v49 = vadd.f32 %v1422_v41, %v951_v57  ;;  %v1443_v50 = vadd.f32 %v1442_v48, %v1441_v45  ;;  %v1040_v51 = vadd.f32 %v1440_v44, %v975_v35 }
 0x143   : > { %v1019_v52 = vadd.f32 %v1425_v47, %v954_v59  ;;  %v1043_v53 = vadd.f32 %v1443_v50, %v978_v37 }
 0x145   : > { %v1426_v54 = vpop.f32.mrb[20].mxu0  ;;  %v1456_v55 = vpop.f32.mrb[20].mxu1 }
 0x146   : > { %v1427_v56 = vpop.f32.mrb[21].mxu0  ;;  %v1080_v60 = vpop.f32.mrb[21].mxu1 }
 0x147   : > { %v1428_v58 = vadd.f32 %v1427_v56, %v1426_v54  ;;  %v1429_v61 = vpop.f32.mrb[22].mxu0  ;;  %v1081_v62 = vadd.f32 %v1080_v60, %v1016_v49  ;;  %v1457_v63 = vpop.f32.mrb[22].mxu1 }
 0x148   : > { %v1430_v0 = vpop.f32.mrb[23].mxu0  ;;  %v1083_v3 = vpop.f32.mrb[23].mxu1 }
 0x149   : > { %v1024_v1 = vadd.f32 %v1428_v58, %v959_v7  ;;  %v1431_v2 = vadd.f32 %v1430_v0, %v1429_v61  ;;  %v1084_v4 = vadd.f32 %v1083_v3, %v1019_v52 }
 0x14b   : > { %v1089_v5 = vadd.f32 %v1456_v55, %v1024_v1  ;;  %v1027_v57 = vadd.f32 %v1431_v2, %v962_v9 }
 0x14d   : > { %v1111_v6 = vmax.f32 %v1081_v62, %v1089_v5  ;;  %v1092_v8 = vadd.f32 %v1457_v63, %v1027_v57  ;;  %v1432_v59 = vpop.f32.mrb[24].mxu0  ;;  %v1460_v10 = vpop.f32.mrb[24].mxu1 }
 0x14e   : > { %v1433_v11 = vpop.f32.mrb[25].mxu0  ;;  %v1105_v13 = vadd.f32 %v1460_v10, %v1040_v51  ;;  %v1096_v15 = vpop.f32.mrb[25].mxu1 }
 0x14f   : > { %v1112_v12 = vmax.f32 %v1084_v4, %v1092_v8  ;;  %v1434_v14 = vadd.f32 %v1433_v11, %v1432_v59  ;;  %v1435_v16 = vpop.f32.mrb[26].mxu0  ;;  %v1461_v17 = vpop.f32.mrb[26].mxu1 }
 0x150   : > { %v1436_v18 = vpop.f32.mrb[27].mxu0  ;;  %v1108_v19 = vadd.f32 %v1461_v17, %v1043_v53  ;;  %v1099_v22 = vpop.f32.mrb[27].mxu1 }
 0x151   : > { %v1032_v7 = vadd.f32 %v1434_v14, %v967_v21  ;;  %v1437_v20 = vadd.f32 %v1436_v18, %v1435_v16 }
 0x153   : > { %v1097_v24 = vadd.f32 %v1096_v15, %v1032_v7  ;;  %v1035_v9 = vadd.f32 %v1437_v20, %v1928_v23 }
 0x155   : > { %v1113_v25 = vmax.f32 %v1097_v24, %v1105_v13  ;;  %v1100_v26 = vadd.f32 %v1099_v22, %v1035_v9 }
 0x157   : > { %v1115_v28 = vmax.f32 %v1111_v6, %v1113_v25  ;;  %v1114_v29 = vmax.f32 %v1100_v26, %v1108_v19 }
 0x159   : > { %v1124_v30 = vadd.f32 %v1312_v27, %v1115_v28  ;;  %v1116_v31 = vmax.f32 %v1112_v12, %v1114_v29 }
 0x15b   : > { %v1125_v21 = vadd.f32 %v1312_v27, %v1116_v31  ;;  %v1126_v32 = vmax.f32 %v1124_v30, 0.0 }
 0x15d   : > { %v1127_v33 = vmax.f32 %v1125_v21, 0.0 }
 0x15f   : > { %v1322_v23 = vpack.c.bf16 %v1127_v33, %v1126_v32 }
 0x161   : > { %1323 = vst [vmem:[%s263_s26] sm:$0xff] %v1322_v23  }
 0x162 PF: > { %p10_p9 = scmp.ge.s32.totalorder %s1656_s16, 4   ;;  %s1953_s12 = smov %s1613_s13 }
 0x163   : > { %s1954_s13 = smov %s1665_s19  ;;  %s1955_s14 = smov %s1656_s16 }
 0x164   :  { %12 = sbr.rel (!%p10_p9) target bundleno = 2 (0x2), region = 99 }

// kernel: mnist_forward.5
= control target key start
LH: loop header
LB: loop body
LE: loop exit
PB: predicated region body
PF: predicated region fallthrough
CT: control target
= control target key end

     0   :  { %vm6507_vm0 = vmmov 0   ;;  %s8554_s1 = inlined_call_operand.vmem [shape: bf16[2048,512], index: 1, kind: input, shape index: {}]   ;;  %s8555_s0 = inlined_call_operand.vmem [shape: bf16[16,2048], index: 0, kind: input, shape index: {}]   ;;  %s8556_s3 = inlined_call_operand.vmem [shape: bf16[512,256], index: 3, kind: input, shape index: {}]   ;;  %s8557_s5 = inlined_call_operand.vmem [shape: bf16[256,128], index: 5, kind: input, shape index: {}]   ;;  %s8558_s2 = inlined_call_operand.vmem [shape: f32[1,512], index: 2, kind: input, shape index: {}]   ;;  %s8559_s7 = inlined_call_operand.vmem [shape: bf16[128,128], index: 7, kind: input, shape index: {}]   ;;  %s8560_s4 = inlined_call_operand.vmem [shape: f32[1,256], index: 4, kind: input, shape index: {}]   ;;  %s8561_s9 = inlined_call_operand.vmem [shape: bf16[128,128], index: 9, kind: input, shape index: {}]   ;;  %s8562_s6 = inlined_call_operand.vmem [shape: f32[1,128], index: 6, kind: input, shape index: {}]   ;;  %s8563_s8 = inlined_call_operand.vmem [shape: f32[1,128], index: 8, kind: input, shape index: {}]   ;;  %s8564_s10 = inlined_call_operand.vmem [shape: f32[1,128], index: 10, kind: input, shape index: {}]   ;;  %s8565_s11 = inlined_call_operand.vmem [shape: f32[16,128], index: 11, kind: output, shape index: {}]  }
   0x1   :  { %v5610_v0 = vld [vmem:[%s8554_s1 + $0x4] ss:$16 sps:$4 sm:$0xff]   ;;  %v5612_v1 = vld [vmem:[%s8554_s1 + $0xc] ss:$16 sps:$4 sm:$0xff]   ;;  %v5614_v2 = vld [vmem:[%s8554_s1] ss:$16 sps:$4 sm:$0xff]  }
   0x2   :  { %3229 = vmatprep.subr.bf16.mxu0 %v5610_v0  ;;  %v5615_v3 = vld [vmem:[%s8554_s1 + $0x8] ss:$16 sps:$4 sm:$0xff]   ;;  %3573 = vmatprep.subr.bf16.mxu1 %v5612_v1  ;;  %v5616_v4 = vld [vmem:[%s8554_s1 + $0x24] ss:$16 sps:$4 sm:$0xff]   ;;  %v5618_v5 = vld [vmem:[%s8554_s1 + $0x2c] ss:$16 sps:$4 sm:$0xff]  }
   0x3   :  { %3230 = vmatpush1.bf16.msra.mxu0 %v5614_v2  ;;  %3574 = vmatpush1.bf16.msra.mxu1 %v5615_v3  ;;  %v5620_v6 = vld [vmem:[%s8554_s1 + $0x20] ss:$16 sps:$4 sm:$0xff]   ;;  %v5621_v7 = vld [vmem:[%s8554_s1 + $0x28] ss:$16 sps:$4 sm:$0xff]   ;;  %v5622_v8 = vld [vmem:[%s8554_s1 + $0x44] ss:$16 sps:$4 sm:$0xff]  }
   0x4   :  { %3231 = vmatprep.subr.bf16.mxu0 %v5616_v4  ;;  %3575 = vmatprep.subr.bf16.mxu1 %v5618_v5  ;;  %v5624_v9 = vld [vmem:[%s8554_s1 + $0x4c] ss:$16 sps:$4 sm:$0xff]   ;;  %v5626_v10 = vld [vmem:[%s8554_s1 + $0x40] ss:$16 sps:$4 sm:$0xff]   ;;  %v5627_v11 = vld [vmem:[%s8554_s1 + $0x48] ss:$16 sps:$4 sm:$0xff]  }
   0x5   :  { %v5628_v12 = vld [vmem:[%s8554_s1 + $0x64] ss:$16 sps:$4 sm:$0xff]   ;;  %v5630_v13 = vld [vmem:[%s8554_s1 + $0x6c] ss:$16 sps:$4 sm:$0xff]   ;;  %v5632_v14 = vld [vmem:[%s8554_s1 + $0x60] ss:$16 sps:$4 sm:$0xff]  }
   0x6   :  { %v5633_v15 = vld [vmem:[%s8554_s1 + $0x68] ss:$16 sps:$4 sm:$0xff]   ;;  %v5634_v16 = vld [vmem:[%s8554_s1 + $0x84] ss:$16 sps:$4 sm:$0xff]   ;;  %v5636_v17 = vld [vmem:[%s8554_s1 + $0x8c] ss:$16 sps:$4 sm:$0xff]  }
   0x7   :  { %3232 = vmatpush1.bf16.msra.mxu0 %v5620_v6  ;;  %3576 = vmatpush1.bf16.msra.mxu1 %v5621_v7  ;;  %v5638_v18 = vld [vmem:[%s8554_s1 + $0x80] ss:$16 sps:$4 sm:$0xff]   ;;  %v5639_v19 = vld [vmem:[%s8554_s1 + $0x88] ss:$16 sps:$4 sm:$0xff]   ;;  %v5640_v20 = vld [vmem:[%s8554_s1 + $0xa4] ss:$16 sps:$4 sm:$0xff]  }
   0x8   :  { %3233 = vmatprep.subr.bf16.mxu0 %v5622_v8  ;;  %3577 = vmatprep.subr.bf16.mxu1 %v5624_v9  ;;  %v5642_v21 = vld [vmem:[%s8554_s1 + $0xac] ss:$16 sps:$4 sm:$0xff]   ;;  %v5644_v22 = vld [vmem:[%s8554_s1 + $0xa0] ss:$16 sps:$4 sm:$0xff]   ;;  %v5645_v23 = vld [vmem:[%s8554_s1 + $0xa8] ss:$16 sps:$4 sm:$0xff]  }
   0x9   :  { %v5646_v24 = vld [vmem:[%s8554_s1 + $0xc4] ss:$16 sps:$4 sm:$0xff]   ;;  %v5648_v25 = vld [vmem:[%s8554_s1 + $0xcc] ss:$16 sps:$4 sm:$0xff]   ;;  %v5650_v26 = vld [vmem:[%s8554_s1 + $0xc0] ss:$16 sps:$4 sm:$0xff]  }
   0xa   :  { %v5651_v27 = vld [vmem:[%s8554_s1 + $0xc8] ss:$16 sps:$4 sm:$0xff]   ;;  %v5652_v28 = vld [vmem:[%s8554_s1 + $0xe4] ss:$16 sps:$4 sm:$0xff]   ;;  %v5654_v29 = vld [vmem:[%s8554_s1 + $0xec] ss:$16 sps:$4 sm:$0xff]  }
   0xb   :  { %3234 = vmatpush1.bf16.msra.mxu0 %v5626_v10  ;;  %3578 = vmatpush1.bf16.msra.mxu1 %v5627_v11  ;;  %v5656_v30 = vld [vmem:[%s8554_s1 + $0xe0] ss:$16 sps:$4 sm:$0xff]   ;;  %v5657_v31 = vld [vmem:[%s8554_s1 + $0xe8] ss:$16 sps:$4 sm:$0xff]   ;;  %v5658_v32 = vld [vmem:[%s8554_s1 + $0x104] ss:$16 sps:$4 sm:$0xff]  }
   0xc   :  { %3235 = vmatprep.subr.bf16.mxu0 %v5628_v12  ;;  %3579 = vmatprep.subr.bf16.mxu1 %v5630_v13  ;;  %v5660_v33 = vld [vmem:[%s8554_s1 + $0x10c] ss:$16 sps:$4 sm:$0xff]   ;;  %v5662_v34 = vld [vmem:[%s8554_s1 + $0x100] ss:$16 sps:$4 sm:$0xff]   ;;  %v5663_v35 = vld [vmem:[%s8554_s1 + $0x108] ss:$16 sps:$4 sm:$0xff]  }
   0xd   :  { %v5664_v36 = vld [vmem:[%s8554_s1 + $0x124] ss:$16 sps:$4 sm:$0xff]   ;;  %v5666_v37 = vld [vmem:[%s8554_s1 + $0x12c] ss:$16 sps:$4 sm:$0xff]   ;;  %v5668_v38 = vld [vmem:[%s8554_s1 + $0x120] ss:$16 sps:$4 sm:$0xff]  }
   0xe   :  { %v5669_v39 = vld [vmem:[%s8554_s1 + $0x128] ss:$16 sps:$4 sm:$0xff]   ;;  %v5670_v40 = vld [vmem:[%s8554_s1 + $0x144] ss:$16 sps:$4 sm:$0xff]   ;;  %v5672_v41 = vld [vmem:[%s8554_s1 + $0x14c] ss:$16 sps:$4 sm:$0xff]  }
   0xf   :  { %3236 = vmatpush1.bf16.msra.mxu0 %v5632_v14  ;;  %3580 = vmatpush1.bf16.msra.mxu1 %v5633_v15  ;;  %v5674_v42 = vld [vmem:[%s8554_s1 + $0x140] ss:$16 sps:$4 sm:$0xff]   ;;  %v5675_v43 = vld [vmem:[%s8554_s1 + $0x148] ss:$16 sps:$4 sm:$0xff]   ;;  %v5676_v44 = vld [vmem:[%s8554_s1 + $0x164] ss:$16 sps:$4 sm:$0xff]  }
  0x10   :  { %3237 = vmatprep.subr.bf16.mxu0 %v5634_v16  ;;  %3581 = vmatprep.subr.bf16.mxu1 %v5636_v17  ;;  %v5678_v45 = vld [vmem:[%s8554_s1 + $0x16c] ss:$16 sps:$4 sm:$0xff]   ;;  %v39_v46 = vld [vmem:[%s8555_s0] sm:$0xff]  ;;  %v5681_v49 = vld [vmem:[%s8554_s1 + $0x168] ss:$16 sps:$4 sm:$0xff]  }
  0x11   :  { %v47_v47 = vld [vmem:[%s8555_s0 + $0x40] sm:$0xff]  ;;  %v5684_v52 = vld [vmem:[%s8554_s1 + $0x18c] ss:$16 sps:$4 sm:$0xff]   ;;  %v5687_v54 = vld [vmem:[%s8554_s1 + $0x188] ss:$16 sps:$4 sm:$0xff]  }
  0x12   :  { %v5680_v48 = vld [vmem:[%s8554_s1 + $0x160] ss:$16 sps:$4 sm:$0xff]   ;;  %v4830_v50 = vcombine.high %v39_v46, %v47_v47  ;;  %v5682_v51 = vld [vmem:[%s8554_s1 + $0x184] ss:$16 sps:$4 sm:$0xff]   ;;  %v5690_v56 = vld [vmem:[%s8554_s1 + $0x1ac] ss:$16 sps:$4 sm:$0xff]   ;;  %v4829_v5 = vcombine.low %v39_v46, %v47_v47 }
  0x13   :  { %3238 = vmatpush1.bf16.msra.mxu0 %v5638_v18  ;;  %3582 = vmatpush1.bf16.msra.mxu1 %v5639_v19  ;;  %v5686_v53 = vld [vmem:[%s8554_s1 + $0x180] ss:$16 sps:$4 sm:$0xff]   ;;  %v5688_v55 = vld [vmem:[%s8554_s1 + $0x1a4] ss:$16 sps:$4 sm:$0xff]   ;;  %v5693_v58 = vld [vmem:[%s8554_s1 + $0x1a8] ss:$16 sps:$4 sm:$0xff]  }
  0x14   :  { %3239 = vmatprep.subr.bf16.mxu0 %v5640_v20  ;;  %3583 = vmatprep.subr.bf16.mxu1 %v5642_v21  ;;  %v5692_v57 = vld [vmem:[%s8554_s1 + $0x1a0] ss:$16 sps:$4 sm:$0xff]   ;;  %v5694_v59 = vld [vmem:[%s8554_s1 + $0x1c4] ss:$16 sps:$4 sm:$0xff]   ;;  %v5696_v60 = vld [vmem:[%s8554_s1 + $0x1cc] ss:$16 sps:$4 sm:$0xff]  }
  0x15   :  { %3261 = vmatprep.mubr.bf16.mxu0 %v4830_v50  ;;  %3605 = vmatprep.mubr.bf16.mxu1 %v4830_v50  ;;  %v5698_v61 = vld [vmem:[%s8554_s1 + $0x1c0] ss:$16 sps:$4 sm:$0xff]   ;;  %v5699_v62 = vld [vmem:[%s8554_s1 + $0x1c8] ss:$16 sps:$4 sm:$0xff]   ;;  %v5700_v63 = vld [vmem:[%s8554_s1 + $0x1e4] ss:$16 sps:$4 sm:$0xff]  }
  0x16   :  { %v5702_v0 = vld [vmem:[%s8554_s1 + $0x1ec] ss:$16 sps:$4 sm:$0xff]   ;;  %v5704_v1 = vld [vmem:[%s8554_s1 + $0x1e0] ss:$16 sps:$4 sm:$0xff]   ;;  %v5705_v2 = vld [vmem:[%s8554_s1 + $0x1e8] ss:$16 sps:$4 sm:$0xff]  }
  0x17   :  { %3240 = vmatpush1.bf16.msra.mxu0 %v5644_v22  ;;  %3584 = vmatpush1.bf16.msra.mxu1 %v5645_v23  ;;  %v5708_v3 = vld [vmem:[%s8554_s1 + $0x204] ss:$16 sps:$4 sm:$0xff]   ;;  %v5711_v4 = vld [vmem:[%s8554_s1 + $0x20c] ss:$16 sps:$4 sm:$0xff]   ;;  %v5706_v6 = vld [vmem:[%s8554_s1 + $0x200] ss:$16 sps:$4 sm:$0xff]  }
  0x18   :  { %3241 = vmatprep.subr.bf16.mxu0 %v5646_v24  ;;  %3585 = vmatprep.subr.bf16.mxu1 %v5648_v25  ;;  %v5709_v7 = vld [vmem:[%s8554_s1 + $0x208] ss:$16 sps:$4 sm:$0xff]   ;;  %v5714_v8 = vld [vmem:[%s8554_s1 + $0x224] ss:$16 sps:$4 sm:$0xff]   ;;  %v5717_v9 = vld [vmem:[%s8554_s1 + $0x22c] ss:$16 sps:$4 sm:$0xff]  }
  0x19   :  { %v5712_v10 = vld [vmem:[%s8554_s1 + $0x220] ss:$16 sps:$4 sm:$0xff]   ;;  %v5715_v11 = vld [vmem:[%s8554_s1 + $0x228] ss:$16 sps:$4 sm:$0xff]   ;;  %v5720_v12 = vld [vmem:[%s8554_s1 + $0x244] ss:$16 sps:$4 sm:$0xff]  }
  0x1a   :  { %v5723_v13 = vld [vmem:[%s8554_s1 + $0x24c] ss:$16 sps:$4 sm:$0xff]   ;;  %v5718_v14 = vld [vmem:[%s8554_s1 + $0x240] ss:$16 sps:$4 sm:$0xff]   ;;  %v5721_v15 = vld [vmem:[%s8554_s1 + $0x248] ss:$16 sps:$4 sm:$0xff]  }
  0x1b   :  { %3242 = vmatpush1.bf16.msra.mxu0 %v5650_v26  ;;  %3586 = vmatpush1.bf16.msra.mxu1 %v5651_v27  ;;  %v5726_v16 = vld [vmem:[%s8554_s1 + $0x264] ss:$16 sps:$4 sm:$0xff]   ;;  %v5729_v17 = vld [vmem:[%s8554_s1 + $0x26c] ss:$16 sps:$4 sm:$0xff]   ;;  %v5724_v18 = vld [vmem:[%s8554_s1 + $0x260] ss:$16 sps:$4 sm:$0xff]  }
  0x1c   :  { %3243 = vmatprep.subr.bf16.mxu0 %v5652_v28  ;;  %3587 = vmatprep.subr.bf16.mxu1 %v5654_v29  ;;  %v5727_v19 = vld [vmem:[%s8554_s1 + $0x268] ss:$16 sps:$4 sm:$0xff]   ;;  %v5732_v20 = vld [vmem:[%s8554_s1 + $0x284] ss:$16 sps:$4 sm:$0xff]   ;;  %v5735_v21 = vld [vmem:[%s8554_s1 + $0x28c] ss:$16 sps:$4 sm:$0xff]  }
  0x1d   :  { %v5730_v22 = vld [vmem:[%s8554_s1 + $0x280] ss:$16 sps:$4 sm:$0xff]   ;;  %v5733_v23 = vld [vmem:[%s8554_s1 + $0x288] ss:$16 sps:$4 sm:$0xff]   ;;  %v5738_v24 = vld [vmem:[%s8554_s1 + $0x2a4] ss:$16 sps:$4 sm:$0xff]  }
  0x1e   :  { %v5741_v25 = vld [vmem:[%s8554_s1 + $0x2ac] ss:$16 sps:$4 sm:$0xff]   ;;  %v5736_v26 = vld [vmem:[%s8554_s1 + $0x2a0] ss:$16 sps:$4 sm:$0xff]   ;;  %v5739_v27 = vld [vmem:[%s8554_s1 + $0x2a8] ss:$16 sps:$4 sm:$0xff]  }
  0x1f   :  { %3244 = vmatpush1.bf16.msra.mxu0 %v5656_v30  ;;  %3588 = vmatpush1.bf16.msra.mxu1 %v5657_v31  ;;  %v5744_v28 = vld [vmem:[%s8554_s1 + $0x2c4] ss:$16 sps:$4 sm:$0xff]   ;;  %v5747_v29 = vld [vmem:[%s8554_s1 + $0x2cc] ss:$16 sps:$4 sm:$0xff]   ;;  %v5763_v46 = vld [vmem:[%s8554_s1 + $0x328] ss:$16 sps:$4 sm:$0xff]  }
  0x20   :  { %3245 = vmatprep.subr.bf16.mxu0 %v5658_v32  ;;  %3589 = vmatprep.subr.bf16.mxu1 %v5660_v33  ;;  %v6847_v30 = vld [vmem:[%s8555_s0 + $0x8] sm:$0xff]  ;;  %v5742_v32 = vld [vmem:[%s8554_s1 + $0x2c0] ss:$16 sps:$4 sm:$0xff]   ;;  %v5768_v47 = vld [vmem:[%s8554_s1 + $0x344] ss:$16 sps:$4 sm:$0xff]  }
  0x21   :  { %v6852_v31 = vld [vmem:[%s8555_s0 + $0x48] sm:$0xff] }
  0x22   :  { %v5745_v33 = vld [vmem:[%s8554_s1 + $0x2c8] ss:$16 sps:$4 sm:$0xff]  }
  0x23   :  { %3246 = vmatpush1.bf16.msra.mxu0 %v5662_v34  ;;  %3590 = vmatpush1.bf16.msra.mxu1 %v5663_v35  ;;  %v4832_v34 = vcombine.high %v6847_v30, %v6852_v31  ;;  %v5750_v35 = vld [vmem:[%s8554_s1 + $0x2e4] ss:$16 sps:$4 sm:$0xff]   ;;  %v5769_v50 = vld [vmem:[%s8554_s1 + $0x348] ss:$16 sps:$4 sm:$0xff]  }
  0x24   :  { %3247 = vmatprep.subr.bf16.mxu0 %v5664_v36  ;;  %3591 = vmatprep.subr.bf16.mxu1 %v5666_v37  ;;  %v5753_v36 = vld [vmem:[%s8554_s1 + $0x2ec] ss:$16 sps:$4 sm:$0xff]   ;;  %v5748_v37 = vld [vmem:[%s8554_s1 + $0x2e0] ss:$16 sps:$4 sm:$0xff]  }
  0x27   :  { %3248 = vmatpush1.bf16.msra.mxu0 %v5668_v38  ;;  %3592 = vmatpush1.bf16.msra.mxu1 %v5669_v39  ;;  %v5751_v38 = vld [vmem:[%s8554_s1 + $0x2e8] ss:$16 sps:$4 sm:$0xff]   ;;  %v5756_v39 = vld [vmem:[%s8554_s1 + $0x304] ss:$16 sps:$4 sm:$0xff]  }
  0x28   :  { %3249 = vmatprep.subr.bf16.mxu0 %v5670_v40  ;;  %3593 = vmatprep.subr.bf16.mxu1 %v5672_v41  ;;  %v5759_v40 = vld [vmem:[%s8554_s1 + $0x30c] ss:$16 sps:$4 sm:$0xff]   ;;  %v5754_v41 = vld [vmem:[%s8554_s1 + $0x300] ss:$16 sps:$4 sm:$0xff]  }
  0x2b   :  { %3250 = vmatpush1.bf16.msra.mxu0 %v5674_v42  ;;  %3594 = vmatpush1.bf16.msra.mxu1 %v5675_v43  ;;  %v5757_v42 = vld [vmem:[%s8554_s1 + $0x308] ss:$16 sps:$4 sm:$0xff]   ;;  %v5762_v43 = vld [vmem:[%s8554_s1 + $0x324] ss:$16 sps:$4 sm:$0xff]  }
  0x2c   :  { %3251 = vmatprep.subr.bf16.mxu0 %v5676_v44  ;;  %3595 = vmatprep.subr.bf16.mxu1 %v5678_v45  ;;  %v5765_v44 = vld [vmem:[%s8554_s1 + $0x32c] ss:$16 sps:$4 sm:$0xff]   ;;  %v5760_v45 = vld [vmem:[%s8554_s1 + $0x320] ss:$16 sps:$4 sm:$0xff]  }
  0x2f   :  { %3252 = vmatpush1.bf16.msra.mxu0 %v5680_v48  ;;  %3596 = vmatpush1.bf16.msra.mxu1 %v5681_v49  ;;  %v5771_v48 = vld [vmem:[%s8554_s1 + $0x34c] ss:$16 sps:$4 sm:$0xff]   ;;  %v5766_v49 = vld [vmem:[%s8554_s1 + $0x340] ss:$16 sps:$4 sm:$0xff]  }
  0x30   :  { %3253 = vmatprep.subr.bf16.mxu0 %v5682_v51  ;;  %3597 = vmatprep.subr.bf16.mxu1 %v5684_v52  ;;  %v5774_v51 = vld [vmem:[%s8554_s1 + $0x364] ss:$16 sps:$4 sm:$0xff]   ;;  %v5777_v52 = vld [vmem:[%s8554_s1 + $0x36c] ss:$16 sps:$4 sm:$0xff]  }
  0x33   :  { %3254 = vmatpush1.bf16.msra.mxu0 %v5686_v53  ;;  %3598 = vmatpush1.bf16.msra.mxu1 %v5687_v54  ;;  %v5772_v53 = vld [vmem:[%s8554_s1 + $0x360] ss:$16 sps:$4 sm:$0xff]   ;;  %v5775_v54 = vld [vmem:[%s8554_s1 + $0x368] ss:$16 sps:$4 sm:$0xff]  }
  0x34   :  { %3255 = vmatprep.subr.bf16.mxu0 %v5688_v55  ;;  %3599 = vmatprep.subr.bf16.mxu1 %v5690_v56  ;;  %v5780_v55 = vld [vmem:[%s8554_s1 + $0x384] ss:$16 sps:$4 sm:$0xff]   ;;  %v5783_v56 = vld [vmem:[%s8554_s1 + $0x38c] ss:$16 sps:$4 sm:$0xff]  }
  0x37   :  { %3256 = vmatpush1.bf16.msra.mxu0 %v5692_v57  ;;  %3600 = vmatpush1.bf16.msra.mxu1 %v5693_v58  ;;  %v5778_v57 = vld [vmem:[%s8554_s1 + $0x380] ss:$16 sps:$4 sm:$0xff]   ;;  %v5781_v58 = vld [vmem:[%s8554_s1 + $0x388] ss:$16 sps:$4 sm:$0xff]  }
  0x38   :  { %3257 = vmatprep.subr.bf16.mxu0 %v5694_v59  ;;  %3601 = vmatprep.subr.bf16.mxu1 %v5696_v60  ;;  %v5786_v59 = vld [vmem:[%s8554_s1 + $0x3a4] ss:$16 sps:$4 sm:$0xff]   ;;  %v5789_v60 = vld [vmem:[%s8554_s1 + $0x3ac] ss:$16 sps:$4 sm:$0xff]  }
  0x3b   :  { %3258 = vmatpush1.bf16.msra.mxu0 %v5698_v61  ;;  %3602 = vmatpush1.bf16.msra.mxu1 %v5699_v62  ;;  %v5784_v61 = vld [vmem:[%s8554_s1 + $0x3a0] ss:$16 sps:$4 sm:$0xff]   ;;  %v5787_v62 = vld [vmem:[%s8554_s1 + $0x3a8] ss:$16 sps:$4 sm:$0xff]  }
  0x3c   :  { %3259 = vmatprep.subr.bf16.mxu0 %v5700_v63  ;;  %3603 = vmatprep.subr.bf16.mxu1 %v5702_v0  ;;  %v5792_v63 = vld [vmem:[%s8554_s1 + $0x3c4] ss:$16 sps:$4 sm:$0xff]   ;;  %v5795_v0 = vld [vmem:[%s8554_s1 + $0x3cc] ss:$16 sps:$4 sm:$0xff]  }
  0x3f   :  { %3260 = vmatpush1.bf16.msra.mxu0 %v5704_v1  ;;  %3604 = vmatpush1.bf16.msra.mxu1 %v5705_v2  ;;  %v5790_v1 = vld [vmem:[%s8554_s1 + $0x3c0] ss:$16 sps:$4 sm:$0xff]   ;;  %v5793_v2 = vld [vmem:[%s8554_s1 + $0x3c8] ss:$16 sps:$4 sm:$0xff]  }
  0x40   :  { %3272 = vmatprep.subr.bf16.mxu0 %v5708_v3  ;;  %3616 = vmatprep.subr.bf16.mxu1 %v5711_v4  ;;  %v5798_v3 = vld [vmem:[%s8554_s1 + $0x3e4] ss:$16 sps:$4 sm:$0xff]   ;;  %v5801_v4 = vld [vmem:[%s8554_s1 + $0x3ec] ss:$16 sps:$4 sm:$0xff]  }
  0x42   :  { %3262 = vmatmul.mubr.bf16.vlgmr.msra.gmra.mrb[0].mxu0 %v4829_v5  ;;  %3606 = vmatmul.mubr.bf16.vlgmr.msra.gmra.mrb[0].mxu1 %v4829_v5  ;;  %v5796_v5 = vld [vmem:[%s8554_s1 + $0x3e0] ss:$16 sps:$4 sm:$0xff]  }
  0x43   :  { %3273 = vmatpush1.bf16.msra.mxu0 %v5706_v6  ;;  %3617 = vmatpush1.bf16.msra.mxu1 %v5709_v7  ;;  %v5799_v6 = vld [vmem:[%s8554_s1 + $0x3e8] ss:$16 sps:$4 sm:$0xff]   ;;  %v5804_v7 = vld [vmem:[%s8554_s1 + $0x404] ss:$16 sps:$4 sm:$0xff]  }
  0x44   :  { %3274 = vmatprep.subr.bf16.mxu0 %v5714_v8  ;;  %3618 = vmatprep.subr.bf16.mxu1 %v5717_v9  ;;  %v5807_v8 = vld [vmem:[%s8554_s1 + $0x40c] ss:$16 sps:$4 sm:$0xff]   ;;  %v4831_v9 = vcombine.low %v6847_v30, %v6852_v31  ;;  %v5829_v30 = vld [vmem:[%s8554_s1 + $0x488] ss:$16 sps:$4 sm:$0xff]   ;;  %v5834_v31 = vld [vmem:[%s8554_s1 + $0x4a4] ss:$16 sps:$4 sm:$0xff]  }
  0x45   :  { %3304 = vmatprep.mubr.bf16.mxu0 %v4832_v34  ;;  %3648 = vmatprep.mubr.bf16.mxu1 %v4832_v34  ;;  %v5835_v34 = vld [vmem:[%s8554_s1 + $0x4a8] ss:$16 sps:$4 sm:$0xff]  }
  0x47   :  { %3275 = vmatpush1.bf16.msra.mxu0 %v5712_v10  ;;  %3619 = vmatpush1.bf16.msra.mxu1 %v5715_v11  ;;  %v5802_v10 = vld [vmem:[%s8554_s1 + $0x400] ss:$16 sps:$4 sm:$0xff]   ;;  %v5805_v11 = vld [vmem:[%s8554_s1 + $0x408] ss:$16 sps:$4 sm:$0xff]  }
  0x48   :  { %3276 = vmatprep.subr.bf16.mxu0 %v5720_v12  ;;  %3620 = vmatprep.subr.bf16.mxu1 %v5723_v13  ;;  %v5810_v12 = vld [vmem:[%s8554_s1 + $0x424] ss:$16 sps:$4 sm:$0xff]   ;;  %v5813_v13 = vld [vmem:[%s8554_s1 + $0x42c] ss:$16 sps:$4 sm:$0xff]  }
  0x4b   :  { %3277 = vmatpush1.bf16.msra.mxu0 %v5718_v14  ;;  %3621 = vmatpush1.bf16.msra.mxu1 %v5721_v15  ;;  %v6993_v14 = vld [vmem:[%s8555_s0 + $0x10] sm:$0xff] }
  0x4c   :  { %3278 = vmatprep.subr.bf16.mxu0 %v5726_v16  ;;  %3622 = vmatprep.subr.bf16.mxu1 %v5729_v17  ;;  %v6998_v15 = vld [vmem:[%s8555_s0 + $0x50] sm:$0xff] }
  0x4d   :  { %v4834_v16 = vcombine.high %v6993_v14, %v6998_v15  ;;  %v5808_v17 = vld [vmem:[%s8554_s1 + $0x420] ss:$16 sps:$4 sm:$0xff]  }
  0x4f   :  { %3279 = vmatpush1.bf16.msra.mxu0 %v5724_v18  ;;  %3623 = vmatpush1.bf16.msra.mxu1 %v5727_v19  ;;  %v5811_v18 = vld [vmem:[%s8554_s1 + $0x428] ss:$16 sps:$4 sm:$0xff]   ;;  %v5816_v19 = vld [vmem:[%s8554_s1 + $0x444] ss:$16 sps:$4 sm:$0xff]  }
  0x50   :  { %3280 = vmatprep.subr.bf16.mxu0 %v5732_v20  ;;  %3624 = vmatprep.subr.bf16.mxu1 %v5735_v21  ;;  %v5819_v20 = vld [vmem:[%s8554_s1 + $0x44c] ss:$16 sps:$4 sm:$0xff]   ;;  %v5814_v21 = vld [vmem:[%s8554_s1 + $0x440] ss:$16 sps:$4 sm:$0xff]  }
  0x53   :  { %3281 = vmatpush1.bf16.msra.mxu0 %v5730_v22  ;;  %3625 = vmatpush1.bf16.msra.mxu1 %v5733_v23  ;;  %v5817_v22 = vld [vmem:[%s8554_s1 + $0x448] ss:$16 sps:$4 sm:$0xff]   ;;  %v5822_v23 = vld [vmem:[%s8554_s1 + $0x464] ss:$16 sps:$4 sm:$0xff]  }
  0x54   :  { %3282 = vmatprep.subr.bf16.mxu0 %v5738_v24  ;;  %3626 = vmatprep.subr.bf16.mxu1 %v5741_v25  ;;  %v5825_v24 = vld [vmem:[%s8554_s1 + $0x46c] ss:$16 sps:$4 sm:$0xff]   ;;  %v5820_v25 = vld [vmem:[%s8554_s1 + $0x460] ss:$16 sps:$4 sm:$0xff]  }
  0x57   :  { %3283 = vmatpush1.bf16.msra.mxu0 %v5736_v26  ;;  %3627 = vmatpush1.bf16.msra.mxu1 %v5739_v27  ;;  %v5823_v26 = vld [vmem:[%s8554_s1 + $0x468] ss:$16 sps:$4 sm:$0xff]   ;;  %v5828_v27 = vld [vmem:[%s8554_s1 + $0x484] ss:$16 sps:$4 sm:$0xff]  }
  0x58   :  { %3284 = vmatprep.subr.bf16.mxu0 %v5744_v28  ;;  %3628 = vmatprep.subr.bf16.mxu1 %v5747_v29  ;;  %v5831_v28 = vld [vmem:[%s8554_s1 + $0x48c] ss:$16 sps:$4 sm:$0xff]   ;;  %v5826_v29 = vld [vmem:[%s8554_s1 + $0x480] ss:$16 sps:$4 sm:$0xff]  }
  0x5b   :  { %3285 = vmatpush1.bf16.msra.mxu0 %v5742_v32  ;;  %3629 = vmatpush1.bf16.msra.mxu1 %v5745_v33  ;;  %v5837_v32 = vld [vmem:[%s8554_s1 + $0x4ac] ss:$16 sps:$4 sm:$0xff]   ;;  %v5832_v33 = vld [vmem:[%s8554_s1 + $0x4a0] ss:$16 sps:$4 sm:$0xff]  }
  0x5c   :  { %3286 = vmatprep.subr.bf16.mxu0 %v5750_v35  ;;  %3630 = vmatprep.subr.bf16.mxu1 %v5753_v36  ;;  %v5840_v35 = vld [vmem:[%s8554_s1 + $0x4c4] ss:$16 sps:$4 sm:$0xff]   ;;  %v5843_v36 = vld [vmem:[%s8554_s1 + $0x4cc] ss:$16 sps:$4 sm:$0xff]  }
  0x5f   :  { %3287 = vmatpush1.bf16.msra.mxu0 %v5748_v37  ;;  %3631 = vmatpush1.bf16.msra.mxu1 %v5751_v38  ;;  %v5838_v37 = vld [vmem:[%s8554_s1 + $0x4c0] ss:$16 sps:$4 sm:$0xff]   ;;  %v5841_v38 = vld [vmem:[%s8554_s1 + $0x4c8] ss:$16 sps:$4 sm:$0xff]  }
  0x60   :  { %3288 = vmatprep.subr.bf16.mxu0 %v5756_v39  ;;  %3632 = vmatprep.subr.bf16.mxu1 %v5759_v40  ;;  %v5846_v39 = vld [vmem:[%s8554_s1 + $0x4e4] ss:$16 sps:$4 sm:$0xff]   ;;  %v5849_v40 = vld [vmem:[%s8554_s1 + $0x4ec] ss:$16 sps:$4 sm:$0xff]  }
  0x63   :  { %3289 = vmatpush1.bf16.msra.mxu0 %v5754_v41  ;;  %3633 = vmatpush1.bf16.msra.mxu1 %v5757_v42  ;;  %v5844_v41 = vld [vmem:[%s8554_s1 + $0x4e0] ss:$16 sps:$4 sm:$0xff]   ;;  %v5847_v42 = vld [vmem:[%s8554_s1 + $0x4e8] ss:$16 sps:$4 sm:$0xff]  }
  0x64   :  { %3290 = vmatprep.subr.bf16.mxu0 %v5762_v43  ;;  %3634 = vmatprep.subr.bf16.mxu1 %v5765_v44  ;;  %v5852_v43 = vld [vmem:[%s8554_s1 + $0x504] ss:$16 sps:$4 sm:$0xff]   ;;  %v5855_v44 = vld [vmem:[%s8554_s1 + $0x50c] ss:$16 sps:$4 sm:$0xff]  }
  0x67   :  { %3291 = vmatpush1.bf16.msra.mxu0 %v5760_v45  ;;  %3635 = vmatpush1.bf16.msra.mxu1 %v5763_v46  ;;  %v5850_v45 = vld [vmem:[%s8554_s1 + $0x500] ss:$16 sps:$4 sm:$0xff]   ;;  %v5853_v46 = vld [vmem:[%s8554_s1 + $0x508] ss:$16 sps:$4 sm:$0xff]  }
  0x68   :  { %3292 = vmatprep.subr.bf16.mxu0 %v5768_v47  ;;  %3636 = vmatprep.subr.bf16.mxu1 %v5771_v48  ;;  %v5858_v47 = vld [vmem:[%s8554_s1 + $0x524] ss:$16 sps:$4 sm:$0xff]   ;;  %v5861_v48 = vld [vmem:[%s8554_s1 + $0x52c] ss:$16 sps:$4 sm:$0xff]  }
  0x6b   :  { %3293 = vmatpush1.bf16.msra.mxu0 %v5766_v49  ;;  %3637 = vmatpush1.bf16.msra.mxu1 %v5769_v50  ;;  %v5856_v49 = vld [vmem:[%s8554_s1 + $0x520] ss:$16 sps:$4 sm:$0xff]   ;;  %v5859_v50 = vld [vmem:[%s8554_s1 + $0x528] ss:$16 sps:$4 sm:$0xff]  }
  0x6c   :  { %3294 = vmatprep.subr.bf16.mxu0 %v5774_v51  ;;  %3638 = vmatprep.subr.bf16.mxu1 %v5777_v52  ;;  %v5864_v51 = vld [vmem:[%s8554_s1 + $0x544] ss:$16 sps:$4 sm:$0xff]   ;;  %v5867_v52 = vld [vmem:[%s8554_s1 + $0x54c] ss:$16 sps:$4 sm:$0xff]  }
  0x6f   :  { %3295 = vmatpush1.bf16.msra.mxu0 %v5772_v53  ;;  %3639 = vmatpush1.bf16.msra.mxu1 %v5775_v54  ;;  %v5862_v53 = vld [vmem:[%s8554_s1 + $0x540] ss:$16 sps:$4 sm:$0xff]   ;;  %v5865_v54 = vld [vmem:[%s8554_s1 + $0x548] ss:$16 sps:$4 sm:$0xff]  }
  0x70   :  { %3296 = vmatprep.subr.bf16.mxu0 %v5780_v55  ;;  %3640 = vmatprep.subr.bf16.mxu1 %v5783_v56  ;;  %v5870_v55 = vld [vmem:[%s8554_s1 + $0x564] ss:$16 sps:$4 sm:$0xff]   ;;  %v5873_v56 = vld [vmem:[%s8554_s1 + $0x56c] ss:$16 sps:$4 sm:$0xff]  }
  0x73   :  { %3297 = vmatpush1.bf16.msra.mxu0 %v5778_v57  ;;  %3641 = vmatpush1.bf16.msra.mxu1 %v5781_v58  ;;  %v5868_v57 = vld [vmem:[%s8554_s1 + $0x560] ss:$16 sps:$4 sm:$0xff]   ;;  %v5871_v58 = vld [vmem:[%s8554_s1 + $0x568] ss:$16 sps:$4 sm:$0xff]  }
  0x74   :  { %3298 = vmatprep.subr.bf16.mxu0 %v5786_v59  ;;  %3642 = vmatprep.subr.bf16.mxu1 %v5789_v60  ;;  %v5876_v59 = vld [vmem:[%s8554_s1 + $0x584] ss:$16 sps:$4 sm:$0xff]   ;;  %v5879_v60 = vld [vmem:[%s8554_s1 + $0x58c] ss:$16 sps:$4 sm:$0xff]  }
  0x77   :  { %3299 = vmatpush1.bf16.msra.mxu0 %v5784_v61  ;;  %3643 = vmatpush1.bf16.msra.mxu1 %v5787_v62  ;;  %v5874_v61 = vld [vmem:[%s8554_s1 + $0x580] ss:$16 sps:$4 sm:$0xff]   ;;  %v5877_v62 = vld [vmem:[%s8554_s1 + $0x588] ss:$16 sps:$4 sm:$0xff]  }
  0x78   :  { %3300 = vmatprep.subr.bf16.mxu0 %v5792_v63  ;;  %3644 = vmatprep.subr.bf16.mxu1 %v5795_v0  ;;  %v5882_v63 = vld [vmem:[%s8554_s1 + $0x5a4] ss:$16 sps:$4 sm:$0xff]   ;;  %v5885_v0 = vld [vmem:[%s8554_s1 + $0x5ac] ss:$16 sps:$4 sm:$0xff]  }
  0x7b   :  { %3301 = vmatpush1.bf16.msra.mxu0 %v5790_v1  ;;  %3645 = vmatpush1.bf16.msra.mxu1 %v5793_v2  ;;  %v5880_v1 = vld [vmem:[%s8554_s1 + $0x5a0] ss:$16 sps:$4 sm:$0xff]   ;;  %v5883_v2 = vld [vmem:[%s8554_s1 + $0x5a8] ss:$16 sps:$4 sm:$0xff]  }
  0x7c   :  { %3302 = vmatprep.subr.bf16.mxu0 %v5798_v3  ;;  %3646 = vmatprep.subr.bf16.mxu1 %v5801_v4  ;;  %v5888_v3 = vld [vmem:[%s8554_s1 + $0x5c4] ss:$16 sps:$4 sm:$0xff]   ;;  %v5891_v4 = vld [vmem:[%s8554_s1 + $0x5cc] ss:$16 sps:$4 sm:$0xff]  }
  0x7f   :  { %3303 = vmatpush1.bf16.msra.mxu0 %v5796_v5  ;;  %3647 = vmatpush1.bf16.msra.mxu1 %v5799_v6  ;;  %v5886_v5 = vld [vmem:[%s8554_s1 + $0x5c0] ss:$16 sps:$4 sm:$0xff]   ;;  %v5889_v6 = vld [vmem:[%s8554_s1 + $0x5c8] ss:$16 sps:$4 sm:$0xff]  }
  0x80   :  { %3315 = vmatprep.subr.bf16.mxu0 %v5804_v7  ;;  %3659 = vmatprep.subr.bf16.mxu1 %v5807_v8  ;;  %v5894_v7 = vld [vmem:[%s8554_s1 + $0x5e4] ss:$16 sps:$4 sm:$0xff]   ;;  %v5897_v8 = vld [vmem:[%s8554_s1 + $0x5ec] ss:$16 sps:$4 sm:$0xff]  }
  0x82   :  { %3305 = vmatmul.mubr.bf16.vlgmr.msra.gmra.mrb[0].mxu0 %v4831_v9  ;;  %3649 = vmatmul.mubr.bf16.vlgmr.msra.gmra.mrb[0].mxu1 %v4831_v9  ;;  %v5892_v9 = vld [vmem:[%s8554_s1 + $0x5e0] ss:$16 sps:$4 sm:$0xff]  }
  0x83   :  { %3316 = vmatpush1.bf16.msra.mxu0 %v5802_v10  ;;  %3660 = vmatpush1.bf16.msra.mxu1 %v5805_v11  ;;  %v5895_v10 = vld [vmem:[%s8554_s1 + $0x5e8] ss:$16 sps:$4 sm:$0xff]   ;;  %v5900_v11 = vld [vmem:[%s8554_s1 + $0x604] ss:$16 sps:$4 sm:$0xff]  }
  0x84   :  { %3317 = vmatprep.subr.bf16.mxu0 %v5810_v12  ;;  %3661 = vmatprep.subr.bf16.mxu1 %v5813_v13  ;;  %v5903_v12 = vld [vmem:[%s8554_s1 + $0x60c] ss:$16 sps:$4 sm:$0xff]   ;;  %v5898_v13 = vld [vmem:[%s8554_s1 + $0x600] ss:$16 sps:$4 sm:$0xff]  }
  0x85   :  { %3347 = vmatprep.mubr.bf16.mxu0 %v4834_v16  ;;  %3691 = vmatprep.mubr.bf16.mxu1 %v4834_v16  ;;  %v5901_v16 = vld [vmem:[%s8554_s1 + $0x608] ss:$16 sps:$4 sm:$0xff]  }
  0x87   :  { %3318 = vmatpush1.bf16.msra.mxu0 %v5808_v17  ;;  %3662 = vmatpush1.bf16.msra.mxu1 %v5811_v18  ;;  %v4833_v17 = vcombine.low %v6993_v14, %v6998_v15  ;;  %v7193_v18 = vld [vmem:[%s8555_s0 + $0x18] sm:$0xff] }
  0x88   :  { %3319 = vmatprep.subr.bf16.mxu0 %v5816_v19  ;;  %3663 = vmatprep.subr.bf16.mxu1 %v5819_v20  ;;  %v7198_v19 = vld [vmem:[%s8555_s0 + $0x58] sm:$0xff]  ;;  %v5906_v20 = vld [vmem:[%s8554_s1 + $0x624] ss:$16 sps:$4 sm:$0xff]  }
  0x89   :  { %v5909_v14 = vld [vmem:[%s8554_s1 + $0x62c] ss:$16 sps:$4 sm:$0xff]   ;;  %v4836_v15 = vcombine.high %v7193_v18, %v7198_v19 }
  0x8b   :  { %3320 = vmatpush1.bf16.msra.mxu0 %v5814_v21  ;;  %3664 = vmatpush1.bf16.msra.mxu1 %v5817_v22  ;;  %v5904_v21 = vld [vmem:[%s8554_s1 + $0x620] ss:$16 sps:$4 sm:$0xff]   ;;  %v5907_v22 = vld [vmem:[%s8554_s1 + $0x628] ss:$16 sps:$4 sm:$0xff]  }
  0x8c   :  { %3321 = vmatprep.subr.bf16.mxu0 %v5822_v23  ;;  %3665 = vmatprep.subr.bf16.mxu1 %v5825_v24  ;;  %v5912_v23 = vld [vmem:[%s8554_s1 + $0x644] ss:$16 sps:$4 sm:$0xff]   ;;  %v5915_v24 = vld [vmem:[%s8554_s1 + $0x64c] ss:$16 sps:$4 sm:$0xff]  }
  0x8f   :  { %3322 = vmatpush1.bf16.msra.mxu0 %v5820_v25  ;;  %3666 = vmatpush1.bf16.msra.mxu1 %v5823_v26  ;;  %v5910_v25 = vld [vmem:[%s8554_s1 + $0x640] ss:$16 sps:$4 sm:$0xff]   ;;  %v5913_v26 = vld [vmem:[%s8554_s1 + $0x648] ss:$16 sps:$4 sm:$0xff]  }
  0x90   :  { %3323 = vmatprep.subr.bf16.mxu0 %v5828_v27  ;;  %3667 = vmatprep.subr.bf16.mxu1 %v5831_v28  ;;  %v5918_v27 = vld [vmem:[%s8554_s1 + $0x664] ss:$16 sps:$4 sm:$0xff]   ;;  %v5921_v28 = vld [vmem:[%s8554_s1 + $0x66c] ss:$16 sps:$4 sm:$0xff]  }
  0x93   :  { %3324 = vmatpush1.bf16.msra.mxu0 %v5826_v29  ;;  %3668 = vmatpush1.bf16.msra.mxu1 %v5829_v30  ;;  %v5916_v29 = vld [vmem:[%s8554_s1 + $0x660] ss:$16 sps:$4 sm:$0xff]   ;;  %v5919_v30 = vld [vmem:[%s8554_s1 + $0x668] ss:$16 sps:$4 sm:$0xff]  }
  0x94   :  { %3325 = vmatprep.subr.bf16.mxu0 %v5834_v31  ;;  %3669 = vmatprep.subr.bf16.mxu1 %v5837_v32  ;;  %v5924_v31 = vld [vmem:[%s8554_s1 + $0x684] ss:$16 sps:$4 sm:$0xff]   ;;  %v5927_v32 = vld [vmem:[%s8554_s1 + $0x68c] ss:$16 sps:$4 sm:$0xff]  }
  0x97   :  { %3326 = vmatpush1.bf16.msra.mxu0 %v5832_v33  ;;  %3670 = vmatpush1.bf16.msra.mxu1 %v5835_v34  ;;  %v5922_v33 = vld [vmem:[%s8554_s1 + $0x680] ss:$16 sps:$4 sm:$0xff]   ;;  %v5925_v34 = vld [vmem:[%s8554_s1 + $0x688] ss:$16 sps:$4 sm:$0xff]  }
  0x98   :  { %3327 = vmatprep.subr.bf16.mxu0 %v5840_v35  ;;  %3671 = vmatprep.subr.bf16.mxu1 %v5843_v36  ;;  %v5930_v35 = vld [vmem:[%s8554_s1 + $0x6a4] ss:$16 sps:$4 sm:$0xff]   ;;  %v5933_v36 = vld [vmem:[%s8554_s1 + $0x6ac] ss:$16 sps:$4 sm:$0xff]  }
  0x9b   :  { %3328 = vmatpush1.bf16.msra.mxu0 %v5838_v37  ;;  %3672 = vmatpush1.bf16.msra.mxu1 %v5841_v38  ;;  %v5928_v37 = vld [vmem:[%s8554_s1 + $0x6a0] ss:$16 sps:$4 sm:$0xff]   ;;  %v5931_v38 = vld [vmem:[%s8554_s1 + $0x6a8] ss:$16 sps:$4 sm:$0xff]  }
  0x9c   :  { %3329 = vmatprep.subr.bf16.mxu0 %v5846_v39  ;;  %3673 = vmatprep.subr.bf16.mxu1 %v5849_v40  ;;  %v5936_v39 = vld [vmem:[%s8554_s1 + $0x6c4] ss:$16 sps:$4 sm:$0xff]   ;;  %v5939_v40 = vld [vmem:[%s8554_s1 + $0x6cc] ss:$16 sps:$4 sm:$0xff]  }
  0x9f   :  { %3330 = vmatpush1.bf16.msra.mxu0 %v5844_v41  ;;  %3674 = vmatpush1.bf16.msra.mxu1 %v5847_v42  ;;  %v5934_v41 = vld [vmem:[%s8554_s1 + $0x6c0] ss:$16 sps:$4 sm:$0xff]   ;;  %v5937_v42 = vld [vmem:[%s8554_s1 + $0x6c8] ss:$16 sps:$4 sm:$0xff]  }
  0xa0   :  { %3331 = vmatprep.subr.bf16.mxu0 %v5852_v43  ;;  %3675 = vmatprep.subr.bf16.mxu1 %v5855_v44  ;;  %v5942_v43 = vld [vmem:[%s8554_s1 + $0x6e4] ss:$16 sps:$4 sm:$0xff]   ;;  %v5945_v44 = vld [vmem:[%s8554_s1 + $0x6ec] ss:$16 sps:$4 sm:$0xff]  }
  0xa3   :  { %3332 = vmatpush1.bf16.msra.mxu0 %v5850_v45  ;;  %3676 = vmatpush1.bf16.msra.mxu1 %v5853_v46  ;;  %v5940_v45 = vld [vmem:[%s8554_s1 + $0x6e0] ss:$16 sps:$4 sm:$0xff]   ;;  %v5943_v46 = vld [vmem:[%s8554_s1 + $0x6e8] ss:$16 sps:$4 sm:$0xff]  }
  0xa4   :  { %3333 = vmatprep.subr.bf16.mxu0 %v5858_v47  ;;  %3677 = vmatprep.subr.bf16.mxu1 %v5861_v48  ;;  %v5948_v47 = vld [vmem:[%s8554_s1 + $0x704] ss:$16 sps:$4 sm:$0xff]   ;;  %v5951_v48 = vld [vmem:[%s8554_s1 + $0x70c] ss:$16 sps:$4 sm:$0xff]  }
  0xa7   :  { %3334 = vmatpush1.bf16.msra.mxu0 %v5856_v49  ;;  %3678 = vmatpush1.bf16.msra.mxu1 %v5859_v50  ;;  %v5946_v49 = vld [vmem:[%s8554_s1 + $0x700] ss:$16 sps:$4 sm:$0xff]   ;;  %v5949_v50 = vld [vmem:[%s8554_s1 + $0x708] ss:$16 sps:$4 sm:$0xff]  }
  0xa8   :  { %3335 = vmatprep.subr.bf16.mxu0 %v5864_v51  ;;  %3679 = vmatprep.subr.bf16.mxu1 %v5867_v52  ;;  %v5954_v51 = vld [vmem:[%s8554_s1 + $0x724] ss:$16 sps:$4 sm:$0xff]   ;;  %v5957_v52 = vld [vmem:[%s8554_s1 + $0x72c] ss:$16 sps:$4 sm:$0xff]  }
  0xab   :  { %3336 = vmatpush1.bf16.msra.mxu0 %v5862_v53  ;;  %3680 = vmatpush1.bf16.msra.mxu1 %v5865_v54  ;;  %v5952_v53 = vld [vmem:[%s8554_s1 + $0x720] ss:$16 sps:$4 sm:$0xff]   ;;  %v5955_v54 = vld [vmem:[%s8554_s1 + $0x728] ss:$16 sps:$4 sm:$0xff]  }
  0xac   :  { %3337 = vmatprep.subr.bf16.mxu0 %v5870_v55  ;;  %3681 = vmatprep.subr.bf16.mxu1 %v5873_v56  ;;  %v5960_v55 = vld [vmem:[%s8554_s1 + $0x744] ss:$16 sps:$4 sm:$0xff]   ;;  %v5963_v56 = vld [vmem:[%s8554_s1 + $0x74c] ss:$16 sps:$4 sm:$0xff]  }
  0xaf   :  { %3338 = vmatpush1.bf16.msra.mxu0 %v5868_v57  ;;  %3682 = vmatpush1.bf16.msra.mxu1 %v5871_v58  ;;  %v5958_v57 = vld [vmem:[%s8554_s1 + $0x740] ss:$16 sps:$4 sm:$0xff]   ;;  %v5961_v58 = vld [vmem:[%s8554_s1 + $0x748] ss:$16 sps:$4 sm:$0xff]  }
  0xb0   :  { %3339 = vmatprep.subr.bf16.mxu0 %v5876_v59  ;;  %3683 = vmatprep.subr.bf16.mxu1 %v5879_v60  ;;  %v5966_v59 = vld [vmem:[%s8554_s1 + $0x764] ss:$16 sps:$4 sm:$0xff]   ;;  %v5969_v60 = vld [vmem:[%s8554_s1 + $0x76c] ss:$16 sps:$4 sm:$0xff]  }
  0xb3   :  { %3340 = vmatpush1.bf16.msra.mxu0 %v5874_v61  ;;  %3684 = vmatpush1.bf16.msra.mxu1 %v5877_v62  ;;  %v5964_v61 = vld [vmem:[%s8554_s1 + $0x760] ss:$16 sps:$4 sm:$0xff]   ;;  %v5967_v62 = vld [vmem:[%s8554_s1 + $0x768] ss:$16 sps:$4 sm:$0xff]  }
  0xb4   :  { %3341 = vmatprep.subr.bf16.mxu0 %v5882_v63  ;;  %3685 = vmatprep.subr.bf16.mxu1 %v5885_v0  ;;  %v5972_v63 = vld [vmem:[%s8554_s1 + $0x784] ss:$16 sps:$4 sm:$0xff]   ;;  %v5975_v0 = vld [vmem:[%s8554_s1 + $0x78c] ss:$16 sps:$4 sm:$0xff]  }
  0xb7   :  { %3342 = vmatpush1.bf16.msra.mxu0 %v5880_v1  ;;  %3686 = vmatpush1.bf16.msra.mxu1 %v5883_v2  ;;  %v5970_v1 = vld [vmem:[%s8554_s1 + $0x780] ss:$16 sps:$4 sm:$0xff]   ;;  %v5973_v2 = vld [vmem:[%s8554_s1 + $0x788] ss:$16 sps:$4 sm:$0xff]  }
  0xb8   :  { %3343 = vmatprep.subr.bf16.mxu0 %v5888_v3  ;;  %3687 = vmatprep.subr.bf16.mxu1 %v5891_v4  ;;  %v5978_v3 = vld [vmem:[%s8554_s1 + $0x7a4] ss:$16 sps:$4 sm:$0xff]   ;;  %v5981_v4 = vld [vmem:[%s8554_s1 + $0x7ac] ss:$16 sps:$4 sm:$0xff]  }
  0xbb   :  { %3344 = vmatpush1.bf16.msra.mxu0 %v5886_v5  ;;  %3688 = vmatpush1.bf16.msra.mxu1 %v5889_v6  ;;  %v5976_v5 = vld [vmem:[%s8554_s1 + $0x7a0] ss:$16 sps:$4 sm:$0xff]   ;;  %v5979_v6 = vld [vmem:[%s8554_s1 + $0x7a8] ss:$16 sps:$4 sm:$0xff]  }
  0xbc   :  { %3345 = vmatprep.subr.bf16.mxu0 %v5894_v7  ;;  %3689 = vmatprep.subr.bf16.mxu1 %v5897_v8  ;;  %v5984_v7 = vld [vmem:[%s8554_s1 + $0x7c4] ss:$16 sps:$4 sm:$0xff]   ;;  %v5987_v8 = vld [vmem:[%s8554_s1 + $0x7cc] ss:$16 sps:$4 sm:$0xff]  }
  0xbf   :  { %3346 = vmatpush1.bf16.msra.mxu0 %v5892_v9  ;;  %3690 = vmatpush1.bf16.msra.mxu1 %v5895_v10  ;;  %v5982_v9 = vld [vmem:[%s8554_s1 + $0x7c0] ss:$16 sps:$4 sm:$0xff]   ;;  %v5985_v10 = vld [vmem:[%s8554_s1 + $0x7c8] ss:$16 sps:$4 sm:$0xff]  }
  0xc0   :  { %3358 = vmatprep.subr.bf16.mxu0 %v5900_v11  ;;  %3702 = vmatprep.subr.bf16.mxu1 %v5903_v12  ;;  %v5990_v11 = vld [vmem:[%s8554_s1 + $0x7e4] ss:$16 sps:$4 sm:$0xff]   ;;  %v5993_v12 = vld [vmem:[%s8554_s1 + $0x7ec] ss:$16 sps:$4 sm:$0xff]  }
  0xc2   :  { %3348 = vmatmul.mubr.bf16.vlgmr.msra.gmra.mrb[0].mxu0 %v4833_v17  ;;  %3692 = vmatmul.mubr.bf16.vlgmr.msra.gmra.mrb[0].mxu1 %v4833_v17  ;;  %v5996_v17 = vld [vmem:[%s8554_s1 + $0x804] ss:$16 sps:$4 sm:$0xff]  }
  0xc3   :  { %3359 = vmatpush1.bf16.msra.mxu0 %v5898_v13  ;;  %3703 = vmatpush1.bf16.msra.mxu1 %v5901_v16  ;;  %v5988_v13 = vld [vmem:[%s8554_s1 + $0x7e0] ss:$16 sps:$4 sm:$0xff]   ;;  %v5991_v16 = vld [vmem:[%s8554_s1 + $0x7e8] ss:$16 sps:$4 sm:$0xff]  }
  0xc4   :  { %3360 = vmatprep.subr.bf16.mxu0 %v5906_v20  ;;  %3704 = vmatprep.subr.bf16.mxu1 %v5909_v14  ;;  %v5999_v20 = vld [vmem:[%s8554_s1 + $0x80c] ss:$16 sps:$4 sm:$0xff]   ;;  %v7391_v14 = vld [vmem:[%s8555_s0 + $0x20] sm:$0xff] }
  0xc5   :  { %3390 = vmatprep.mubr.bf16.mxu0 %v4836_v15  ;;  %3734 = vmatprep.mubr.bf16.mxu1 %v4836_v15  ;;  %v4835_v15 = vcombine.low %v7193_v18, %v7198_v19  ;;  %v6002_v18 = vld [vmem:[%s8554_s1 + $0x824] ss:$16 sps:$4 sm:$0xff]   ;;  %v6005_v19 = vld [vmem:[%s8554_s1 + $0x82c] ss:$16 sps:$4 sm:$0xff]  }
  0xc7   :  { %3361 = vmatpush1.bf16.msra.mxu0 %v5904_v21  ;;  %3705 = vmatpush1.bf16.msra.mxu1 %v5907_v22  ;;  %v7398_v21 = vld [vmem:[%s8555_s0 + $0x60] sm:$0xff] }
  0xc8   :  { %3362 = vmatprep.subr.bf16.mxu0 %v5912_v23  ;;  %3706 = vmatprep.subr.bf16.mxu1 %v5915_v24  ;;  %v5994_v22 = vld [vmem:[%s8554_s1 + $0x800] ss:$16 sps:$4 sm:$0xff]   ;;  %v5997_v23 = vld [vmem:[%s8554_s1 + $0x808] ss:$16 sps:$4 sm:$0xff]   ;;  %v4838_v24 = vcombine.high %v7391_v14, %v7398_v21 }
  0xcb   :  { %3363 = vmatpush1.bf16.msra.mxu0 %v5910_v25  ;;  %3707 = vmatpush1.bf16.msra.mxu1 %v5913_v26  ;;  %v6000_v25 = vld [vmem:[%s8554_s1 + $0x820] ss:$16 sps:$4 sm:$0xff]   ;;  %v6003_v26 = vld [vmem:[%s8554_s1 + $0x828] ss:$16 sps:$4 sm:$0xff]  }
  0xcc   :  { %3364 = vmatprep.subr.bf16.mxu0 %v5918_v27  ;;  %3708 = vmatprep.subr.bf16.mxu1 %v5921_v28  ;;  %v6008_v27 = vld [vmem:[%s8554_s1 + $0x844] ss:$16 sps:$4 sm:$0xff]   ;;  %v6011_v28 = vld [vmem:[%s8554_s1 + $0x84c] ss:$16 sps:$4 sm:$0xff]  }
  0xcf   :  { %3365 = vmatpush1.bf16.msra.mxu0 %v5916_v29  ;;  %3709 = vmatpush1.bf16.msra.mxu1 %v5919_v30  ;;  %v6006_v29 = vld [vmem:[%s8554_s1 + $0x840] ss:$16 sps:$4 sm:$0xff]   ;;  %v6009_v30 = vld [vmem:[%s8554_s1 + $0x848] ss:$16 sps:$4 sm:$0xff]  }
  0xd0   :  { %3366 = vmatprep.subr.bf16.mxu0 %v5924_v31  ;;  %3710 = vmatprep.subr.bf16.mxu1 %v5927_v32  ;;  %v6014_v31 = vld [vmem:[%s8554_s1 + $0x864] ss:$16 sps:$4 sm:$0xff]   ;;  %v6017_v32 = vld [vmem:[%s8554_s1 + $0x86c] ss:$16 sps:$4 sm:$0xff]  }
  0xd3   :  { %3367 = vmatpush1.bf16.msra.mxu0 %v5922_v33  ;;  %3711 = vmatpush1.bf16.msra.mxu1 %v5925_v34  ;;  %v6012_v33 = vld [vmem:[%s8554_s1 + $0x860] ss:$16 sps:$4 sm:$0xff]   ;;  %v6015_v34 = vld [vmem:[%s8554_s1 + $0x868] ss:$16 sps:$4 sm:$0xff]  }
  0xd4   :  { %3368 = vmatprep.subr.bf16.mxu0 %v5930_v35  ;;  %3712 = vmatprep.subr.bf16.mxu1 %v5933_v36  ;;  %v6020_v35 = vld [vmem:[%s8554_s1 + $0x884] ss:$16 sps:$4 sm:$0xff]   ;;  %v6023_v36 = vld [vmem:[%s8554_s1 + $0x88c] ss:$16 sps:$4 sm:$0xff]  }
  0xd7   :  { %3369 = vmatpush1.bf16.msra.mxu0 %v5928_v37  ;;  %3713 = vmatpush1.bf16.msra.mxu1 %v5931_v38  ;;  %v6018_v37 = vld [vmem:[%s8554_s1 + $0x880] ss:$16 sps:$4 sm:$0xff]   ;;  %v6021_v38 = vld [vmem:[%s8554_s1 + $0x888] ss:$16 sps:$4 sm:$0xff]  }
  0xd8   :  { %3370 = vmatprep.subr.bf16.mxu0 %v5936_v39  ;;  %3714 = vmatprep.subr.bf16.mxu1 %v5939_v40  ;;  %v6026_v39 = vld [vmem:[%s8554_s1 + $0x8a4] ss:$16 sps:$4 sm:$0xff]   ;;  %v6029_v40 = vld [vmem:[%s8554_s1 + $0x8ac] ss:$16 sps:$4 sm:$0xff]  }
  0xdb   :  { %3371 = vmatpush1.bf16.msra.mxu0 %v5934_v41  ;;  %3715 = vmatpush1.bf16.msra.mxu1 %v5937_v42  ;;  %v6024_v41 = vld [vmem:[%s8554_s1 + $0x8a0] ss:$16 sps:$4 sm:$0xff]   ;;  %v6027_v42 = vld [vmem:[%s8554_s1 + $0x8a8] ss:$16 sps:$4 sm:$0xff]  }
  0xdc   :  { %3372 = vmatprep.subr.bf16.mxu0 %v5942_v43  ;;  %3716 = vmatprep.subr.bf16.mxu1 %v5945_v44  ;;  %v6032_v43 = vld [vmem:[%s8554_s1 + $0x8c4] ss:$16 sps:$4 sm:$0xff]   ;;  %v6035_v44 = vld [vmem:[%s8554_s1 + $0x8cc] ss:$16 sps:$4 sm:$0xff]  }
  0xdf   :  { %3373 = vmatpush1.bf16.msra.mxu0 %v5940_v45  ;;  %3717 = vmatpush1.bf16.msra.mxu1 %v5943_v46  ;;  %v6030_v45 = vld [vmem:[%s8554_s1 + $0x8c0] ss:$16 sps:$4 sm:$0xff]   ;;  %v6033_v46 = vld [vmem:[%s8554_s1 + $0x8c8] ss:$16 sps:$4 sm:$0xff]  }
  0xe0   :  { %3374 = vmatprep.subr.bf16.mxu0 %v5948_v47  ;;  %3718 = vmatprep.subr.bf16.mxu1 %v5951_v48  ;;  %v6038_v47 = vld [vmem:[%s8554_s1 + $0x8e4] ss:$16 sps:$4 sm:$0xff]   ;;  %v6041_v48 = vld [vmem:[%s8554_s1 + $0x8ec] ss:$16 sps:$4 sm:$0xff]  }
  0xe3   :  { %3375 = vmatpush1.bf16.msra.mxu0 %v5946_v49  ;;  %3719 = vmatpush1.bf16.msra.mxu1 %v5949_v50  ;;  %v6036_v49 = vld [vmem:[%s8554_s1 + $0x8e0] ss:$16 sps:$4 sm:$0xff]   ;;  %v6039_v50 = vld [vmem:[%s8554_s1 + $0x8e8] ss:$16 sps:$4 sm:$0xff]  }
  0xe4   :  { %3376 = vmatprep.subr.bf16.mxu0 %v5954_v51  ;;  %3720 = vmatprep.subr.bf16.mxu1 %v5957_v52  ;;  %v6044_v51 = vld [vmem:[%s8554_s1 + $0x904] ss:$16 sps:$4 sm:$0xff]   ;;  %v6047_v52 = vld [vmem:[%s8554_s1 + $0x90c] ss:$16 sps:$4 sm:$0xff]  }
  0xe7   :  { %3377 = vmatpush1.bf16.msra.mxu0 %v5952_v53  ;;  %3721 = vmatpush1.bf16.msra.mxu1 %v5955_v54  ;;  %v6042_v53 = vld [vmem:[%s8554_s1 + $0x900] ss:$16 sps:$4 sm:$0xff]   ;;  %v6045_v54 = vld [vmem:[%s8554_s1 + $0x908] ss:$16 sps:$4 sm:$0xff]  }
  0xe8   :  { %3378 = vmatprep.subr.bf16.mxu0 %v5960_v55  ;;  %3722 = vmatprep.subr.bf16.mxu1 %v5963_v56  ;;  %v6050_v55 = vld [vmem:[%s8554_s1 + $0x924] ss:$16 sps:$4 sm:$0xff]   ;;  %v6053_v56 = vld [vmem:[%s8554_s1 + $0x92c] ss:$16 sps:$4 sm:$0xff]  }
  0xeb   :  { %3379 = vmatpush1.bf16.msra.mxu0 %v5958_v57  ;;  %3723 = vmatpush1.bf16.msra.mxu1 %v5961_v58  ;;  %v6048_v57 = vld [vmem:[%s8554_s1 + $0x920] ss:$16 sps:$4 sm:$0xff]   ;;  %v6051_v58 = vld [vmem:[%s8554_s1 + $0x928] ss:$16 sps:$4 sm:$0xff]  }
  0xec   :  { %3380 = vmatprep.subr.bf16.mxu0 %v5966_v59  ;;  %3724 = vmatprep.subr.bf16.mxu1 %v5969_v60  ;;  %v6056_v59 = vld [vmem:[%s8554_s1 + $0x944] ss:$16 sps:$4 sm:$0xff]   ;;  %v6059_v60 = vld [vmem:[%s8554_s1 + $0x94c] ss:$16 sps:$4 sm:$0xff]  }
  0xef   :  { %3381 = vmatpush1.bf16.msra.mxu0 %v5964_v61  ;;  %3725 = vmatpush1.bf16.msra.mxu1 %v5967_v62  ;;  %v6054_v61 = vld [vmem:[%s8554_s1 + $0x940] ss:$16 sps:$4 sm:$0xff]   ;;  %v6057_v62 = vld [vmem:[%s8554_s1 + $0x948] ss:$16 sps:$4 sm:$0xff]  }
  0xf0   :  { %3382 = vmatprep.subr.bf16.mxu0 %v5972_v63  ;;  %3726 = vmatprep.subr.bf16.mxu1 %v5975_v0  ;;  %v6062_v63 = vld [vmem:[%s8554_s1 + $0x964] ss:$16 sps:$4 sm:$0xff]   ;;  %v6065_v0 = vld [vmem:[%s8554_s1 + $0x96c] ss:$16 sps:$4 sm:$0xff]  }
  0xf3   :  { %3383 = vmatpush1.bf16.msra.mxu0 %v5970_v1  ;;  %3727 = vmatpush1.bf16.msra.mxu1 %v5973_v2  ;;  %v6060_v1 = vld [vmem:[%s8554_s1 + $0x960] ss:$16 sps:$4 sm:$0xff]   ;;  %v6063_v2 = vld [vmem:[%s8554_s1 + $0x968] ss:$16 sps:$4 sm:$0xff]  }
  0xf4   :  { %3384 = vmatprep.subr.bf16.mxu0 %v5978_v3  ;;  %3728 = vmatprep.subr.bf16.mxu1 %v5981_v4  ;;  %v6068_v3 = vld [vmem:[%s8554_s1 + $0x984] ss:$16 sps:$4 sm:$0xff]   ;;  %v6071_v4 = vld [vmem:[%s8554_s1 + $0x98c] ss:$16 sps:$4 sm:$0xff]  }
  0xf7   :  { %3385 = vmatpush1.bf16.msra.mxu0 %v5976_v5  ;;  %3729 = vmatpush1.bf16.msra.mxu1 %v5979_v6  ;;  %v6066_v5 = vld [vmem:[%s8554_s1 + $0x980] ss:$16 sps:$4 sm:$0xff]   ;;  %v6069_v6 = vld [vmem:[%s8554_s1 + $0x988] ss:$16 sps:$4 sm:$0xff]  }
  0xf8   :  { %3386 = vmatprep.subr.bf16.mxu0 %v5984_v7  ;;  %3730 = vmatprep.subr.bf16.mxu1 %v5987_v8  ;;  %v6074_v7 = vld [vmem:[%s8554_s1 + $0x9a4] ss:$16 sps:$4 sm:$0xff]   ;;  %v6077_v8 = vld [vmem:[%s8554_s1 + $0x9ac] ss:$16 sps:$4 sm:$0xff]  }
  0xfb   :  { %3387 = vmatpush1.bf16.msra.mxu0 %v5982_v9  ;;  %3731 = vmatpush1.bf16.msra.mxu1 %v5985_v10  ;;  %v6072_v9 = vld [vmem:[%s8554_s1 + $0x9a0] ss:$16 sps:$4 sm:$0xff]   ;;  %v6075_v10 = vld [vmem:[%s8554_s1 + $0x9a8] ss:$16 sps:$4 sm:$0xff]  }
  0xfc   :  { %3388 = vmatprep.subr.bf16.mxu0 %v5990_v11  ;;  %3732 = vmatprep.subr.bf16.mxu1 %v5993_v12  ;;  %v6080_v11 = vld [vmem:[%s8554_s1 + $0x9c4] ss:$16 sps:$4 sm:$0xff]   ;;  %v6083_v12 = vld [vmem:[%s8554_s1 + $0x9cc] ss:$16 sps:$4 sm:$0xff]  }
  0xff   :  { %3389 = vmatpush1.bf16.msra.mxu0 %v5988_v13  ;;  %3733 = vmatpush1.bf16.msra.mxu1 %v5991_v16  ;;  %v6078_v13 = vld [vmem:[%s8554_s1 + $0x9c0] ss:$16 sps:$4 sm:$0xff]   ;;  %v6081_v16 = vld [vmem:[%s8554_s1 + $0x9c8] ss:$16 sps:$4 sm:$0xff]  }
 0x100   :  { %3401 = vmatprep.subr.bf16.mxu0 %v5996_v17  ;;  %3745 = vmatprep.subr.bf16.mxu1 %v5999_v20  ;;  %v6086_v17 = vld [vmem:[%s8554_s1 + $0x9e4] ss:$16 sps:$4 sm:$0xff]   ;;  %v6089_v20 = vld [vmem:[%s8554_s1 + $0x9ec] ss:$16 sps:$4 sm:$0xff]  }
 0x102   :  { %3391 = vmatmul.mubr.bf16.vlgmr.msra.gmra.mrb[0].mxu0 %v4835_v15  ;;  %3735 = vmatmul.mubr.bf16.vlgmr.msra.gmra.mrb[0].mxu1 %v4835_v15  ;;  %v6084_v15 = vld [vmem:[%s8554_s1 + $0x9e0] ss:$16 sps:$4 sm:$0xff]  }
 0x103   :  { %3402 = vmatpush1.bf16.msra.mxu0 %v5994_v22  ;;  %3746 = vmatpush1.bf16.msra.mxu1 %v5997_v23  ;;  %v6087_v22 = vld [vmem:[%s8554_s1 + $0x9e8] ss:$16 sps:$4 sm:$0xff]   ;;  %v6092_v23 = vld [vmem:[%s8554_s1 + $0xa04] ss:$16 sps:$4 sm:$0xff]  }
 0x104   :  { %3403 = vmatprep.subr.bf16.mxu0 %v6002_v18  ;;  %3747 = vmatprep.subr.bf16.mxu1 %v6005_v19  ;;  %v6095_v18 = vld [vmem:[%s8554_s1 + $0xa0c] ss:$16 sps:$4 sm:$0xff]  }
 0x105   :  { %3433 = vmatprep.mubr.bf16.mxu0 %v4838_v24  ;;  %3777 = vmatprep.mubr.bf16.mxu1 %v4838_v24  ;;  %v7597_v19 = vld [vmem:[%s8555_s0 + $0x28] sm:$0xff] }
 0x106   :  { %v7602_v24 = vld [vmem:[%s8555_s0 + $0x68] sm:$0xff] }
 0x107   :  { %3404 = vmatpush1.bf16.msra.mxu0 %v6000_v25  ;;  %3748 = vmatpush1.bf16.msra.mxu1 %v6003_v26  ;;  %v4837_v25 = vcombine.low %v7391_v14, %v7398_v21  ;;  %v6090_v26 = vld [vmem:[%s8554_s1 + $0xa00] ss:$16 sps:$4 sm:$0xff]   ;;  %v6101_v14 = vld [vmem:[%s8554_s1 + $0xa2c] ss:$16 sps:$4 sm:$0xff]   ;;  %v4840_v21 = vcombine.high %v7597_v19, %v7602_v24 }
 0x108   :  { %3405 = vmatprep.subr.bf16.mxu0 %v6008_v27  ;;  %3749 = vmatprep.subr.bf16.mxu1 %v6011_v28  ;;  %v6093_v27 = vld [vmem:[%s8554_s1 + $0xa08] ss:$16 sps:$4 sm:$0xff]   ;;  %v6098_v28 = vld [vmem:[%s8554_s1 + $0xa24] ss:$16 sps:$4 sm:$0xff]  }
 0x10b   :  { %3406 = vmatpush1.bf16.msra.mxu0 %v6006_v29  ;;  %3750 = vmatpush1.bf16.msra.mxu1 %v6009_v30  ;;  %v6096_v29 = vld [vmem:[%s8554_s1 + $0xa20] ss:$16 sps:$4 sm:$0xff]   ;;  %v6099_v30 = vld [vmem:[%s8554_s1 + $0xa28] ss:$16 sps:$4 sm:$0xff]  }
 0x10c   :  { %3407 = vmatprep.subr.bf16.mxu0 %v6014_v31  ;;  %3751 = vmatprep.subr.bf16.mxu1 %v6017_v32  ;;  %v6104_v31 = vld [vmem:[%s8554_s1 + $0xa44] ss:$16 sps:$4 sm:$0xff]   ;;  %v6107_v32 = vld [vmem:[%s8554_s1 + $0xa4c] ss:$16 sps:$4 sm:$0xff]  }
 0x10f   :  { %3408 = vmatpush1.bf16.msra.mxu0 %v6012_v33  ;;  %3752 = vmatpush1.bf16.msra.mxu1 %v6015_v34  ;;  %v6102_v33 = vld [vmem:[%s8554_s1 + $0xa40] ss:$16 sps:$4 sm:$0xff]   ;;  %v6105_v34 = vld [vmem:[%s8554_s1 + $0xa48] ss:$16 sps:$4 sm:$0xff]  }
 0x110   :  { %3409 = vmatprep.subr.bf16.mxu0 %v6020_v35  ;;  %3753 = vmatprep.subr.bf16.mxu1 %v6023_v36  ;;  %v6110_v35 = vld [vmem:[%s8554_s1 + $0xa64] ss:$16 sps:$4 sm:$0xff]   ;;  %v6113_v36 = vld [vmem:[%s8554_s1 + $0xa6c] ss:$16 sps:$4 sm:$0xff]  }
 0x113   :  { %3410 = vmatpush1.bf16.msra.mxu0 %v6018_v37  ;;  %3754 = vmatpush1.bf16.msra.mxu1 %v6021_v38  ;;  %v6108_v37 = vld [vmem:[%s8554_s1 + $0xa60] ss:$16 sps:$4 sm:$0xff]   ;;  %v6111_v38 = vld [vmem:[%s8554_s1 + $0xa68] ss:$16 sps:$4 sm:$0xff]  }
 0x114   :  { %3411 = vmatprep.subr.bf16.mxu0 %v6026_v39  ;;  %3755 = vmatprep.subr.bf16.mxu1 %v6029_v40  ;;  %v6116_v39 = vld [vmem:[%s8554_s1 + $0xa84] ss:$16 sps:$4 sm:$0xff]   ;;  %v6119_v40 = vld [vmem:[%s8554_s1 + $0xa8c] ss:$16 sps:$4 sm:$0xff]  }
 0x117   :  { %3412 = vmatpush1.bf16.msra.mxu0 %v6024_v41  ;;  %3756 = vmatpush1.bf16.msra.mxu1 %v6027_v42  ;;  %v6114_v41 = vld [vmem:[%s8554_s1 + $0xa80] ss:$16 sps:$4 sm:$0xff]   ;;  %v6117_v42 = vld [vmem:[%s8554_s1 + $0xa88] ss:$16 sps:$4 sm:$0xff]  }
 0x118   :  { %3413 = vmatprep.subr.bf16.mxu0 %v6032_v43  ;;  %3757 = vmatprep.subr.bf16.mxu1 %v6035_v44  ;;  %v6122_v43 = vld [vmem:[%s8554_s1 + $0xaa4] ss:$16 sps:$4 sm:$0xff]   ;;  %v6125_v44 = vld [vmem:[%s8554_s1 + $0xaac] ss:$16 sps:$4 sm:$0xff]  }
 0x11b   :  { %3414 = vmatpush1.bf16.msra.mxu0 %v6030_v45  ;;  %3758 = vmatpush1.bf16.msra.mxu1 %v6033_v46  ;;  %v6120_v45 = vld [vmem:[%s8554_s1 + $0xaa0] ss:$16 sps:$4 sm:$0xff]   ;;  %v6123_v46 = vld [vmem:[%s8554_s1 + $0xaa8] ss:$16 sps:$4 sm:$0xff]  }
 0x11c   :  { %3415 = vmatprep.subr.bf16.mxu0 %v6038_v47  ;;  %3759 = vmatprep.subr.bf16.mxu1 %v6041_v48  ;;  %v6128_v47 = vld [vmem:[%s8554_s1 + $0xac4] ss:$16 sps:$4 sm:$0xff]   ;;  %v6131_v48 = vld [vmem:[%s8554_s1 + $0xacc] ss:$16 sps:$4 sm:$0xff]  }
 0x11f   :  { %3416 = vmatpush1.bf16.msra.mxu0 %v6036_v49  ;;  %3760 = vmatpush1.bf16.msra.mxu1 %v6039_v50  ;;  %v6126_v49 = vld [vmem:[%s8554_s1 + $0xac0] ss:$16 sps:$4 sm:$0xff]   ;;  %v6129_v50 = vld [vmem:[%s8554_s1 + $0xac8] ss:$16 sps:$4 sm:$0xff]  }
 0x120   :  { %3417 = vmatprep.subr.bf16.mxu0 %v6044_v51  ;;  %3761 = vmatprep.subr.bf16.mxu1 %v6047_v52  ;;  %v6134_v51 = vld [vmem:[%s8554_s1 + $0xae4] ss:$16 sps:$4 sm:$0xff]   ;;  %v6137_v52 = vld [vmem:[%s8554_s1 + $0xaec] ss:$16 sps:$4 sm:$0xff]  }
 0x123   :  { %3418 = vmatpush1.bf16.msra.mxu0 %v6042_v53  ;;  %3762 = vmatpush1.bf16.msra.mxu1 %v6045_v54  ;;  %v6132_v53 = vld [vmem:[%s8554_s1 + $0xae0] ss:$16 sps:$4 sm:$0xff]   ;;  %v6135_v54 = vld [vmem:[%s8554_s1 + $0xae8] ss:$16 sps:$4 sm:$0xff]  }
 0x124   :  { %3419 = vmatprep.subr.bf16.mxu0 %v6050_v55  ;;  %3763 = vmatprep.subr.bf16.mxu1 %v6053_v56  ;;  %v6140_v55 = vld [vmem:[%s8554_s1 + $0xb04] ss:$16 sps:$4 sm:$0xff]   ;;  %v6143_v56 = vld [vmem:[%s8554_s1 + $0xb0c] ss:$16 sps:$4 sm:$0xff]  }
 0x127   :  { %3420 = vmatpush1.bf16.msra.mxu0 %v6048_v57  ;;  %3764 = vmatpush1.bf16.msra.mxu1 %v6051_v58  ;;  %v6138_v57 = vld [vmem:[%s8554_s1 + $0xb00] ss:$16 sps:$4 sm:$0xff]   ;;  %v6141_v58 = vld [vmem:[%s8554_s1 + $0xb08] ss:$16 sps:$4 sm:$0xff]  }
 0x128   :  { %3421 = vmatprep.subr.bf16.mxu0 %v6056_v59  ;;  %3765 = vmatprep.subr.bf16.mxu1 %v6059_v60  ;;  %v6146_v59 = vld [vmem:[%s8554_s1 + $0xb24] ss:$16 sps:$4 sm:$0xff]   ;;  %v6149_v60 = vld [vmem:[%s8554_s1 + $0xb2c] ss:$16 sps:$4 sm:$0xff]  }
 0x12b   :  { %3422 = vmatpush1.bf16.msra.mxu0 %v6054_v61  ;;  %3766 = vmatpush1.bf16.msra.mxu1 %v6057_v62  ;;  %v6144_v61 = vld [vmem:[%s8554_s1 + $0xb20] ss:$16 sps:$4 sm:$0xff]   ;;  %v6147_v62 = vld [vmem:[%s8554_s1 + $0xb28] ss:$16 sps:$4 sm:$0xff]  }
 0x12c   :  { %3423 = vmatprep.subr.bf16.mxu0 %v6062_v63  ;;  %3767 = vmatprep.subr.bf16.mxu1 %v6065_v0  ;;  %v6152_v63 = vld [vmem:[%s8554_s1 + $0xb44] ss:$16 sps:$4 sm:$0xff]   ;;  %v6155_v0 = vld [vmem:[%s8554_s1 + $0xb4c] ss:$16 sps:$4 sm:$0xff]  }
 0x12f   :  { %3424 = vmatpush1.bf16.msra.mxu0 %v6060_v1  ;;  %3768 = vmatpush1.bf16.msra.mxu1 %v6063_v2  ;;  %v6150_v1 = vld [vmem:[%s8554_s1 + $0xb40] ss:$16 sps:$4 sm:$0xff]   ;;  %v6153_v2 = vld [vmem:[%s8554_s1 + $0xb48] ss:$16 sps:$4 sm:$0xff]  }
 0x130   :  { %3425 = vmatprep.subr.bf16.mxu0 %v6068_v3  ;;  %3769 = vmatprep.subr.bf16.mxu1 %v6071_v4  ;;  %v6158_v3 = vld [vmem:[%s8554_s1 + $0xb64] ss:$16 sps:$4 sm:$0xff]   ;;  %v6161_v4 = vld [vmem:[%s8554_s1 + $0xb6c] ss:$16 sps:$4 sm:$0xff]  }
 0x133   :  { %3426 = vmatpush1.bf16.msra.mxu0 %v6066_v5  ;;  %3770 = vmatpush1.bf16.msra.mxu1 %v6069_v6  ;;  %v6156_v5 = vld [vmem:[%s8554_s1 + $0xb60] ss:$16 sps:$4 sm:$0xff]   ;;  %v6159_v6 = vld [vmem:[%s8554_s1 + $0xb68] ss:$16 sps:$4 sm:$0xff]  }
 0x134   :  { %3427 = vmatprep.subr.bf16.mxu0 %v6074_v7  ;;  %3771 = vmatprep.subr.bf16.mxu1 %v6077_v8  ;;  %v6164_v7 = vld [vmem:[%s8554_s1 + $0xb84] ss:$16 sps:$4 sm:$0xff]   ;;  %v6167_v8 = vld [vmem:[%s8554_s1 + $0xb8c] ss:$16 sps:$4 sm:$0xff]  }
 0x137   :  { %3428 = vmatpush1.bf16.msra.mxu0 %v6072_v9  ;;  %3772 = vmatpush1.bf16.msra.mxu1 %v6075_v10  ;;  %v6162_v9 = vld [vmem:[%s8554_s1 + $0xb80] ss:$16 sps:$4 sm:$0xff]   ;;  %v6165_v10 = vld [vmem:[%s8554_s1 + $0xb88] ss:$16 sps:$4 sm:$0xff]  }
 0x138   :  { %3429 = vmatprep.subr.bf16.mxu0 %v6080_v11  ;;  %3773 = vmatprep.subr.bf16.mxu1 %v6083_v12  ;;  %v6170_v11 = vld [vmem:[%s8554_s1 + $0xba4] ss:$16 sps:$4 sm:$0xff]   ;;  %v6173_v12 = vld [vmem:[%s8554_s1 + $0xbac] ss:$16 sps:$4 sm:$0xff]  }
 0x13b   :  { %3430 = vmatpush1.bf16.msra.mxu0 %v6078_v13  ;;  %3774 = vmatpush1.bf16.msra.mxu1 %v6081_v16  ;;  %v6168_v13 = vld [vmem:[%s8554_s1 + $0xba0] ss:$16 sps:$4 sm:$0xff]   ;;  %v6171_v16 = vld [vmem:[%s8554_s1 + $0xba8] ss:$16 sps:$4 sm:$0xff]  }
 0x13c   :  { %3431 = vmatprep.subr.bf16.mxu0 %v6086_v17  ;;  %3775 = vmatprep.subr.bf16.mxu1 %v6089_v20  ;;  %v6176_v17 = vld [vmem:[%s8554_s1 + $0xbc4] ss:$16 sps:$4 sm:$0xff]   ;;  %v6179_v20 = vld [vmem:[%s8554_s1 + $0xbcc] ss:$16 sps:$4 sm:$0xff]  }
 0x13f   :  { %3432 = vmatpush1.bf16.msra.mxu0 %v6084_v15  ;;  %3776 = vmatpush1.bf16.msra.mxu1 %v6087_v22  ;;  %v6174_v15 = vld [vmem:[%s8554_s1 + $0xbc0] ss:$16 sps:$4 sm:$0xff]   ;;  %v6177_v22 = vld [vmem:[%s8554_s1 + $0xbc8] ss:$16 sps:$4 sm:$0xff]  }
 0x140   :  { %3444 = vmatprep.subr.bf16.mxu0 %v6092_v23  ;;  %3788 = vmatprep.subr.bf16.mxu1 %v6095_v18  ;;  %v6182_v23 = vld [vmem:[%s8554_s1 + $0xbe4] ss:$16 sps:$4 sm:$0xff]   ;;  %v6185_v18 = vld [vmem:[%s8554_s1 + $0xbec] ss:$16 sps:$4 sm:$0xff]  }
 0x142   :  { %3434 = vmatmul.mubr.bf16.vlgmr.msra.gmra.mrb[0].mxu0 %v4837_v25  ;;  %3778 = vmatmul.mubr.bf16.vlgmr.msra.gmra.mrb[0].mxu1 %v4837_v25  ;;  %v6180_v25 = vld [vmem:[%s8554_s1 + $0xbe0] ss:$16 sps:$4 sm:$0xff]  }
 0x143   :  { %3445 = vmatpush1.bf16.msra.mxu0 %v6090_v26  ;;  %3789 = vmatpush1.bf16.msra.mxu1 %v6093_v27  ;;  %v6183_v26 = vld [vmem:[%s8554_s1 + $0xbe8] ss:$16 sps:$4 sm:$0xff]   ;;  %v6188_v27 = vld [vmem:[%s8554_s1 + $0xc04] ss:$16 sps:$4 sm:$0xff]  }
 0x144   :  { %3446 = vmatprep.subr.bf16.mxu0 %v6098_v28  ;;  %3790 = vmatprep.subr.bf16.mxu1 %v6101_v14  ;;  %v6191_v28 = vld [vmem:[%s8554_s1 + $0xc0c] ss:$16 sps:$4 sm:$0xff]   ;;  %v4839_v14 = vcombine.low %v7597_v19, %v7602_v24  ;;  %v6189_v19 = vld [vmem:[%s8554_s1 + $0xc08] ss:$16 sps:$4 sm:$0xff]   ;;  %v6194_v24 = vld [vmem:[%s8554_s1 + $0xc24] ss:$16 sps:$4 sm:$0xff]  }
 0x145   :  { %3476 = vmatprep.mubr.bf16.mxu0 %v4840_v21  ;;  %3820 = vmatprep.mubr.bf16.mxu1 %v4840_v21  ;;  %v7805_v21 = vld [vmem:[%s8555_s0 + $0x30] sm:$0xff] }
 0x147   :  { %3447 = vmatpush1.bf16.msra.mxu0 %v6096_v29  ;;  %3791 = vmatpush1.bf16.msra.mxu1 %v6099_v30  ;;  %v7810_v29 = vld [vmem:[%s8555_s0 + $0x70] sm:$0xff] }
 0x148   :  { %3448 = vmatprep.subr.bf16.mxu0 %v6104_v31  ;;  %3792 = vmatprep.subr.bf16.mxu1 %v6107_v32  ;;  %v6186_v30 = vld [vmem:[%s8554_s1 + $0xc00] ss:$16 sps:$4 sm:$0xff]   ;;  %v6197_v31 = vld [vmem:[%s8554_s1 + $0xc2c] ss:$16 sps:$4 sm:$0xff]   ;;  %v4842_v32 = vcombine.high %v7805_v21, %v7810_v29 }
 0x14b   :  { %3449 = vmatpush1.bf16.msra.mxu0 %v6102_v33  ;;  %3793 = vmatpush1.bf16.msra.mxu1 %v6105_v34  ;;  %v6192_v33 = vld [vmem:[%s8554_s1 + $0xc20] ss:$16 sps:$4 sm:$0xff]   ;;  %v6195_v34 = vld [vmem:[%s8554_s1 + $0xc28] ss:$16 sps:$4 sm:$0xff]  }
 0x14c   :  { %3450 = vmatprep.subr.bf16.mxu0 %v6110_v35  ;;  %3794 = vmatprep.subr.bf16.mxu1 %v6113_v36  ;;  %v6200_v35 = vld [vmem:[%s8554_s1 + $0xc44] ss:$16 sps:$4 sm:$0xff]   ;;  %v6203_v36 = vld [vmem:[%s8554_s1 + $0xc4c] ss:$16 sps:$4 sm:$0xff]  }
 0x14f   :  { %3451 = vmatpush1.bf16.msra.mxu0 %v6108_v37  ;;  %3795 = vmatpush1.bf16.msra.mxu1 %v6111_v38  ;;  %v6198_v37 = vld [vmem:[%s8554_s1 + $0xc40] ss:$16 sps:$4 sm:$0xff]   ;;  %v6201_v38 = vld [vmem:[%s8554_s1 + $0xc48] ss:$16 sps:$4 sm:$0xff]  }
 0x150   :  { %3452 = vmatprep.subr.bf16.mxu0 %v6116_v39  ;;  %3796 = vmatprep.subr.bf16.mxu1 %v6119_v40  ;;  %v6206_v39 = vld [vmem:[%s8554_s1 + $0xc64] ss:$16 sps:$4 sm:$0xff]   ;;  %v6209_v40 = vld [vmem:[%s8554_s1 + $0xc6c] ss:$16 sps:$4 sm:$0xff]  }
 0x153   :  { %3453 = vmatpush1.bf16.msra.mxu0 %v6114_v41  ;;  %3797 = vmatpush1.bf16.msra.mxu1 %v6117_v42  ;;  %v6204_v41 = vld [vmem:[%s8554_s1 + $0xc60] ss:$16 sps:$4 sm:$0xff]   ;;  %v6207_v42 = vld [vmem:[%s8554_s1 + $0xc68] ss:$16 sps:$4 sm:$0xff]  }
 0x154   :  { %3454 = vmatprep.subr.bf16.mxu0 %v6122_v43  ;;  %3798 = vmatprep.subr.bf16.mxu1 %v6125_v44  ;;  %v6212_v43 = vld [vmem:[%s8554_s1 + $0xc84] ss:$16 sps:$4 sm:$0xff]   ;;  %v6215_v44 = vld [vmem:[%s8554_s1 + $0xc8c] ss:$16 sps:$4 sm:$0xff]  }
 0x157   :  { %3455 = vmatpush1.bf16.msra.mxu0 %v6120_v45  ;;  %3799 = vmatpush1.bf16.msra.mxu1 %v6123_v46  ;;  %v6210_v45 = vld [vmem:[%s8554_s1 + $0xc80] ss:$16 sps:$4 sm:$0xff]   ;;  %v6213_v46 = vld [vmem:[%s8554_s1 + $0xc88] ss:$16 sps:$4 sm:$0xff]  }
 0x158   :  { %3456 = vmatprep.subr.bf16.mxu0 %v6128_v47  ;;  %3800 = vmatprep.subr.bf16.mxu1 %v6131_v48  ;;  %v6218_v47 = vld [vmem:[%s8554_s1 + $0xca4] ss:$16 sps:$4 sm:$0xff]   ;;  %v6221_v48 = vld [vmem:[%s8554_s1 + $0xcac] ss:$16 sps:$4 sm:$0xff]  }
 0x15b   :  { %3457 = vmatpush1.bf16.msra.mxu0 %v6126_v49  ;;  %3801 = vmatpush1.bf16.msra.mxu1 %v6129_v50  ;;  %v6216_v49 = vld [vmem:[%s8554_s1 + $0xca0] ss:$16 sps:$4 sm:$0xff]   ;;  %v6219_v50 = vld [vmem:[%s8554_s1 + $0xca8] ss:$16 sps:$4 sm:$0xff]  }
 0x15c   :  { %3458 = vmatprep.subr.bf16.mxu0 %v6134_v51  ;;  %3802 = vmatprep.subr.bf16.mxu1 %v6137_v52  ;;  %v6224_v51 = vld [vmem:[%s8554_s1 + $0xcc4] ss:$16 sps:$4 sm:$0xff]   ;;  %v6227_v52 = vld [vmem:[%s8554_s1 + $0xccc] ss:$16 sps:$4 sm:$0xff]  }
 0x15f   :  { %3459 = vmatpush1.bf16.msra.mxu0 %v6132_v53  ;;  %3803 = vmatpush1.bf16.msra.mxu1 %v6135_v54  ;;  %v6222_v53 = vld [vmem:[%s8554_s1 + $0xcc0] ss:$16 sps:$4 sm:$0xff]   ;;  %v6225_v54 = vld [vmem:[%s8554_s1 + $0xcc8] ss:$16 sps:$4 sm:$0xff]  }
 0x160   :  { %3460 = vmatprep.subr.bf16.mxu0 %v6140_v55  ;;  %3804 = vmatprep.subr.bf16.mxu1 %v6143_v56  ;;  %v6230_v55 = vld [vmem:[%s8554_s1 + $0xce4] ss:$16 sps:$4 sm:$0xff]   ;;  %v6233_v56 = vld [vmem:[%s8554_s1 + $0xcec] ss:$16 sps:$4 sm:$0xff]  }
 0x163   :  { %3461 = vmatpush1.bf16.msra.mxu0 %v6138_v57  ;;  %3805 = vmatpush1.bf16.msra.mxu1 %v6141_v58  ;;  %v6228_v57 = vld [vmem:[%s8554_s1 + $0xce0] ss:$16 sps:$4 sm:$0xff]   ;;  %v6231_v58 = vld [vmem:[%s8554_s1 + $0xce8] ss:$16 sps:$4 sm:$0xff]  }
 0x164   :  { %3462 = vmatprep.subr.bf16.mxu0 %v6146_v59  ;;  %3806 = vmatprep.subr.bf16.mxu1 %v6149_v60  ;;  %v6236_v59 = vld [vmem:[%s8554_s1 + $0xd04] ss:$16 sps:$4 sm:$0xff]   ;;  %v6239_v60 = vld [vmem:[%s8554_s1 + $0xd0c] ss:$16 sps:$4 sm:$0xff]  }
 0x167   :  { %3463 = vmatpush1.bf16.msra.mxu0 %v6144_v61  ;;  %3807 = vmatpush1.bf16.msra.mxu1 %v6147_v62  ;;  %v6234_v61 = vld [vmem:[%s8554_s1 + $0xd00] ss:$16 sps:$4 sm:$0xff]   ;;  %v6237_v62 = vld [vmem:[%s8554_s1 + $0xd08] ss:$16 sps:$4 sm:$0xff]  }
 0x168   :  { %3464 = vmatprep.subr.bf16.mxu0 %v6152_v63  ;;  %3808 = vmatprep.subr.bf16.mxu1 %v6155_v0  ;;  %v6242_v63 = vld [vmem:[%s8554_s1 + $0xd24] ss:$16 sps:$4 sm:$0xff]   ;;  %v6245_v0 = vld [vmem:[%s8554_s1 + $0xd2c] ss:$16 sps:$4 sm:$0xff]  }
 0x16b   :  { %3465 = vmatpush1.bf16.msra.mxu0 %v6150_v1  ;;  %3809 = vmatpush1.bf16.msra.mxu1 %v6153_v2  ;;  %v6240_v1 = vld [vmem:[%s8554_s1 + $0xd20] ss:$16 sps:$4 sm:$0xff]   ;;  %v6243_v2 = vld [vmem:[%s8554_s1 + $0xd28] ss:$16 sps:$4 sm:$0xff]  }
 0x16c   :  { %3466 = vmatprep.subr.bf16.mxu0 %v6158_v3  ;;  %3810 = vmatprep.subr.bf16.mxu1 %v6161_v4  ;;  %v6248_v3 = vld [vmem:[%s8554_s1 + $0xd44] ss:$16 sps:$4 sm:$0xff]   ;;  %v6251_v4 = vld [vmem:[%s8554_s1 + $0xd4c] ss:$16 sps:$4 sm:$0xff]  }
 0x16f   :  { %3467 = vmatpush1.bf16.msra.mxu0 %v6156_v5  ;;  %3811 = vmatpush1.bf16.msra.mxu1 %v6159_v6  ;;  %v6246_v5 = vld [vmem:[%s8554_s1 + $0xd40] ss:$16 sps:$4 sm:$0xff]   ;;  %v6249_v6 = vld [vmem:[%s8554_s1 + $0xd48] ss:$16 sps:$4 sm:$0xff]  }
 0x170   :  { %3468 = vmatprep.subr.bf16.mxu0 %v6164_v7  ;;  %3812 = vmatprep.subr.bf16.mxu1 %v6167_v8  ;;  %v6254_v7 = vld [vmem:[%s8554_s1 + $0xd64] ss:$16 sps:$4 sm:$0xff]   ;;  %v6257_v8 = vld [vmem:[%s8554_s1 + $0xd6c] ss:$16 sps:$4 sm:$0xff]  }
 0x173   :  { %3469 = vmatpush1.bf16.msra.mxu0 %v6162_v9  ;;  %3813 = vmatpush1.bf16.msra.mxu1 %v6165_v10  ;;  %v6252_v9 = vld [vmem:[%s8554_s1 + $0xd60] ss:$16 sps:$4 sm:$0xff]   ;;  %v6255_v10 = vld [vmem:[%s8554_s1 + $0xd68] ss:$16 sps:$4 sm:$0xff]  }
 0x174   :  { %3470 = vmatprep.subr.bf16.mxu0 %v6170_v11  ;;  %3814 = vmatprep.subr.bf16.mxu1 %v6173_v12  ;;  %v6260_v11 = vld [vmem:[%s8554_s1 + $0xd84] ss:$16 sps:$4 sm:$0xff]   ;;  %v6263_v12 = vld [vmem:[%s8554_s1 + $0xd8c] ss:$16 sps:$4 sm:$0xff]  }
 0x177   :  { %3471 = vmatpush1.bf16.msra.mxu0 %v6168_v13  ;;  %3815 = vmatpush1.bf16.msra.mxu1 %v6171_v16  ;;  %v6258_v13 = vld [vmem:[%s8554_s1 + $0xd80] ss:$16 sps:$4 sm:$0xff]   ;;  %v6261_v16 = vld [vmem:[%s8554_s1 + $0xd88] ss:$16 sps:$4 sm:$0xff]  }
 0x178   :  { %3472 = vmatprep.subr.bf16.mxu0 %v6176_v17  ;;  %3816 = vmatprep.subr.bf16.mxu1 %v6179_v20  ;;  %v6266_v17 = vld [vmem:[%s8554_s1 + $0xda4] ss:$16 sps:$4 sm:$0xff]   ;;  %v6269_v20 = vld [vmem:[%s8554_s1 + $0xdac] ss:$16 sps:$4 sm:$0xff]  }
 0x17b   :  { %3473 = vmatpush1.bf16.msra.mxu0 %v6174_v15  ;;  %3817 = vmatpush1.bf16.msra.mxu1 %v6177_v22  ;;  %v6264_v15 = vld [vmem:[%s8554_s1 + $0xda0] ss:$16 sps:$4 sm:$0xff]   ;;  %v6267_v22 = vld [vmem:[%s8554_s1 + $0xda8] ss:$16 sps:$4 sm:$0xff]  }
 0x17c   :  { %3474 = vmatprep.subr.bf16.mxu0 %v6182_v23  ;;  %3818 = vmatprep.subr.bf16.mxu1 %v6185_v18  ;;  %v6272_v23 = vld [vmem:[%s8554_s1 + $0xdc4] ss:$16 sps:$4 sm:$0xff]   ;;  %v6275_v18 = vld [vmem:[%s8554_s1 + $0xdcc] ss:$16 sps:$4 sm:$0xff]  }
 0x17f   :  { %3475 = vmatpush1.bf16.msra.mxu0 %v6180_v25  ;;  %3819 = vmatpush1.bf16.msra.mxu1 %v6183_v26  ;;  %v6270_v25 = vld [vmem:[%s8554_s1 + $0xdc0] ss:$16 sps:$4 sm:$0xff]   ;;  %v6273_v26 = vld [vmem:[%s8554_s1 + $0xdc8] ss:$16 sps:$4 sm:$0xff]  }
 0x180   :  { %3487 = vmatprep.subr.bf16.mxu0 %v6188_v27  ;;  %3831 = vmatprep.subr.bf16.mxu1 %v6191_v28  ;;  %v6278_v27 = vld [vmem:[%s8554_s1 + $0xde4] ss:$16 sps:$4 sm:$0xff]   ;;  %v6281_v28 = vld [vmem:[%s8554_s1 + $0xdec] ss:$16 sps:$4 sm:$0xff]  }
 0x182   :  { %3477 = vmatmul.mubr.bf16.vlgmr.msra.gmra.mrb[0].mxu0 %v4839_v14  ;;  %3821 = vmatmul.mubr.bf16.vlgmr.msra.gmra.mrb[0].mxu1 %v4839_v14  ;;  %v6276_v14 = vld [vmem:[%s8554_s1 + $0xde0] ss:$16 sps:$4 sm:$0xff]  }
 0x183   :  { %3488 = vmatpush1.bf16.msra.mxu0 %v6186_v30  ;;  %3832 = vmatpush1.bf16.msra.mxu1 %v6189_v19  ;;  %v6279_v30 = vld [vmem:[%s8554_s1 + $0xde8] ss:$16 sps:$4 sm:$0xff]   ;;  %v6284_v19 = vld [vmem:[%s8554_s1 + $0xe04] ss:$16 sps:$4 sm:$0xff]  }
 0x184   :  { %3489 = vmatprep.subr.bf16.mxu0 %v6194_v24  ;;  %3833 = vmatprep.subr.bf16.mxu1 %v6197_v31  ;;  %v6287_v24 = vld [vmem:[%s8554_s1 + $0xe0c] ss:$16 sps:$4 sm:$0xff]   ;;  %v4841_v31 = vcombine.low %v7805_v21, %v7810_v29  ;;  %v6285_v21 = vld [vmem:[%s8554_s1 + $0xe08] ss:$16 sps:$4 sm:$0xff]   ;;  %v6290_v29 = vld [vmem:[%s8554_s1 + $0xe24] ss:$16 sps:$4 sm:$0xff]  }
 0x185   :  { %3519 = vmatprep.mubr.bf16.mxu0 %v4842_v32  ;;  %3863 = vmatprep.mubr.bf16.mxu1 %v4842_v32  ;;  %v8011_v32 = vld [vmem:[%s8555_s0 + $0x38] sm:$0xff] }
 0x187   :  { %3490 = vmatpush1.bf16.msra.mxu0 %v6192_v33  ;;  %3834 = vmatpush1.bf16.msra.mxu1 %v6195_v34  ;;  %v8016_v33 = vld [vmem:[%s8555_s0 + $0x78] sm:$0xff]  ;;  %v6282_v34 = vld [vmem:[%s8554_s1 + $0xe00] ss:$16 sps:$4 sm:$0xff]  }
 0x188   :  { %3491 = vmatprep.subr.bf16.mxu0 %v6200_v35  ;;  %3835 = vmatprep.subr.bf16.mxu1 %v6203_v36  ;;  %v6293_v35 = vld [vmem:[%s8554_s1 + $0xe2c] ss:$16 sps:$4 sm:$0xff]   ;;  %v4844_v36 = vcombine.high %v8011_v32, %v8016_v33 }
 0x18b   :  { %3492 = vmatpush1.bf16.msra.mxu0 %v6198_v37  ;;  %3836 = vmatpush1.bf16.msra.mxu1 %v6201_v38  ;;  %v6288_v37 = vld [vmem:[%s8554_s1 + $0xe20] ss:$16 sps:$4 sm:$0xff]   ;;  %v6291_v38 = vld [vmem:[%s8554_s1 + $0xe28] ss:$16 sps:$4 sm:$0xff]  }
 0x18c   :  { %3493 = vmatprep.subr.bf16.mxu0 %v6206_v39  ;;  %3837 = vmatprep.subr.bf16.mxu1 %v6209_v40  ;;  %v6296_v39 = vld [vmem:[%s8554_s1 + $0xe44] ss:$16 sps:$4 sm:$0xff]   ;;  %v6299_v40 = vld [vmem:[%s8554_s1 + $0xe4c] ss:$16 sps:$4 sm:$0xff]  }
 0x18f   :  { %3494 = vmatpush1.bf16.msra.mxu0 %v6204_v41  ;;  %3838 = vmatpush1.bf16.msra.mxu1 %v6207_v42  ;;  %v6294_v41 = vld [vmem:[%s8554_s1 + $0xe40] ss:$16 sps:$4 sm:$0xff]   ;;  %v6297_v42 = vld [vmem:[%s8554_s1 + $0xe48] ss:$16 sps:$4 sm:$0xff]  }
 0x190   :  { %3495 = vmatprep.subr.bf16.mxu0 %v6212_v43  ;;  %3839 = vmatprep.subr.bf16.mxu1 %v6215_v44  ;;  %v6302_v43 = vld [vmem:[%s8554_s1 + $0xe64] ss:$16 sps:$4 sm:$0xff]   ;;  %v6305_v44 = vld [vmem:[%s8554_s1 + $0xe6c] ss:$16 sps:$4 sm:$0xff]  }
 0x193   :  { %3496 = vmatpush1.bf16.msra.mxu0 %v6210_v45  ;;  %3840 = vmatpush1.bf16.msra.mxu1 %v6213_v46  ;;  %v6300_v45 = vld [vmem:[%s8554_s1 + $0xe60] ss:$16 sps:$4 sm:$0xff]   ;;  %v6303_v46 = vld [vmem:[%s8554_s1 + $0xe68] ss:$16 sps:$4 sm:$0xff]  }
 0x194   :  { %3497 = vmatprep.subr.bf16.mxu0 %v6218_v47  ;;  %3841 = vmatprep.subr.bf16.mxu1 %v6221_v48  ;;  %v6308_v47 = vld [vmem:[%s8554_s1 + $0xe84] ss:$16 sps:$4 sm:$0xff]   ;;  %v6311_v48 = vld [vmem:[%s8554_s1 + $0xe8c] ss:$16 sps:$4 sm:$0xff]  }
 0x197   :  { %3498 = vmatpush1.bf16.msra.mxu0 %v6216_v49  ;;  %3842 = vmatpush1.bf16.msra.mxu1 %v6219_v50  ;;  %v6306_v49 = vld [vmem:[%s8554_s1 + $0xe80] ss:$16 sps:$4 sm:$0xff]   ;;  %v6309_v50 = vld [vmem:[%s8554_s1 + $0xe88] ss:$16 sps:$4 sm:$0xff]  }
 0x198   :  { %3499 = vmatprep.subr.bf16.mxu0 %v6224_v51  ;;  %3843 = vmatprep.subr.bf16.mxu1 %v6227_v52  ;;  %v6314_v51 = vld [vmem:[%s8554_s1 + $0xea4] ss:$16 sps:$4 sm:$0xff]   ;;  %v6317_v52 = vld [vmem:[%s8554_s1 + $0xeac] ss:$16 sps:$4 sm:$0xff]  }
 0x19b   :  { %3500 = vmatpush1.bf16.msra.mxu0 %v6222_v53  ;;  %3844 = vmatpush1.bf16.msra.mxu1 %v6225_v54  ;;  %v6312_v53 = vld [vmem:[%s8554_s1 + $0xea0] ss:$16 sps:$4 sm:$0xff]   ;;  %v6315_v54 = vld [vmem:[%s8554_s1 + $0xea8] ss:$16 sps:$4 sm:$0xff]  }
 0x19c   :  { %3501 = vmatprep.subr.bf16.mxu0 %v6230_v55  ;;  %3845 = vmatprep.subr.bf16.mxu1 %v6233_v56  ;;  %v6320_v55 = vld [vmem:[%s8554_s1 + $0xec4] ss:$16 sps:$4 sm:$0xff]   ;;  %v6323_v56 = vld [vmem:[%s8554_s1 + $0xecc] ss:$16 sps:$4 sm:$0xff]  }
 0x19f   :  { %3502 = vmatpush1.bf16.msra.mxu0 %v6228_v57  ;;  %3846 = vmatpush1.bf16.msra.mxu1 %v6231_v58  ;;  %v6318_v57 = vld [vmem:[%s8554_s1 + $0xec0] ss:$16 sps:$4 sm:$0xff]   ;;  %v6321_v58 = vld [vmem:[%s8554_s1 + $0xec8] ss:$16 sps:$4 sm:$0xff]  }
 0x1a0   :  { %3503 = vmatprep.subr.bf16.mxu0 %v6236_v59  ;;  %3847 = vmatprep.subr.bf16.mxu1 %v6239_v60  ;;  %v6326_v59 = vld [vmem:[%s8554_s1 + $0xee4] ss:$16 sps:$4 sm:$0xff]   ;;  %v6329_v60 = vld [vmem:[%s8554_s1 + $0xeec] ss:$16 sps:$4 sm:$0xff]  }
 0x1a3   :  { %3504 = vmatpush1.bf16.msra.mxu0 %v6234_v61  ;;  %3848 = vmatpush1.bf16.msra.mxu1 %v6237_v62  ;;  %v6324_v61 = vld [vmem:[%s8554_s1 + $0xee0] ss:$16 sps:$4 sm:$0xff]   ;;  %v6327_v62 = vld [vmem:[%s8554_s1 + $0xee8] ss:$16 sps:$4 sm:$0xff]  }
 0x1a4   :  { %3505 = vmatprep.subr.bf16.mxu0 %v6242_v63  ;;  %3849 = vmatprep.subr.bf16.mxu1 %v6245_v0  ;;  %v6332_v63 = vld [vmem:[%s8554_s1 + $0xf04] ss:$16 sps:$4 sm:$0xff]   ;;  %v6335_v0 = vld [vmem:[%s8554_s1 + $0xf0c] ss:$16 sps:$4 sm:$0xff]  }
 0x1a7   :  { %3506 = vmatpush1.bf16.msra.mxu0 %v6240_v1  ;;  %3850 = vmatpush1.bf16.msra.mxu1 %v6243_v2  ;;  %v6330_v1 = vld [vmem:[%s8554_s1 + $0xf00] ss:$16 sps:$4 sm:$0xff]   ;;  %v6333_v2 = vld [vmem:[%s8554_s1 + $0xf08] ss:$16 sps:$4 sm:$0xff]  }
 0x1a8   :  { %3507 = vmatprep.subr.bf16.mxu0 %v6248_v3  ;;  %3851 = vmatprep.subr.bf16.mxu1 %v6251_v4  ;;  %v6338_v3 = vld [vmem:[%s8554_s1 + $0xf24] ss:$16 sps:$4 sm:$0xff]   ;;  %v6341_v4 = vld [vmem:[%s8554_s1 + $0xf2c] ss:$16 sps:$4 sm:$0xff]  }
 0x1ab   :  { %3508 = vmatpush1.bf16.msra.mxu0 %v6246_v5  ;;  %3852 = vmatpush1.bf16.msra.mxu1 %v6249_v6  ;;  %v6336_v5 = vld [vmem:[%s8554_s1 + $0xf20] ss:$16 sps:$4 sm:$0xff]   ;;  %v6339_v6 = vld [vmem:[%s8554_s1 + $0xf28] ss:$16 sps:$4 sm:$0xff]  }
 0x1ac   :  { %3509 = vmatprep.subr.bf16.mxu0 %v6254_v7  ;;  %3853 = vmatprep.subr.bf16.mxu1 %v6257_v8  ;;  %v6344_v7 = vld [vmem:[%s8554_s1 + $0xf44] ss:$16 sps:$4 sm:$0xff]   ;;  %v6347_v8 = vld [vmem:[%s8554_s1 + $0xf4c] ss:$16 sps:$4 sm:$0xff]  }
 0x1af   :  { %3510 = vmatpush1.bf16.msra.mxu0 %v6252_v9  ;;  %3854 = vmatpush1.bf16.msra.mxu1 %v6255_v10  ;;  %v6342_v9 = vld [vmem:[%s8554_s1 + $0xf40] ss:$16 sps:$4 sm:$0xff]   ;;  %v6345_v10 = vld [vmem:[%s8554_s1 + $0xf48] ss:$16 sps:$4 sm:$0xff]  }
 0x1b0   :  { %3511 = vmatprep.subr.bf16.mxu0 %v6260_v11  ;;  %3855 = vmatprep.subr.bf16.mxu1 %v6263_v12  ;;  %v6350_v11 = vld [vmem:[%s8554_s1 + $0xf64] ss:$16 sps:$4 sm:$0xff]   ;;  %v6353_v12 = vld [vmem:[%s8554_s1 + $0xf6c] ss:$16 sps:$4 sm:$0xff]  }
 0x1b3   :  { %3512 = vmatpush1.bf16.msra.mxu0 %v6258_v13  ;;  %3856 = vmatpush1.bf16.msra.mxu1 %v6261_v16  ;;  %v6348_v13 = vld [vmem:[%s8554_s1 + $0xf60] ss:$16 sps:$4 sm:$0xff]   ;;  %v6351_v16 = vld [vmem:[%s8554_s1 + $0xf68] ss:$16 sps:$4 sm:$0xff]  }
 0x1b4   :  { %3513 = vmatprep.subr.bf16.mxu0 %v6266_v17  ;;  %3857 = vmatprep.subr.bf16.mxu1 %v6269_v20  ;;  %v6356_v17 = vld [vmem:[%s8554_s1 + $0xf84] ss:$16 sps:$4 sm:$0xff]   ;;  %v6359_v20 = vld [vmem:[%s8554_s1 + $0xf8c] ss:$16 sps:$4 sm:$0xff]  }
 0x1b7   :  { %3514 = vmatpush1.bf16.msra.mxu0 %v6264_v15  ;;  %3858 = vmatpush1.bf16.msra.mxu1 %v6267_v22  ;;  %v6354_v15 = vld [vmem:[%s8554_s1 + $0xf80] ss:$16 sps:$4 sm:$0xff]   ;;  %v6357_v22 = vld [vmem:[%s8554_s1 + $0xf88] ss:$16 sps:$4 sm:$0xff]  }
 0x1b8   :  { %3515 = vmatprep.subr.bf16.mxu0 %v6272_v23  ;;  %3859 = vmatprep.subr.bf16.mxu1 %v6275_v18  ;;  %v6362_v23 = vld [vmem:[%s8554_s1 + $0xfa4] ss:$16 sps:$4 sm:$0xff]   ;;  %v6365_v18 = vld [vmem:[%s8554_s1 + $0xfac] ss:$16 sps:$4 sm:$0xff]  }
 0x1bb   :  { %3516 = vmatpush1.bf16.msra.mxu0 %v6270_v25  ;;  %3860 = vmatpush1.bf16.msra.mxu1 %v6273_v26  ;;  %v6360_v25 = vld [vmem:[%s8554_s1 + $0xfa0] ss:$16 sps:$4 sm:$0xff]   ;;  %v6363_v26 = vld [vmem:[%s8554_s1 + $0xfa8] ss:$16 sps:$4 sm:$0xff]  }
 0x1bc   :  { %3517 = vmatprep.subr.bf16.mxu0 %v6278_v27  ;;  %3861 = vmatprep.subr.bf16.mxu1 %v6281_v28  ;;  %v6368_v27 = vld [vmem:[%s8554_s1 + $0xfc4] ss:$16 sps:$4 sm:$0xff]   ;;  %v6371_v28 = vld [vmem:[%s8554_s1 + $0xfcc] ss:$16 sps:$4 sm:$0xff]  }
 0x1bf   :  { %3518 = vmatpush1.bf16.msra.mxu0 %v6276_v14  ;;  %3862 = vmatpush1.bf16.msra.mxu1 %v6279_v30  ;;  %v6366_v14 = vld [vmem:[%s8554_s1 + $0xfc0] ss:$16 sps:$4 sm:$0xff]   ;;  %v6369_v30 = vld [vmem:[%s8554_s1 + $0xfc8] ss:$16 sps:$4 sm:$0xff]  }
 0x1c0   :  { %3530 = vmatprep.subr.bf16.mxu0 %v6284_v19  ;;  %3874 = vmatprep.subr.bf16.mxu1 %v6287_v24  ;;  %v6374_v19 = vld [vmem:[%s8554_s1 + $0xfe4] ss:$16 sps:$4 sm:$0xff]   ;;  %v6377_v24 = vld [vmem:[%s8554_s1 + $0xfec] ss:$16 sps:$4 sm:$0xff]  }
 0x1c2   :  { %3520 = vmatmul.mubr.bf16.vlgmr.msra.gmra.mrb[0].mxu0 %v4841_v31  ;;  %3864 = vmatmul.mubr.bf16.vlgmr.msra.gmra.mrb[0].mxu1 %v4841_v31  ;;  %v6372_v31 = vld [vmem:[%s8554_s1 + $0xfe0] ss:$16 sps:$4 sm:$0xff]  }
 0x1c3   :  { %3531 = vmatpush1.bf16.msra.mxu0 %v6282_v34  ;;  %3875 = vmatpush1.bf16.msra.mxu1 %v6285_v21  ;;  %v6375_v34 = vld [vmem:[%s8554_s1 + $0xfe8] ss:$16 sps:$4 sm:$0xff]   ;;  %v6380_v21 = vld [vmem:[%s8556_s3 + $0x4] ss:$8 sps:$4 sm:$0xff]  }
 0x1c4   :  { %3532 = vmatprep.subr.bf16.mxu0 %v6290_v29  ;;  %3876 = vmatprep.subr.bf16.mxu1 %v6293_v35  ;;  %v4843_v29 = vcombine.low %v8011_v32, %v8016_v33  ;;  %v6378_v35 = vld [vmem:[%s8556_s3] ss:$8 sps:$4 sm:$0xff]   ;;  %v6386_v32 = vld [vmem:[%s8556_s3 + $0x24] ss:$8 sps:$4 sm:$0xff]  }
 0x1c5   :  { %3562 = vmatprep.mubr.bf16.mxu0 %v4844_v36  ;;  %3906 = vmatprep.mubr.bf16.mxu1 %v4844_v36  ;;  %v6383_v36 = vld [vmem:[%s8556_s3 + $0x14] ss:$8 sps:$4 sm:$0xff]   ;;  %v6384_v33 = vld [vmem:[%s8556_s3 + $0x20] ss:$8 sps:$4 sm:$0xff]  }
 0x1c7   :  { %3533 = vmatpush1.bf16.msra.mxu0 %v6288_v37  ;;  %3877 = vmatpush1.bf16.msra.mxu1 %v6291_v38  ;;  %v6381_v37 = vld [vmem:[%s8556_s3 + $0x10] ss:$8 sps:$4 sm:$0xff]   ;;  %v6389_v38 = vld [vmem:[%s8556_s3 + $0x34] ss:$8 sps:$4 sm:$0xff]  }
 0x1c8   :  { %3534 = vmatprep.subr.bf16.mxu0 %v6296_v39  ;;  %3878 = vmatprep.subr.bf16.mxu1 %v6299_v40  ;;  %v6387_v39 = vld [vmem:[%s8556_s3 + $0x30] ss:$8 sps:$4 sm:$0xff]   ;;  %v6392_v40 = vld [vmem:[%s8556_s3 + $0x44] ss:$8 sps:$4 sm:$0xff]  }
 0x1cb   :  { %3535 = vmatpush1.bf16.msra.mxu0 %v6294_v41  ;;  %3879 = vmatpush1.bf16.msra.mxu1 %v6297_v42  ;;  %v6390_v41 = vld [vmem:[%s8556_s3 + $0x40] ss:$8 sps:$4 sm:$0xff]   ;;  %v6395_v42 = vld [vmem:[%s8556_s3 + $0x54] ss:$8 sps:$4 sm:$0xff]  }
 0x1cc   :  { %3536 = vmatprep.subr.bf16.mxu0 %v6302_v43  ;;  %3880 = vmatprep.subr.bf16.mxu1 %v6305_v44  ;;  %v6393_v43 = vld [vmem:[%s8556_s3 + $0x50] ss:$8 sps:$4 sm:$0xff]   ;;  %v6398_v44 = vld [vmem:[%s8556_s3 + $0x64] ss:$8 sps:$4 sm:$0xff]  }
 0x1cf   :  { %3537 = vmatpush1.bf16.msra.mxu0 %v6300_v45  ;;  %3881 = vmatpush1.bf16.msra.mxu1 %v6303_v46  ;;  %v6396_v45 = vld [vmem:[%s8556_s3 + $0x60] ss:$8 sps:$4 sm:$0xff]   ;;  %v6401_v46 = vld [vmem:[%s8556_s3 + $0x74] ss:$8 sps:$4 sm:$0xff]  }
 0x1d0   :  { %3538 = vmatprep.subr.bf16.mxu0 %v6308_v47  ;;  %3882 = vmatprep.subr.bf16.mxu1 %v6311_v48  ;;  %v6399_v47 = vld [vmem:[%s8556_s3 + $0x70] ss:$8 sps:$4 sm:$0xff]   ;;  %v6404_v48 = vld [vmem:[%s8556_s3 + $0x84] ss:$8 sps:$4 sm:$0xff]  }
 0x1d3   :  { %3539 = vmatpush1.bf16.msra.mxu0 %v6306_v49  ;;  %3883 = vmatpush1.bf16.msra.mxu1 %v6309_v50  ;;  %v6402_v49 = vld [vmem:[%s8556_s3 + $0x80] ss:$8 sps:$4 sm:$0xff]   ;;  %v6407_v50 = vld [vmem:[%s8556_s3 + $0x94] ss:$8 sps:$4 sm:$0xff]  }
 0x1d4   :  { %3540 = vmatprep.subr.bf16.mxu0 %v6314_v51  ;;  %3884 = vmatprep.subr.bf16.mxu1 %v6317_v52  ;;  %v6405_v51 = vld [vmem:[%s8556_s3 + $0x90] ss:$8 sps:$4 sm:$0xff]   ;;  %v6410_v52 = vld [vmem:[%s8556_s3 + $0xa4] ss:$8 sps:$4 sm:$0xff]  }
 0x1d7   :  { %3541 = vmatpush1.bf16.msra.mxu0 %v6312_v53  ;;  %3885 = vmatpush1.bf16.msra.mxu1 %v6315_v54  ;;  %v6408_v53 = vld [vmem:[%s8556_s3 + $0xa0] ss:$8 sps:$4 sm:$0xff]   ;;  %v6413_v54 = vld [vmem:[%s8556_s3 + $0xb4] ss:$8 sps:$4 sm:$0xff]  }
 0x1d8   :  { %3542 = vmatprep.subr.bf16.mxu0 %v6320_v55  ;;  %3886 = vmatprep.subr.bf16.mxu1 %v6323_v56  ;;  %v6411_v55 = vld [vmem:[%s8556_s3 + $0xb0] ss:$8 sps:$4 sm:$0xff]   ;;  %v6416_v56 = vld [vmem:[%s8556_s3 + $0xc4] ss:$8 sps:$4 sm:$0xff]  }
 0x1db   :  { %3543 = vmatpush1.bf16.msra.mxu0 %v6318_v57  ;;  %3887 = vmatpush1.bf16.msra.mxu1 %v6321_v58  ;;  %v6414_v57 = vld [vmem:[%s8556_s3 + $0xc0] ss:$8 sps:$4 sm:$0xff]   ;;  %v6419_v58 = vld [vmem:[%s8556_s3 + $0xd4] ss:$8 sps:$4 sm:$0xff]  }
 0x1dc   :  { %3544 = vmatprep.subr.bf16.mxu0 %v6326_v59  ;;  %3888 = vmatprep.subr.bf16.mxu1 %v6329_v60  ;;  %v6417_v59 = vld [vmem:[%s8556_s3 + $0xd0] ss:$8 sps:$4 sm:$0xff]   ;;  %v6422_v60 = vld [vmem:[%s8556_s3 + $0xe4] ss:$8 sps:$4 sm:$0xff]  }
 0x1df   :  { %3545 = vmatpush1.bf16.msra.mxu0 %v6324_v61  ;;  %3889 = vmatpush1.bf16.msra.mxu1 %v6327_v62  ;;  %v6420_v61 = vld [vmem:[%s8556_s3 + $0xe0] ss:$8 sps:$4 sm:$0xff]   ;;  %v6425_v62 = vld [vmem:[%s8556_s3 + $0xf4] ss:$8 sps:$4 sm:$0xff]  }
 0x1e0   :  { %3546 = vmatprep.subr.bf16.mxu0 %v6332_v63  ;;  %3890 = vmatprep.subr.bf16.mxu1 %v6335_v0  ;;  %v6423_v63 = vld [vmem:[%s8556_s3 + $0xf0] ss:$8 sps:$4 sm:$0xff]   ;;  %v6428_v0 = vld [vmem:[%s8556_s3 + $0x104] ss:$8 sps:$4 sm:$0xff]  }
 0x1e3   :  { %3547 = vmatpush1.bf16.msra.mxu0 %v6330_v1  ;;  %3891 = vmatpush1.bf16.msra.mxu1 %v6333_v2  ;;  %v6474_v1 = vld [vmem:[%s8557_s5 + $0x40] sm:$0xff]  }
 0x1e4   :  { %3548 = vmatprep.subr.bf16.mxu0 %v6338_v3  ;;  %3892 = vmatprep.subr.bf16.mxu1 %v6341_v4  ;;  %v6475_v2 = vld [vmem:[%s8557_s5] sm:$0xff]   ;;  %v6476_v3 = vld [vmem:[%s8557_s5 + $0x48] sm:$0xff]  }
 0x1e5   :  { %v6477_v4 = vld [vmem:[%s8557_s5 + $0x8] sm:$0xff]  }
 0x1e7   :  { %3549 = vmatpush1.bf16.msra.mxu0 %v6336_v5  ;;  %3893 = vmatpush1.bf16.msra.mxu1 %v6339_v6  ;;  %v6478_v5 = vld [vmem:[%s8557_s5 + $0x50] sm:$0xff]  }
 0x1e8   :  { %3550 = vmatprep.subr.bf16.mxu0 %v6344_v7  ;;  %3894 = vmatprep.subr.bf16.mxu1 %v6347_v8  ;;  %v6479_v6 = vld [vmem:[%s8557_s5 + $0x10] sm:$0xff]   ;;  %v6480_v7 = vld [vmem:[%s8557_s5 + $0x58] sm:$0xff]  }
 0x1e9   :  { %v6481_v8 = vld [vmem:[%s8557_s5 + $0x18] sm:$0xff]  }
 0x1eb   :  { %3551 = vmatpush1.bf16.msra.mxu0 %v6342_v9  ;;  %3895 = vmatpush1.bf16.msra.mxu1 %v6345_v10  ;;  %v6482_v9 = vld [vmem:[%s8557_s5 + $0x60] sm:$0xff]  }
 0x1ec   :  { %3552 = vmatprep.subr.bf16.mxu0 %v6350_v11  ;;  %3896 = vmatprep.subr.bf16.mxu1 %v6353_v12  ;;  %v6483_v10 = vld [vmem:[%s8557_s5 + $0x20] sm:$0xff]   ;;  %v6484_v11 = vld [vmem:[%s8557_s5 + $0x68] sm:$0xff]   ;;  %v569_v12 = vlaneseq }
 0x1ef   :  { %3553 = vmatpush1.bf16.msra.mxu0 %v6348_v13  ;;  %3897 = vmatpush1.bf16.msra.mxu1 %v6351_v16  ;;  %v8340_v13 = vshrl.u32 %v569_v12, 7  ;;  %v6467_v12 = vld [vmem:[%s8556_s3 + $0x1d4] ss:$8 sps:$4 sm:$0xff]  }
 0x1f0   :  { %3554 = vmatprep.subr.bf16.mxu0 %v6356_v17  ;;  %3898 = vmatprep.subr.bf16.mxu1 %v6359_v20  ;;  %v567_v20 = vld [vmem:[%s8558_s2] sm:$0xf] }
 0x1f1   :  { %v571_v16 = vsub.s32 0, %v8340_v13  ;;  %v579_v17 = vsub.s32 2, %v8340_v13 }
 0x1f3   :  { %3555 = vmatpush1.bf16.msra.mxu0 %v6354_v15  ;;  %3899 = vmatpush1.bf16.msra.mxu1 %v6357_v22  ;;  %v575_v15 = vsub.s32 1, %v8340_v13  ;;  %v583_v22 = vsub.s32 3, %v8340_v13  ;;  %v6491_v13 = vld [vmem:[%s8559_s7 + $0x8] sm:$0xff]  }
 0x1f4   :  { %3556 = vmatprep.subr.bf16.mxu0 %v6362_v23  ;;  %3900 = vmatprep.subr.bf16.mxu1 %v6365_v18  ;;  %v572_v23 = vrot.slane %v567_v20, %v571_v16  ;;  %v580_v18 = vrot.slane %v567_v20, %v579_v17  ;;  %v6465_v17 = vld [vmem:[%s8556_s3 + $0x1d0] ss:$8 sps:$4 sm:$0xff]  }
 0x1f7   :  { %3557 = vmatpush1.bf16.msra.mxu0 %v6360_v25  ;;  %3901 = vmatpush1.bf16.msra.mxu1 %v6363_v26  ;;  %v576_v25 = vrot.slane %v567_v20, %v575_v15  ;;  %v584_v26 = vrot.slane %v567_v20, %v583_v22  ;;  %v6470_v20 = vld [vmem:[%s8556_s3 + $0x1e4] ss:$8 sps:$4 sm:$0xff]   ;;  %v6468_v22 = vld [vmem:[%s8556_s3 + $0x1e0] ss:$8 sps:$4 sm:$0xff]  }
 0x1f8   :  { %3558 = vmatprep.subr.bf16.mxu0 %v6368_v27  ;;  %3902 = vmatprep.subr.bf16.mxu1 %v6371_v28 }
 0x1fb   :  { %3559 = vmatpush1.bf16.msra.mxu0 %v6366_v14  ;;  %3903 = vmatpush1.bf16.msra.mxu1 %v6369_v30 }
 0x1fc   :  { %3560 = vmatprep.subr.bf16.mxu0 %v6374_v19  ;;  %3904 = vmatprep.subr.bf16.mxu1 %v6377_v24 }
 0x1ff   :  { %3561 = vmatpush1.bf16.msra.mxu0 %v6372_v31  ;;  %3905 = vmatpush1.bf16.msra.mxu1 %v6375_v34 }
 0x200   :  { %4325 = vmatprep.subr.bf16.mxu0 %v6380_v21  ;;  %5456 = vmatprep.subr.bf16.mxu1 %v6474_v1  ;;  %v6447_v1 = vld [vmem:[%s8556_s3 + $0x170] ss:$8 sps:$4 sm:$0xff]  }
 0x202   :  { %3563 = vmatmul.mubr.bf16.vlgmr.msra.gmra.mrb[0].mxu0 %v4843_v29  ;;  %3907 = vmatmul.mubr.bf16.vlgmr.msra.gmra.mrb[0].mxu1 %v4843_v29 }
 0x203   :  { %4326 = vmatpush1.bf16.msra.mxu0 %v6378_v35  ;;  %5457 = vmatpush3.bf16.msra.mxu1 %v6475_v2  ;;  %v6452_v2 = vld [vmem:[%s8556_s3 + $0x184] ss:$8 sps:$4 sm:$0xff]  }
 0x204   :  { %4327 = vmatprep.subr.bf16.mxu0 %v6383_v36  ;;  %5458 = vmatprep.subr.bf16.mxu1 %v6476_v3  ;;  %v6450_v3 = vld [vmem:[%s8556_s3 + $0x180] ss:$8 sps:$4 sm:$0xff]  }
 0x207   :  { %4328 = vmatpush1.bf16.msra.mxu0 %v6381_v37  ;;  %5459 = vmatpush3.bf16.msra.mxu1 %v6477_v4  ;;  %v6455_v4 = vld [vmem:[%s8556_s3 + $0x194] ss:$8 sps:$4 sm:$0xff]  }
 0x208   :  { %4329 = vmatprep.subr.bf16.mxu0 %v6386_v32  ;;  %5460 = vmatprep.subr.bf16.mxu1 %v6478_v5  ;;  %v6453_v5 = vld [vmem:[%s8556_s3 + $0x190] ss:$8 sps:$4 sm:$0xff]  }
 0x20b   :  { %4330 = vmatpush1.bf16.msra.mxu0 %v6384_v33  ;;  %5461 = vmatpush3.bf16.msra.mxu1 %v6479_v6  ;;  %v6458_v6 = vld [vmem:[%s8556_s3 + $0x1a4] ss:$8 sps:$4 sm:$0xff]  }
 0x20c   :  { %4331 = vmatprep.subr.bf16.mxu0 %v6389_v38  ;;  %5462 = vmatprep.subr.bf16.mxu1 %v6480_v7  ;;  %v6456_v7 = vld [vmem:[%s8556_s3 + $0x1a0] ss:$8 sps:$4 sm:$0xff]  }
 0x20f   :  { %4332 = vmatpush1.bf16.msra.mxu0 %v6387_v39  ;;  %5463 = vmatpush3.bf16.msra.mxu1 %v6481_v8  ;;  %v6461_v8 = vld [vmem:[%s8556_s3 + $0x1b4] ss:$8 sps:$4 sm:$0xff]  }
 0x210   :  { %4333 = vmatprep.subr.bf16.mxu0 %v6392_v40  ;;  %5464 = vmatprep.subr.bf16.mxu1 %v6482_v9  ;;  %v6459_v9 = vld [vmem:[%s8556_s3 + $0x1b0] ss:$8 sps:$4 sm:$0xff]  }
 0x213   :  { %4334 = vmatpush1.bf16.msra.mxu0 %v6390_v41  ;;  %5465 = vmatpush3.bf16.msra.mxu1 %v6483_v10  ;;  %v6464_v10 = vld [vmem:[%s8556_s3 + $0x1c4] ss:$8 sps:$4 sm:$0xff]  }
 0x214   :  { %4335 = vmatprep.subr.bf16.mxu0 %v6395_v42  ;;  %5466 = vmatprep.subr.bf16.mxu1 %v6484_v11  ;;  %v6462_v11 = vld [vmem:[%s8556_s3 + $0x1c0] ss:$8 sps:$4 sm:$0xff]  }
 0x217   :  { %4336 = vmatpush1.bf16.msra.mxu0 %v6393_v43 }
 0x218   :  { %4337 = vmatprep.subr.bf16.mxu0 %v6398_v44 }
 0x21b   :  { %4338 = vmatpush1.bf16.msra.mxu0 %v6396_v45 }
 0x21c   :  { %4339 = vmatprep.subr.bf16.mxu0 %v6401_v46 }
 0x21f   :  { %4340 = vmatpush1.bf16.msra.mxu0 %v6399_v47 }
 0x220   :  { %4341 = vmatprep.subr.bf16.mxu0 %v6404_v48 }
 0x223   :  { %4342 = vmatpush1.bf16.msra.mxu0 %v6402_v49 }
 0x224   :  { %4343 = vmatprep.subr.bf16.mxu0 %v6407_v50 }
 0x227   :  { %4344 = vmatpush1.bf16.msra.mxu0 %v6405_v51  ;;  %v6426_v51 = vld [vmem:[%s8556_s3 + $0x100] ss:$8 sps:$4 sm:$0xff]  }
 0x228   :  { %4345 = vmatprep.subr.bf16.mxu0 %v6410_v52  ;;  %v6431_v52 = vld [vmem:[%s8556_s3 + $0x114] ss:$8 sps:$4 sm:$0xff]  }
 0x22b   :  { %4346 = vmatpush1.bf16.msra.mxu0 %v6408_v53  ;;  %v6429_v53 = vld [vmem:[%s8556_s3 + $0x110] ss:$8 sps:$4 sm:$0xff]  }
 0x22c   :  { %4347 = vmatprep.subr.bf16.mxu0 %v6413_v54  ;;  %v6434_v54 = vld [vmem:[%s8556_s3 + $0x124] ss:$8 sps:$4 sm:$0xff]  }
 0x22f   :  { %4348 = vmatpush1.bf16.msra.mxu0 %v6411_v55  ;;  %v6432_v55 = vld [vmem:[%s8556_s3 + $0x120] ss:$8 sps:$4 sm:$0xff]  }
 0x230   :  { %4349 = vmatprep.subr.bf16.mxu0 %v6416_v56  ;;  %v6437_v56 = vld [vmem:[%s8556_s3 + $0x134] ss:$8 sps:$4 sm:$0xff]  }
 0x233   :  { %4350 = vmatpush1.bf16.msra.mxu0 %v6414_v57  ;;  %v6435_v57 = vld [vmem:[%s8556_s3 + $0x130] ss:$8 sps:$4 sm:$0xff]  }
 0x234   :  { %4351 = vmatprep.subr.bf16.mxu0 %v6419_v58  ;;  %v6440_v58 = vld [vmem:[%s8556_s3 + $0x144] ss:$8 sps:$4 sm:$0xff]  }
 0x237   :  { %4352 = vmatpush1.bf16.msra.mxu0 %v6417_v59  ;;  %v6438_v59 = vld [vmem:[%s8556_s3 + $0x140] ss:$8 sps:$4 sm:$0xff]  }
 0x238   :  { %4353 = vmatprep.subr.bf16.mxu0 %v6422_v60  ;;  %v6443_v60 = vld [vmem:[%s8556_s3 + $0x154] ss:$8 sps:$4 sm:$0xff]  }
 0x23b   :  { %4354 = vmatpush1.bf16.msra.mxu0 %v6420_v61  ;;  %v6441_v61 = vld [vmem:[%s8556_s3 + $0x150] ss:$8 sps:$4 sm:$0xff]  }
 0x23c   :  { %4355 = vmatprep.subr.bf16.mxu0 %v6425_v62  ;;  %v6446_v62 = vld [vmem:[%s8556_s3 + $0x164] ss:$8 sps:$4 sm:$0xff]  }
 0x23f   :  { %4356 = vmatpush1.bf16.msra.mxu0 %v6423_v63  ;;  %v6444_v63 = vld [vmem:[%s8556_s3 + $0x160] ss:$8 sps:$4 sm:$0xff]  }
 0x240   :  { %4368 = vmatprep.subr.bf16.mxu0 %v6428_v0  ;;  %v6449_v0 = vld [vmem:[%s8556_s3 + $0x174] ss:$8 sps:$4 sm:$0xff]  }
 0x2d5   :  { %v3564_v27 = vpop.f32.mrb[0].mxu0  ;;  %v3908_v28 = vpop.f32.mrb[0].mxu1 }
 0x2d6   :  { %v5536_v14 = vadd.f32 %v3564_v27, %v572_v23  ;;  %v5540_v30 = vadd.f32 %v3908_v28, %v580_v18  ;;  %v3566_v19 = vpop.f32.mrb[1].mxu0  ;;  %v3910_v24 = vpop.f32.mrb[1].mxu1  ;;  %v6487_v27 = vld [vmem:[%s8557_s5 + $0x30] sm:$0xff]   ;;  %v6488_v28 = vld [vmem:[%s8557_s5 + $0x78] sm:$0xff]  }
 0x2d7   :  { %v5537_v31 = vadd.f32 %v3566_v19, %v576_v25  ;;  %v5541_v34 = vadd.f32 %v3910_v24, %v584_v26  ;;  %v3568_v21 = vpop.f32.mrb[2].mxu0  ;;  %v3912_v29 = vpop.f32.mrb[2].mxu1  ;;  %v3993_v19 = vld [vmem:[%s8560_s4] sm:$0x3] }
 0x2d8   :  { %v5538_v35 = vadd.f32 %v3568_v21, %v572_v23  ;;  %v5542_v36 = vadd.f32 %v3912_v29, %v580_v18  ;;  %v3570_v37 = vpop.f32.mrb[3].mxu0  ;;  %v3914_v32 = vpop.f32.mrb[3].mxu1  ;;  %v3917_v39 = vmax.f32 %v5536_v14, 0.0  ;;  %v3919_v40 = vmax.f32 %v5540_v30, 0.0  ;;  %v6473_v23 = vld [vmem:[%s8556_s3 + $0x1f4] ss:$8 sps:$4 sm:$0xff]  }
 0x2d9   :  { %v5539_v33 = vadd.f32 %v3570_v37, %v576_v25  ;;  %v5543_v38 = vadd.f32 %v3914_v32, %v584_v26  ;;  %v3918_v43 = vmax.f32 %v5537_v31, 0.0  ;;  %v3920_v44 = vmax.f32 %v5541_v34, 0.0  ;;  %v6471_v18 = vld [vmem:[%s8556_s3 + $0x1f0] ss:$8 sps:$4 sm:$0xff]   ;;  %v6485_v25 = vld [vmem:[%s8557_s5 + $0x28] sm:$0xff]  }
 0x2da   :  { %v3921_v41 = vmax.f32 %v5538_v35, 0.0  ;;  %v3923_v42 = vmax.f32 %v5542_v36, 0.0  ;;  %5467 = vmatpush3.bf16.msra.mxu1 %v6485_v25  ;;  %v6486_v26 = vld [vmem:[%s8557_s5 + $0x70] sm:$0xff]   ;;  %v6489_v14 = vld [vmem:[%s8557_s5 + $0x38] sm:$0xff]   ;;  %v6506_v30 = vmov 0.0   ;;  %v3998_v24 = vrot.slane %v3993_v19, %v571_v16  ;;  %v6490_v16 = vld [vmem:[%s8559_s7] sm:$0xff]  }
 0x2db   :  { %v3922_v45 = vmax.f32 %v5539_v33, 0.0  ;;  %v3924_v46 = vmax.f32 %v5543_v38, 0.0  ;;  %5468 = vmatprep.subr.bf16.mxu1 %v6486_v26  ;;  %v4002_v31 = vrot.slane %v3993_v19, %v575_v15  ;;  %v6492_v15 = vld [vmem:[%s8559_s7 + $0x10] sm:$0xff]  }
 0x2dc   :  { %v3925_v47 = vpack.c.bf16 %v3921_v41, %v3917_v39  ;;  %v8353_v48 = vpack.c.bf16 %v3923_v42, %v3919_v40 }
 0x2dd   :  { %v3926_v49 = vpack.c.bf16 %v3922_v45, %v3918_v43  ;;  %v3928_v50 = vpack.c.bf16 %v3924_v46, %v3920_v44  ;;  %v6493_v44 = vld [vmem:[%s8559_s7 + $0x18] sm:$0xff]   ;;  %v6494_v45 = vld [vmem:[%s8559_s7 + $0x20] sm:$0xff]   ;;  %v6495_v46 = vld [vmem:[%s8559_s7 + $0x28] sm:$0xff]  }
 0x2de   :  { %5469 = vmatpush3.bf16.msra.mxu1 %v6487_v27 }
 0x2df   :  { %4357 = vmatprep.mubr.bf16.mxu0 %v3926_v49  ;;  %5470 = vmatprep.subr.bf16.mxu1 %v6488_v28 }
 0x2e0   :  { %4358 = vmatmul.mubr.bf16.vlgmr.msra.gmra.mrb[4].mxu0 %v3925_v47  ;;  %v6496_v47 = vld [vmem:[%s8559_s7 + $0x30] sm:$0xff]  }
 0x2e1   :  { %4369 = vmatpush1.bf16.msra.mxu0 %v6426_v51  ;;  %4400 = vmatprep.mubr.bf16.mxu0 %v3928_v50  ;;  %v5421_v50 = vld [vmem:[%s8562_s6] ss:$0 sm:$0xff] }
 0x2e2   :  { %4370 = vmatprep.subr.bf16.mxu0 %v6431_v52  ;;  %5471 = vmatpush3.bf16.msra.mxu1 %v6489_v14 }
 0x2e3   :  { %5496 = vmatprep.subr.bf16.mxu1 %v6506_v30 }
 0x2e5   :  { %4371 = vmatpush1.bf16.msra.mxu0 %v6429_v53 }
 0x2e6   :  { %4372 = vmatprep.subr.bf16.mxu0 %v6434_v54 }
 0x2e9   :  { %4373 = vmatpush1.bf16.msra.mxu0 %v6432_v55 }
 0x2ea   :  { %4374 = vmatprep.subr.bf16.mxu0 %v6437_v56 }
 0x2ed   :  { %4375 = vmatpush1.bf16.msra.mxu0 %v6435_v57 }
 0x2ee   :  { %4376 = vmatprep.subr.bf16.mxu0 %v6440_v58 }
 0x2f1   :  { %4377 = vmatpush1.bf16.msra.mxu0 %v6438_v59 }
 0x2f2   :  { %4378 = vmatprep.subr.bf16.mxu0 %v6443_v60  ;;  %v6498_v60 = vld [vmem:[%s8561_s9] sm:$0xff]  }
 0x2f5   :  { %4379 = vmatpush1.bf16.msra.mxu0 %v6441_v61 }
 0x2f6   :  { %4380 = vmatprep.subr.bf16.mxu0 %v6446_v62  ;;  %v6499_v62 = vld [vmem:[%s8561_s9 + $0x8] sm:$0xff]  }
 0x2f9   :  { %4381 = vmatpush1.bf16.msra.mxu0 %v6444_v63  ;;  %v6500_v63 = vld [vmem:[%s8561_s9 + $0x10] sm:$0xff]  }
 0x2fa   :  { %4382 = vmatprep.subr.bf16.mxu0 %v6449_v0  ;;  %v6501_v0 = vld [vmem:[%s8561_s9 + $0x18] sm:$0xff]  }
 0x2fd   :  { %4383 = vmatpush1.bf16.msra.mxu0 %v6447_v1  ;;  %v6502_v1 = vld [vmem:[%s8561_s9 + $0x20] sm:$0xff]  }
 0x2fe   :  { %4384 = vmatprep.subr.bf16.mxu0 %v6452_v2  ;;  %v6503_v2 = vld [vmem:[%s8561_s9 + $0x28] sm:$0xff]  }
 0x301   :  { %4385 = vmatpush1.bf16.msra.mxu0 %v6450_v3  ;;  %v6504_v3 = vld [vmem:[%s8561_s9 + $0x30] sm:$0xff]  }
 0x302   :  { %4386 = vmatprep.subr.bf16.mxu0 %v6455_v4  ;;  %v6505_v4 = vld [vmem:[%s8561_s9 + $0x38] sm:$0xff]  }
 0x305   :  { %4387 = vmatpush1.bf16.msra.mxu0 %v6453_v5  ;;  %v5438_v5 = vld [vmem:[%s8563_s8] ss:$0 sm:$0xff] }
 0x306   :  { %4388 = vmatprep.subr.bf16.mxu0 %v6458_v6 }
 0x309   :  { %4389 = vmatpush1.bf16.msra.mxu0 %v6456_v7 }
 0x30a   :  { %4390 = vmatprep.subr.bf16.mxu0 %v6461_v8 }
 0x30d   :  { %4391 = vmatpush1.bf16.msra.mxu0 %v6459_v9 }
 0x30e   :  { %4392 = vmatprep.subr.bf16.mxu0 %v6464_v10 }
 0x311   :  { %4393 = vmatpush1.bf16.msra.mxu0 %v6462_v11 }
 0x312   :  { %4394 = vmatprep.subr.bf16.mxu0 %v6467_v12 }
 0x315   :  { %4395 = vmatpush1.bf16.msra.mxu0 %v6465_v17 }
 0x316   :  { %4396 = vmatprep.subr.bf16.mxu0 %v6470_v20 }
 0x319   :  { %4397 = vmatpush1.bf16.msra.mxu0 %v6468_v22  ;;  %v5447_v22 = vld [vmem:[%s8564_s10] ss:$0 sm:$0xff] }
 0x31a   :  { %4398 = vmatprep.subr.bf16.mxu0 %v6473_v23 }
 0x31d   :  { %4399 = vmatpush1.bf16.msra.mxu0 %v6471_v18 }
 0x320   :  { %4401 = vmatmul.mubr.bf16.vlgmr.msra.gmra.mrb[4].mxu0 %v8353_v48  ;;  %v6497_v48 = vld [vmem:[%s8559_s7 + $0x38] sm:$0xff]  }
 0x3f3   :  { %v4402_v34 = vpop.f32.mrb[4].mxu0 }
 0x3f4   :  { %v5544_v21 = vadd.f32 %v4402_v34, %v3998_v24  ;;  %v4404_v29 = vpop.f32.mrb[5].mxu0 }
 0x3f5   :  { %v5545_v35 = vadd.f32 %v4404_v29, %v4002_v31  ;;  %v4406_v36 = vpop.f32.mrb[6].mxu0 }
 0x3f6   :  { %v5546_v37 = vadd.f32 %v4406_v36, %v3998_v24  ;;  %v4408_v32 = vpop.f32.mrb[7].mxu0  ;;  %v4411_v38 = vmax.f32 %v5544_v21, 0.0 }
 0x3f7   :  { %v5547_v33 = vadd.f32 %v4408_v32, %v4002_v31  ;;  %v4412_v40 = vmax.f32 %v5545_v35, 0.0 }
 0x3f8   :  { %v4413_v39 = vmax.f32 %v5546_v37, 0.0 }
 0x3f9   :  { %v4414_v41 = vmax.f32 %v5547_v33, 0.0 }
 0x3fa   :  { %v4415_v42 = vpack.c.bf16 %v4413_v39, %v4411_v38 }
 0x3fb   :  { %v4416_v43 = vpack.c.bf16 %v4414_v41, %v4412_v40 }
 0x3fd   :  { %4584 = vmatprep.mubr.bf16.mxu1 %v4416_v43 }
 0x3fe   :  { %4585 = vmatmul.mubr.bf16.vlgmr.msra.gmra.mrb[4].mxu1 %v4415_v42 }
 0x3ff   :  { %5497 = vmatpush3.bf16.msra.mxu1 %v6490_v16  ;;  %5512 = vmatprep.mubr.msk.bf16.mxu1 %vm6507_vm0, %v6506_v30 }
 0x400   :  { %5498 = vmatprep.subr.bf16.mxu1 %v6506_v30 }
 0x403   :  { %5499 = vmatpush3.bf16.msra.mxu1 %v6491_v13 }
 0x404   :  { %5500 = vmatprep.subr.bf16.mxu1 %v6506_v30 }
 0x407   :  { %5501 = vmatpush3.bf16.msra.mxu1 %v6492_v15 }
 0x408   :  { %5502 = vmatprep.subr.bf16.mxu1 %v6506_v30 }
 0x40b   :  { %5503 = vmatpush3.bf16.msra.mxu1 %v6493_v44 }
 0x40c   :  { %5504 = vmatprep.subr.bf16.mxu1 %v6506_v30 }
 0x40f   :  { %5505 = vmatpush3.bf16.msra.mxu1 %v6494_v45 }
 0x410   :  { %5506 = vmatprep.subr.bf16.mxu1 %v6506_v30 }
 0x413   :  { %5507 = vmatpush3.bf16.msra.mxu1 %v6495_v46 }
 0x414   :  { %5508 = vmatprep.subr.bf16.mxu1 %v6506_v30 }
 0x417   :  { %5509 = vmatpush3.bf16.msra.mxu1 %v6496_v47 }
 0x418   :  { %5510 = vmatprep.subr.bf16.mxu1 %v6506_v30 }
 0x41b   :  { %5511 = vmatpush3.bf16.msra.mxu1 %v6497_v48 }
 0x41c   :  { %5516 = vmatprep.subr.bf16.mxu1 %v6506_v30 }
 0x4d1   :  { %v5472_v49 = vpop.f32.mrb[4].mxu1 }
 0x4d2   :  { %v5473_v51 = vpop.f32.mrb[5].mxu1 }
 0x4d3   :  { %v5474_v52 = vadd.f32 %v5473_v51, %v5472_v49  ;;  %v5475_v53 = vpop.f32.mrb[6].mxu1 }
 0x4d4   :  { %v5476_v54 = vpop.f32.mrb[7].mxu1 }
 0x4d5   :  { %v4587_v55 = vadd.f32 %v5474_v52, %v5421_v50  ;;  %v5477_v56 = vadd.f32 %v5476_v54, %v5475_v53 }
 0x4d7   :  { %v4590_v57 = vadd.f32 %v5477_v56, %v5421_v50  ;;  %v4593_v58 = vmax.f32 %v4587_v55, 0.0 }
 0x4d9   :  { %v4594_v59 = vmax.f32 %v4590_v57, 0.0 }
 0x4db   :  { %v4595_v61 = vpack.c.bf16 %v4594_v59, %v4593_v58 }
 0x4dd   :  { %5513 = vmatmul.mubr.bf16.vlgmr.msra.gmra.mrb[8].mxu1 %v4595_v61 }
 0x4de   :  { %5517 = vmatpush3.bf16.msra.mxu1 %v6498_v60  ;;  %5532 = vmatprep.mubr.msk.bf16.mxu1 %vm6507_vm0, %v6506_v30 }
 0x4df   :  { %5518 = vmatprep.subr.bf16.mxu1 %v6506_v30 }
 0x4e2   :  { %5519 = vmatpush3.bf16.msra.mxu1 %v6499_v62 }
 0x4e3   :  { %5520 = vmatprep.subr.bf16.mxu1 %v6506_v30 }
 0x4e6   :  { %5521 = vmatpush3.bf16.msra.mxu1 %v6500_v63 }
 0x4e7   :  { %5522 = vmatprep.subr.bf16.mxu1 %v6506_v30 }
 0x4ea   :  { %5523 = vmatpush3.bf16.msra.mxu1 %v6501_v0 }
 0x4eb   :  { %5524 = vmatprep.subr.bf16.mxu1 %v6506_v30 }
 0x4ee   :  { %5525 = vmatpush3.bf16.msra.mxu1 %v6502_v1 }
 0x4ef   :  { %5526 = vmatprep.subr.bf16.mxu1 %v6506_v30 }
 0x4f2   :  { %5527 = vmatpush3.bf16.msra.mxu1 %v6503_v2 }
 0x4f3   :  { %5528 = vmatprep.subr.bf16.mxu1 %v6506_v30 }
 0x4f6   :  { %5529 = vmatpush3.bf16.msra.mxu1 %v6504_v3 }
 0x4f7   :  { %5530 = vmatprep.subr.bf16.mxu1 %v6506_v30 }
 0x4fa   :  { %5531 = vmatpush3.bf16.msra.mxu1 %v6505_v4 }
 0x5b0   :  { %v4701_v6 = vpop.f32.mrb[8].mxu1 }
 0x5b1   :  { %v4702_v7 = vadd.f32 %v5438_v5, %v4701_v6  ;;  %v5514_v8 = vpop.f32.mrb[9].mxu1 }
 0x5b2   :  { %v4704_v9 = vpop.f32.mrb[10].mxu1 }
 0x5b3   :  { %v4705_v10 = vadd.f32 %v5438_v5, %v4704_v9  ;;  %v5515_v11 = vpop.f32.mrb[11].mxu1  ;;  %v4708_v12 = vmax.f32 %v4702_v7, 0.0 }
 0x5b5   :  { %v4709_v17 = vmax.f32 %v4705_v10, 0.0 }
 0x5b7   :  { %v4710_v20 = vpack.c.bf16 %v4709_v17, %v4708_v12 }
 0x5b9   :  { %5533 = vmatmul.mubr.bf16.vlgmr.msra.gmra.mrb[12].mxu1 %v4710_v20 }
 0x68c   :  { %v4816_v23 = vpop.f32.mrb[12].mxu1 }
 0x68d   :  { %v4817_v18 = vadd.f32 %v5447_v22, %v4816_v23  ;;  %v5534_v25 = vpop.f32.mrb[13].mxu1 }
 0x68e   :  { %v4819_v26 = vpop.f32.mrb[14].mxu1 }
 0x68f   :  { %4823 = vst [vmem:[%s8565_s11] sm:$0xff] %v4817_v18  ;;  %v4820_v27 = vadd.f32 %v5447_v22, %v4819_v26  ;;  %v5535_v28 = vpop.f32.mrb[15].mxu1 }
 0x691   :  { %4824 = vst [vmem:[%s8565_s11 + $0x8] sm:$0xff] %v4820_v27 }

</bundles_post_ra>
